<compile_context>
chip_gen: v5e
topology: v5e:2x2
jax: 0.10.0
libtpu: 0.0.40
codegen_flags: <defaults>
</compile_context>

<pallas_src>
import functools
import math

import jax
import jax.numpy as jnp
from jax import lax
from jax.experimental import pallas as pl
from jax.experimental.pallas import tpu as pltpu

LN_EPS = 1e-12               # HF ViT/BERT layer_norm_eps default (torch LN default is 1e-5)
MXU_DTYPE = jnp.bfloat16     # MXU operand dtype (f32 accumulation)
NEG_INF = -1e9


# ---------------------------------------------------------------------------
# value-level helpers (used *inside* kernels)
# ---------------------------------------------------------------------------
def _dot(a, b):
    # Weights are already bf16 (prepare_params) so their astype is a no-op;
    # only the activation cast is real work.  f32 accumulation.
    return jnp.dot(a.astype(MXU_DTYPE), b.astype(MXU_DTYPE),
                   preferred_element_type=jnp.float32)


def _ln(x, g, b):
    mean = jnp.mean(x, axis=-1, keepdims=True)
    var = jnp.mean(jnp.square(x - mean), axis=-1, keepdims=True)
    return (x - mean) * lax.rsqrt(var + LN_EPS) * g + b


def _gelu(x):
    # TODO(synk): HF ViT/BERT default to exact (erf) GELU; the tanh approximation
    # is kept to guarantee a clean Mosaic lowering on all TPU generations.
    return jax.nn.gelu(x, approximate=True)


def _attn_bias(bidc_ref, bidr_ref, keyb_ref):
    # (N, N) additive attention bias computed in-kernel from O(N) inputs:
    # 0 where query & key share a batch element and the key is not padding,
    # -1e9 otherwise.  Cheap VPU filler hidden under the MXU; keeps O(N^2)
    # data out of HBM and VMEM residency.
    same = bidc_ref[...] == bidr_ref[...]
    return jnp.where(same, keyb_ref[...], NEG_INF)


def _mha(x, wqkv, bqkv, wo, bo, bias, o_scr, *, D, H):
    """Fused multi-head self-attention on a flat (N, D) activation.

    * packed QKV: one (D, 3D) matmul; 1/sqrt(Dh) folded into the Q columns
      of wqkv/bqkv at param-prep time.
    * K transposed ONCE per layer; per-head K^T slices are sublane slices.
    * head outputs written into o_scr columns, output projection is ONE
      full-contraction (K = D) matmul.
    """
    Dh = D // H
    qkv = _dot(x, wqkv) + bqkv                       # (N, 3D) f32
    kT = jnp.transpose(qkv[:, D:2 * D])              # (D, N): one XLU transpose/layer
    # TODO(synk): for production H=12 / long sequences, convert this static
    # unroll to lax.fori_loop and add online-softmax KV tiling to bound the
    # per-head (N, N) live ranges.
    for h in range(H):                               # static unroll (small H)
        qh = qkv[:, h * Dh:(h + 1) * Dh]             # (N, Dh) -- scale pre-folded
        khT = kT[h * Dh:(h + 1) * Dh, :]             # (Dh, N) sublane slice
        vh = qkv[:, 2 * D + h * Dh:2 * D + (h + 1) * Dh]
        s = _dot(qh, khT) + bias                     # (N, N)
        s = s - jnp.max(s, axis=-1, keepdims=True)
        p = jnp.exp(s)
        p = p * pl.reciprocal(jnp.sum(p, axis=-1, keepdims=True), approx=True)
        o_scr[:, h * Dh:(h + 1) * Dh] = _dot(p, vh)  # (N, Dh)
    return _dot(o_scr[...], wo) + bo                 # single full-K output proj


def _mlp(x, w1, b1, w2, b2):
    h = _gelu(_dot(x, w1) + b1)
    return _dot(h, w2) + b2


# ---------------------------------------------------------------------------
# fused encoder kernels (grid axis = transformer layer, "arbitrary")
# ---------------------------------------------------------------------------
def _vit_encoder_kernel(x0_ref, bidc_ref, bidr_ref, keyb_ref, lnf_ref,
                        wqkv_ref, bqkv_ref, wo_ref, bo_ref,
                        w1_ref, b1_ref, w2_ref, b2_ref, lns_ref,
                        out_ref, x_scr, o_scr, *, B, D, H):
    l = pl.program_id(0)

    @pl.when(l == 0)
    def _init():                                     # embeddings computed in XLA
        x_scr[...] = x0_ref[...]

    bias = _attn_bias(bidc_ref, bidr_ref, keyb_ref)
    lns = lns_ref[0]                                 # (4, D): ln1_g, ln1_b, ln2_g, ln2_b
    x = x_scr[...]
    # pre-LN transformer block
    h = _ln(x, lns[0:1, :], lns[1:2, :])
    x = x + _mha(h, wqkv_ref[0], bqkv_ref[0], wo_ref[0], bo_ref[0], bias,
                 o_scr, D=D, H=H)
    h2 = _ln(x, lns[2:3, :], lns[3:4, :])
    x = x + _mlp(h2, w1_ref[0], b1_ref[0], w2_ref[0], b2_ref[0])
    x_scr[...] = x

    @pl.when(l == pl.num_programs(0) - 1)
    def _finalize():
        # token-major layout -> CLS tokens are the first B contiguous rows;
        # final LN applied only to those rows (LN is per-row), one dense store.
        out_ref[...] = _ln(x[0:B, :], lnf_ref[0:1, :], lnf_ref[1:2, :])


def _bert_encoder_kernel(x0_ref, bidc_ref, bidr_ref, keyb_ref,
                         wqkv_ref, bqkv_ref, wo_ref, bo_ref,
                         w1_ref, b1_ref, w2_ref, b2_ref, lns_ref,
                         out_ref, x_scr, o_scr, *, B, D, H):
    l = pl.program_id(0)

    @pl.when(l == 0)
    def _init():                                     # embeddings + emb-LN in XLA
        x_scr[...] = x0_ref[...]

    bias = _attn_bias(bidc_ref, bidr_ref, keyb_ref)
    lns = lns_ref[0]
    x = x_scr[...]
    # post-LN transformer block
    a = _mha(x, wqkv_ref[0], bqkv_ref[0], wo_ref[0], bo_ref[0], bias,
             o_scr, D=D, H=H)
    x = _ln(x + a, lns[0:1, :], lns[1:2, :])
    m = _mlp(x, w1_ref[0], b1_ref[0], w2_ref[0], b2_ref[0])
    x = _ln(x + m, lns[2:3, :], lns[3:4, :])
    x_scr[...] = x

    @pl.when(l == pl.num_programs(0) - 1)
    def _finalize():
        out_ref[...] = x[0:B, :]                     # CLS rows (token-major)


def _head_kernel(img_ref, txt_ref, fc_wi_ref, fc_wt_ref, fc_b_ref,
                 out_w_ref, out_b_ref, o_ref):
    # concat(img, txt) @ fc_w == img @ fc_w[:Dv] + txt @ fc_w[Dv:]
    h = (jnp.dot(img_ref[...], fc_wi_ref[...], preferred_element_type=jnp.float32)
         + jnp.dot(txt_ref[...], fc_wt_ref[...], preferred_element_type=jnp.float32)
         + fc_b_ref[...])
    h = jnp.maximum(h, 0.0)
    # hidden -> 1 as a VPU multiply + cross-lane reduce (no N=1 MXU pass)
    o_ref[...] = jnp.sum(h * out_w_ref[...], axis=-1, keepdims=True) + out_b_ref[...]


# ---------------------------------------------------------------------------
# BlockSpec / cost / VMEM helpers
# ---------------------------------------------------------------------------
def _const_spec(shape):
    n = len(shape)
    return pl.BlockSpec(tuple(shape), lambda l, _n=n: (0,) * _n)


def _layer_spec(shape):
    n = len(shape)
    return pl.BlockSpec((1,) + tuple(shape[1:]),
                        lambda l, _n=n: (l,) + (0,) * (_n - 1))


def _cost_estimate(args, out_shape, flops, transcendentals):
    bytes_accessed = sum(int(math.prod(a.shape)) * a.dtype.itemsize for a in args)
    bytes_accessed += int(math.prod(out_shape)) * 4
    return pl.CostEstimate(flops=int(flops), transcendentals=int(transcendentals),
                           bytes_accessed=int(bytes_accessed))


def _vmem_limit_bytes(const_args, layer_args, scratch_bytes):
    # resident consts + double-buffered per-layer weight windows + scratch
    # + compiler headroom, clamped to the v7x 64 MiB physical budget.
    const_b = sum(int(math.prod(a.shape)) * a.dtype.itemsize for a in const_args)
    layer_b = sum(int(math.prod(a.shape[1:])) * a.dtype.itemsize for a in layer_args)
    need = 2 * (const_b + layer_b) + scratch_bytes + (8 << 20)
    return int(min(max(need, 16 << 20), 64 << 20))


def _token_major_ids(B, S):
    # token-major layout: row index = s*B + b  ->  batch id of row i is i % B
    return jnp.tile(jnp.arange(B, dtype=jnp.int32), S)


# ---------------------------------------------------------------------------
# encoder / head wrappers (one pallas_call each)
# ---------------------------------------------------------------------------
def vit_encoder(image, p, *, num_heads, patch_size):
    B, C, Hi, Wi = image.shape
    P = patch_size
    nP = (Hi // P) * (Wi // P)
    S = nP + 1
    D = p["patch_w"].shape[1]
    L = p["wqkv"].shape[0]
    mD = p["w1"].shape[-1]
    N = B * S

    # Layer-0-only work in plain XLA (layout plumbing + one small matmul); the
    # kernel keeps only the (N, D) initial activation resident.
    patches = (image.reshape(B, C, Hi // P, P, Wi // P, P)
               .transpose(0, 2, 4, 1, 3, 5)
               .reshape(B, nP, C * P * P))
    emb = patches @ p["patch_w"] + p["patch_b"]                    # (B, nP, D)
    cls = jnp.broadcast_to(p["cls"][None], (B, 1, D))
    x = jnp.concatenate([cls, emb], axis=1) + p["pos"][None]       # (B, S, D)
    x0 = x.transpose(1, 0, 2).reshape(N, D).astype(jnp.float32)    # token-major

    bid = _token_major_ids(B, S)
    bid_col = bid.reshape(N, 1)
    bid_row = bid.reshape(1, N)
    keyb = jnp.zeros((1, N), jnp.float32)                          # ViT: no padding

    const_args = (x0, bid_col, bid_row, keyb, p["lnf"])
    layer_args = (p["wqkv"], p["bqkv"], p["wo"], p["bo"],
                  p["w1"], p["b1"], p["w2"], p["b2"], p["lns"])
    args = const_args + layer_args
    in_specs = ([_const_spec(a.shape) for a in const_args]
                + [_layer_spec(a.shape) for a in layer_args])

    flops = L * (2 * N * D * 3 * D + 4 * N * N * D + 2 * N * D * D + 4 * N * D * mD)
    transc = L * (num_heads * N * N + N * mD)
    scratch_bytes = 2 * N * D * 4

    kernel = functools.partial(_vit_encoder_kernel, B=B, D=D, H=num_heads)
    return pl.pallas_call(
        kernel,
        out_shape=jax.ShapeDtypeStruct((B, D), jnp.float32),
        grid=(L,),
        in_specs=in_specs,
        out_specs=pl.BlockSpec((B, D), lambda l: (0, 0)),
        scratch_shapes=[pltpu.VMEM((N, D), jnp.float32),    # activation carry
                        pltpu.VMEM((N, D), jnp.float32)],   # per-layer head concat
        compiler_params=pltpu.CompilerParams(
            dimension_semantics=("arbitrary",),
            vmem_limit_bytes=_vmem_limit_bytes(const_args, layer_args, scratch_bytes)),
        cost_estimate=_cost_estimate(args, (B, D), flops, transc),
    )(*args)


def bert_encoder(input_ids, attention_mask, p, *, num_heads):
    B, S = input_ids.shape
    D = p["word_emb"].shape[1]
    L = p["wqkv"].shape[0]
    mD = p["w1"].shape[-1]
    N = B * S

    # Embedding lookup (data-dependent gather) + embedding LayerNorm in XLA;
    # the kernel receives only the (N, D) initial activation.
    emb = (jnp.take(p["word_emb"], input_ids, axis=0)
           + p["pos_emb"][None, :S, :] + p["type_emb"][0][None, None, :])
    g, b = p["emb_ln"][0], p["emb_ln"][1]
    mean = jnp.mean(emb, axis=-1, keepdims=True)
    var = jnp.mean(jnp.square(emb - mean), axis=-1, keepdims=True)
    x = (emb - mean) * lax.rsqrt(var + LN_EPS) * g + b             # (B, S, D)
    x0 = x.transpose(1, 0, 2).reshape(N, D).astype(jnp.float32)    # token-major

    bid = _token_major_ids(B, S)
    bid_col = bid.reshape(N, 1)
    bid_row = bid.reshape(1, N)
    keep = attention_mask.astype(bool).T.reshape(1, N)             # token-major keys
    keyb = jnp.where(keep, 0.0, NEG_INF).astype(jnp.float32)

    const_args = (x0, bid_col, bid_row, keyb)
    layer_args = (p["wqkv"], p["bqkv"], p["wo"], p["bo"],
                  p["w1"], p["b1"], p["w2"], p["b2"], p["lns"])
    args = const_args + layer_args
    in_specs = ([_const_spec(a.shape) for a in const_args]
                + [_layer_spec(a.shape) for a in layer_args])

    flops = L * (2 * N * D * 3 * D + 4 * N * N * D + 2 * N * D * D + 4 * N * D * mD)
    transc = L * (num_heads * N * N + N * mD)
    scratch_bytes = 2 * N * D * 4

    kernel = functools.partial(_bert_encoder_kernel, B=B, D=D, H=num_heads)
    return pl.pallas_call(
        kernel,
        out_shape=jax.ShapeDtypeStruct((B, D), jnp.float32),
        grid=(L,),
        in_specs=in_specs,
        out_specs=pl.BlockSpec((B, D), lambda l: (0, 0)),
        scratch_shapes=[pltpu.VMEM((N, D), jnp.float32),
                        pltpu.VMEM((N, D), jnp.float32)],
        compiler_params=pltpu.CompilerParams(
            dimension_semantics=("arbitrary",),
            vmem_limit_bytes=_vmem_limit_bytes(const_args, layer_args, scratch_bytes)),
        cost_estimate=_cost_estimate(args, (B, D), flops, transc),
    )(*args)


def fusion_head(img_feat, txt_feat, params):
    B, Dv = img_feat.shape
    # TODO(synk): at a latency-critical join this tiny head could be folded
    # into plain XLA to drop one kernel launch; kept in Pallas so the module's
    # own fc / ReLU / output layers stay in-kernel.
    args = (img_feat, txt_feat,
            params["fc_w"][:Dv, :], params["fc_w"][Dv:, :],
            params["fc_b"], params["out_wT"], params["out_b"])
    return pl.pallas_call(
        _head_kernel,
        out_shape=jax.ShapeDtypeStruct((B, 1), jnp.float32),
        grid=(1,),
        in_specs=[_const_spec(a.shape) for a in args],
        out_specs=_const_spec((B, 1)),
    )(*args)


# ---------------------------------------------------------------------------
# full multimodal forward (matches MultiModalModel.forward)
# ---------------------------------------------------------------------------
def multimodal_forward(image, input_ids, attention_mask, params, config):
    # TODO(synk): on v7x (2 TensorCores/chip) the two independent encoder
    # calls should be merged into one CORE_PARALLEL pallas_call (or verified
    # to overlap in xprof); kept as two independent custom calls here so XLA
    # may schedule them concurrently.
    img_feat = vit_encoder(image, params["vit"],
                           num_heads=config["vit_heads"],
                           patch_size=config["patch_size"])        # (B, Dv)
    txt_feat = bert_encoder(input_ids, attention_mask, params["bert"],
                            num_heads=config["bert_heads"])        # (B, Db)
    return fusion_head(img_feat, txt_feat, params)                 # (B, 1)


# ---------------------------------------------------------------------------
# deterministic synthetic parameter initialization + one-time param prep
# ---------------------------------------------------------------------------
def init_params(key, *, vocab=100, max_pos=16, vit_hidden=32, bert_hidden=32,
                vit_heads=4, bert_heads=4, vit_layers=2, bert_layers=2,
                mlp_mult=2, patch_size=8, img_channels=3, img_size=16,
                hidden_dim=32):
    ks = iter(jax.random.split(key, 64))

    def dense(shape):
        return jax.random.normal(next(ks), shape, jnp.float32) * 0.02

    def zeros(shape):
        return jnp.zeros(shape, jnp.float32)

    def enc_layers(L, D):
        mD = D * mlp_mult
        ln_unit = jnp.stack([jnp.ones((D,)), jnp.zeros((D,)),
                             jnp.ones((D,)), jnp.zeros((D,))]).astype(jnp.float32)
        return {
            "wqkv": dense((L, D, 3 * D)), "bqkv": zeros((L, 1, 3 * D)),
            "wo": dense((L, D, D)), "bo": zeros((L, 1, D)),
            "w1": dense((L, D, mD)), "b1": zeros((L, 1, mD)),
            "w2": dense((L, mD, D)), "b2": zeros((L, 1, D)),
            # per-layer LN params, rows: [ln1_g, ln1_b, ln2_g, ln2_b]
            "lns": jnp.tile(ln_unit[None], (L, 1, 1)),
        }

    nP = (img_size // patch_size) ** 2
    Dv, Db = vit_hidden, bert_hidden
    vit = {
        "patch_w": dense((img_channels * patch_size * patch_size, Dv)),
        "patch_b": zeros((1, Dv)),
        "cls": dense((1, Dv)),
        "pos": dense((nP + 1, Dv)),
        "lnf": jnp.stack([jnp.ones((Dv,)), jnp.zeros((Dv,))]).astype(jnp.float32),
        **enc_layers(vit_layers, Dv),
    }
    bert = {
        "word_emb": dense((vocab, Db)),
        "pos_emb": dense((max_pos, Db)),
        "type_emb": dense((2, Db)),
        "emb_ln": jnp.stack([jnp.ones((Db,)), jnp.zeros((Db,))]).astype(jnp.float32),
        **enc_layers(bert_layers, Db),
    }
    params = {
        "vit": vit, "bert": bert,
        # fusion head: Linear(Dv+Db -> hidden_dim) -> ReLU -> Linear(hidden_dim -> 1)
        "fc_w": dense((Dv + Db, hidden_dim)),
        "fc_b": zeros((1, hidden_dim)),
        "out_wT": dense((1, hidden_dim)),   # Linear(hidden_dim, 1) weight, transposed
        "out_b": zeros((1, 1)),
    }
    config = {"vit_heads": vit_heads, "bert_heads": bert_heads,
              "patch_size": patch_size}
    return params, config


def prepare_params(params, config):
    """One-time parameter prep: fold 1/sqrt(Dh) into the Q columns of the
    packed QKV weight/bias and store the streamed transformer weights in bf16
    (halves HBM->VMEM DMA and the double-buffered VMEM footprint)."""
    def prep(p, heads):
        D = p["wqkv"].shape[1]
        scale = 1.0 / math.sqrt(D // heads)
        qscale = jnp.concatenate([jnp.full((D,), scale, jnp.float32),
                                  jnp.ones((2 * D,), jnp.float32)])
        q = dict(p)
        q["wqkv"] = (p["wqkv"] * qscale).astype(MXU_DTYPE)
        q["bqkv"] = p["bqkv"] * qscale            # biases stay f32
        q["wo"] = p["wo"].astype(MXU_DTYPE)
        q["w1"] = p["w1"].astype(MXU_DTYPE)
        q["w2"] = p["w2"].astype(MXU_DTYPE)
        return q

    out = dict(params)
    out["vit"] = prep(params["vit"], config["vit_heads"])
    out["bert"] = prep(params["bert"], config["bert_heads"])
    return out


if __name__ == "__main__":
    key = jax.random.PRNGKey(0)
    pkey, ikey, tkey = jax.random.split(key, 3)

    params, config = init_params(pkey)
    params = prepare_params(params, config)        # bf16 weights + scale fold

    B, C, H, W = 2, 3, 16, 16
    S = 8
    image = jax.random.normal(ikey, (B, C, H, W), jnp.float32)          # NCHW
    input_ids = jax.random.randint(tkey, (B, S), 0, 100).astype(jnp.int32)
    attention_mask = jnp.array(
        [[1, 1, 1, 1, 1, 1, 0, 0],
         [1, 1, 1, 1, 1, 1, 1, 1]], dtype=jnp.int32)

    fwd = jax.jit(functools.partial(multimodal_forward, config=config))
    out = fwd(image, input_ids, attention_mask, params)
    out = jax.block_until_ready(out)
    assert out.shape == (B, 1) and out.dtype == jnp.float32
    print("KERNEL_OK")
</pallas_src>

<mosaic_0001>
module attributes {stable_mosaic.version = 11 : i64} {
  func.func @_vit_encoder_kernel(%arg0: i32, %arg1: memref<10x32xf32, #tpu.memory_space<vmem>>, %arg2: memref<10x1xi32, #tpu.memory_space<vmem>>, %arg3: memref<1x10xi32, #tpu.memory_space<vmem>>, %arg4: memref<1x10xf32, #tpu.memory_space<vmem>>, %arg5: memref<2x32xf32, #tpu.memory_space<vmem>>, %arg6: memref<1x32x96xbf16, #tpu.memory_space<vmem>>, %arg7: memref<1x1x96xf32, #tpu.memory_space<vmem>>, %arg8: memref<1x32x32xbf16, #tpu.memory_space<vmem>>, %arg9: memref<1x1x32xf32, #tpu.memory_space<vmem>>, %arg10: memref<1x32x64xbf16, #tpu.memory_space<vmem>>, %arg11: memref<1x1x64xf32, #tpu.memory_space<vmem>>, %arg12: memref<1x64x32xbf16, #tpu.memory_space<vmem>>, %arg13: memref<1x1x32xf32, #tpu.memory_space<vmem>>, %arg14: memref<1x4x32xf32, #tpu.memory_space<vmem>>, %arg15: memref<2x32xf32, #tpu.memory_space<vmem>>, %arg16: memref<10x32xf32, #tpu.memory_space<vmem>>, %arg17: memref<10x32xf32, #tpu.memory_space<vmem>>) attributes {dimension_semantics = [#tpu.dimension_semantics<arbitrary>], iteration_bounds = array<i64: 2>, scalar_prefetch = 0 : i64, scratch_operands = 2 : i64, tpu.core_type = #tpu.core_type<tc>, window_params = [{pipeline_mode = #tpu.pipeline_mode<synchronous>, transform_indices = @transform_0, window_bounds = array<i64: 10, 32>}, {pipeline_mode = #tpu.pipeline_mode<synchronous>, transform_indices = @transform_1, window_bounds = array<i64: 10, 1>}, {pipeline_mode = #tpu.pipeline_mode<synchronous>, transform_indices = @transform_2, window_bounds = array<i64: 1, 10>}, {pipeline_mode = #tpu.pipeline_mode<synchronous>, transform_indices = @transform_3, window_bounds = array<i64: 1, 10>}, {pipeline_mode = #tpu.pipeline_mode<synchronous>, transform_indices = @transform_4, window_bounds = array<i64: 2, 32>}, {transform_indices = @transform_5, window_bounds = array<i64: 1, 32, 96>}, {transform_indices = @transform_6, window_bounds = array<i64: 1, 1, 96>}, {transform_indices = @transform_7, window_bounds = array<i64: 1, 32, 32>}, {transform_indices = @transform_8, window_bounds = array<i64: 1, 1, 32>}, {transform_indices = @transform_9, window_bounds = array<i64: 1, 32, 64>}, {transform_indices = @transform_10, window_bounds = array<i64: 1, 1, 64>}, {transform_indices = @transform_11, window_bounds = array<i64: 1, 64, 32>}, {transform_indices = @transform_12, window_bounds = array<i64: 1, 1, 32>}, {transform_indices = @transform_13, window_bounds = array<i64: 1, 4, 32>}, {pipeline_mode = #tpu.pipeline_mode<synchronous>, transform_indices = @transform_14, window_bounds = array<i64: 2, 32>}]} {
    %c0_i32 = arith.constant 0 : i32
    %0 = arith.cmpi eq, %arg0, %c0_i32 : i32
    %1 = arith.extui %0 : i1 to i32
    %c0_i32_0 = arith.constant 0 : i32
    %2 = arith.cmpi ne, %1, %c0_i32_0 : i32
    scf.if %2 {
      %c0_79 = arith.constant 0 : index
      %c0_80 = arith.constant 0 : index
      %202 = vector.load %arg1[%c0_79, %c0_80] : memref<10x32xf32, #tpu.memory_space<vmem>>, vector<10x32xf32>
      %c0_81 = arith.constant 0 : index
      %c0_82 = arith.constant 0 : index
      %203 = vector.load %arg16[%c0_81, %c0_82] : memref<10x32xf32, #tpu.memory_space<vmem>>, vector<10x32xf32>
      tpu.vector_store %arg16[%c0_81, %c0_82], %202 {strides = array<i32>} : memref<10x32xf32, #tpu.memory_space<vmem>>, vector<10x32xf32>,
    } else {
    }
    %c0 = arith.constant 0 : index
    %c0_1 = arith.constant 0 : index
    %3 = vector.load %arg2[%c0, %c0_1] : memref<10x1xi32, #tpu.memory_space<vmem>>, vector<10x1xi32>
    %c0_2 = arith.constant 0 : index
    %c0_3 = arith.constant 0 : index
    %4 = vector.load %arg3[%c0_2, %c0_3] : memref<1x10xi32, #tpu.memory_space<vmem>>, vector<1x10xi32>
    %5 = vector.broadcast %3 : vector<10x1xi32> to vector<10x10xi32>
    %6 = vector.broadcast %4 : vector<1x10xi32> to vector<10x10xi32>
    %7 = arith.cmpi eq, %5, %6 : vector<10x10xi32>
    %c0_4 = arith.constant 0 : index
    %c0_5 = arith.constant 0 : index
    %8 = vector.load %arg4[%c0_4, %c0_5] : memref<1x10xf32, #tpu.memory_space<vmem>>, vector<1x10xf32>
    %cst = arith.constant -1.000000e+09 : f32
    %9 = vector.shape_cast %8 : vector<1x10xf32> to vector<1x10xf32>
    %10 = vector.broadcast %9 : vector<1x10xf32> to vector<10x10xf32>
    %11 = vector.broadcast %cst : f32 to vector<10x10xf32>
    %12 = arith.select %7, %10, %11 : vector<10x10xi1>, vector<10x10xf32>
    %c0_6 = arith.constant 0 : index
    %c0_7 = arith.constant 0 : index
    %c0_8 = arith.constant 0 : index
    %13 = vector.load %arg14[%c0_6, %c0_7, %c0_8] : memref<1x4x32xf32, #tpu.memory_space<vmem>>, vector<1x4x32xf32>
    %14 = vector.shape_cast %13 : vector<1x4x32xf32> to vector<4x32xf32>
    %c0_9 = arith.constant 0 : index
    %c0_10 = arith.constant 0 : index
    %15 = vector.load %arg16[%c0_9, %c0_10] : memref<10x32xf32, #tpu.memory_space<vmem>>, vector<10x32xf32>
    %16 = vector.extract_strided_slice %14 {offsets = [0, 0], sizes = [1, 32], strides = [1, 1]} : vector<4x32xf32> to vector<1x32xf32>
    %17 = vector.extract_strided_slice %14 {offsets = [1, 0], sizes = [1, 32], strides = [1, 1]} : vector<4x32xf32> to vector<1x32xf32>
    %cst_11 = arith.constant dense<0.000000e+00> : vector<10xf32>
    %18 = vector.multi_reduction <add>, %15, %cst_11 [1] : vector<10x32xf32> to vector<10xf32>
    %19 = vector.shape_cast %18 : vector<10xf32> to vector<10x1xf32>
    %cst_12 = arith.constant 3.200000e+01 : f32
    %20 = vector.broadcast %cst_12 : f32 to vector<10x1xf32>
    %21 = arith.divf %19, %20 : vector<10x1xf32>
    %22 = vector.broadcast %21 : vector<10x1xf32> to vector<10x32xf32>
    %23 = arith.subf %15, %22 : vector<10x32xf32>
    %24 = arith.mulf %23, %23 : vector<10x32xf32>
    %cst_13 = arith.constant dense<0.000000e+00> : vector<10xf32>
    %25 = vector.multi_reduction <add>, %24, %cst_13 [1] : vector<10x32xf32> to vector<10xf32>
    %26 = vector.shape_cast %25 : vector<10xf32> to vector<10x1xf32>
    %cst_14 = arith.constant 3.200000e+01 : f32
    %27 = vector.broadcast %cst_14 : f32 to vector<10x1xf32>
    %28 = arith.divf %26, %27 : vector<10x1xf32>
    %29 = vector.broadcast %21 : vector<10x1xf32> to vector<10x32xf32>
    %30 = arith.subf %15, %29 : vector<10x32xf32>
    %cst_15 = arith.constant 9.99999996E-13 : f32
    %31 = vector.broadcast %cst_15 : f32 to vector<10x1xf32>
    %32 = arith.addf %28, %31 : vector<10x1xf32>
    %33 = math.rsqrt %32 : vector<10x1xf32>
    %34 = vector.broadcast %33 : vector<10x1xf32> to vector<10x32xf32>
    %35 = arith.mulf %30, %34 : vector<10x32xf32>
    %36 = vector.broadcast %16 : vector<1x32xf32> to vector<10x32xf32>
    %37 = arith.mulf %35, %36 : vector<10x32xf32>
    %38 = vector.broadcast %17 : vector<1x32xf32> to vector<10x32xf32>
    %39 = arith.addf %37, %38 : vector<10x32xf32>
    %c0_16 = arith.constant 0 : index
    %c0_17 = arith.constant 0 : index
    %c0_18 = arith.constant 0 : index
    %40 = vector.load %arg6[%c0_16, %c0_17, %c0_18] : memref<1x32x96xbf16, #tpu.memory_space<vmem>>, vector<1x32x96xbf16>
    %41 = vector.shape_cast %40 : vector<1x32x96xbf16> to vector<32x96xbf16>
    %c0_19 = arith.constant 0 : index
    %c0_20 = arith.constant 0 : index
    %c0_21 = arith.constant 0 : index
    %42 = vector.load %arg7[%c0_19, %c0_20, %c0_21] : memref<1x1x96xf32, #tpu.memory_space<vmem>>, vector<1x1x96xf32>
    %43 = vector.shape_cast %42 : vector<1x1x96xf32> to vector<1x96xf32>
    %c0_22 = arith.constant 0 : index
    %c0_23 = arith.constant 0 : index
    %c0_24 = arith.constant 0 : index
    %44 = vector.load %arg8[%c0_22, %c0_23, %c0_24] : memref<1x32x32xbf16, #tpu.memory_space<vmem>>, vector<1x32x32xbf16>
    %45 = vector.shape_cast %44 : vector<1x32x32xbf16> to vector<32x32xbf16>
    %c0_25 = arith.constant 0 : index
    %c0_26 = arith.constant 0 : index
    %c0_27 = arith.constant 0 : index
    %46 = vector.load %arg9[%c0_25, %c0_26, %c0_27] : memref<1x1x32xf32, #tpu.memory_space<vmem>>, vector<1x1x32xf32>
    %47 = vector.shape_cast %46 : vector<1x1x32xf32> to vector<1x32xf32>
    %48 = arith.truncf %39 : vector<10x32xf32> to vector<10x32xbf16>
    %cst_28 = arith.constant dense<0.000000e+00> : vector<10x96xf32>
    %49 = tpu.matmul %48, %41, %cst_28 {dimension_numbers = #tpu.dot_dimension_numbers<[1], [0], [0], [1], [0, 0, 1, 1], [], []>} : vector<10x32xbf16>, vector<32x96xbf16>, vector<10x96xf32> -> vector<10x96xf32>
    %50 = vector.broadcast %43 : vector<1x96xf32> to vector<10x96xf32>
    %51 = arith.addf %49, %50 : vector<10x96xf32>
    %52 = vector.extract_strided_slice %51 {offsets = [0, 32], sizes = [10, 32], strides = [1, 1]} : vector<10x96xf32> to vector<10x32xf32>
    %53 = tpu.transpose %52, [1, 0] : vector<10x32xf32> -> vector<32x10xf32>
    %54 = vector.extract_strided_slice %51 {offsets = [0, 0], sizes = [10, 8], strides = [1, 1]} : vector<10x96xf32> to vector<10x8xf32>
    %55 = vector.extract_strided_slice %53 {offsets = [0, 0], sizes = [8, 10], strides = [1, 1]} : vector<32x10xf32> to vector<8x10xf32>
    %56 = vector.extract_strided_slice %51 {offsets = [0, 64], sizes = [10, 8], strides = [1, 1]} : vector<10x96xf32> to vector<10x8xf32>
    %57 = arith.truncf %54 : vector<10x8xf32> to vector<10x8xbf16>
    %58 = arith.truncf %55 : vector<8x10xf32> to vector<8x10xbf16>
    %cst_29 = arith.constant dense<0.000000e+00> : vector<10x10xf32>
    %59 = tpu.matmul %57, %58, %cst_29 {dimension_numbers = #tpu.dot_dimension_numbers<[1], [0], [0], [1], [0, 0, 1, 1], [], []>} : vector<10x8xbf16>, vector<8x10xbf16>, vector<10x10xf32> -> vector<10x10xf32>
    %60 = arith.addf %59, %12 : vector<10x10xf32>
    %cst_30 = arith.constant dense<0xFF800000> : vector<10xf32>
    %61 = vector.multi_reduction <maximumf>, %60, %cst_30 [1] : vector<10x10xf32> to vector<10xf32>
    %62 = vector.shape_cast %61 : vector<10xf32> to vector<10x1xf32>
    %63 = vector.broadcast %62 : vector<10x1xf32> to vector<10x10xf32>
    %64 = arith.subf %60, %63 : vector<10x10xf32>
    %65 = math.exp %64 : vector<10x10xf32>
    %cst_31 = arith.constant dense<0.000000e+00> : vector<10xf32>
    %66 = vector.multi_reduction <add>, %65, %cst_31 [1] : vector<10x10xf32> to vector<10xf32>
    %67 = vector.shape_cast %66 : vector<10xf32> to vector<10x1xf32>
    %68 = tpu.reciprocal %67 {approx = true} : vector<10x1xf32> -> vector<10x1xf32>
    %69 = vector.broadcast %68 : vector<10x1xf32> to vector<10x10xf32>
    %70 = arith.mulf %65, %69 : vector<10x10xf32>
    %71 = arith.truncf %70 : vector<10x10xf32> to vector<10x10xbf16>
    %72 = arith.truncf %56 : vector<10x8xf32> to vector<10x8xbf16>
    %cst_32 = arith.constant dense<0.000000e+00> : vector<10x8xf32>
    %73 = tpu.matmul %71, %72, %cst_32 {dimension_numbers = #tpu.dot_dimension_numbers<[1], [0], [0], [1], [0, 0, 1, 1], [], []>} : vector<10x10xbf16>, vector<10x8xbf16>, vector<10x8xf32> -> vector<10x8xf32>
    %c0_33 = arith.constant 0 : index
    %c0_34 = arith.constant 0 : index
    %74 = vector.load %arg17[%c0_33, %c0_34] : memref<10x32xf32, #tpu.memory_space<vmem>>, vector<10x8xf32>
    tpu.vector_store %arg17[%c0_33, %c0_34], %73 {strides = array<i32>} : memref<10x32xf32, #tpu.memory_space<vmem>>, vector<10x8xf32>,
    %75 = vector.extract_strided_slice %51 {offsets = [0, 8], sizes = [10, 8], strides = [1, 1]} : vector<10x96xf32> to vector<10x8xf32>
    %76 = vector.extract_strided_slice %53 {offsets = [8, 0], sizes = [8, 10], strides = [1, 1]} : vector<32x10xf32> to vector<8x10xf32>
    %77 = vector.extract_strided_slice %51 {offsets = [0, 72], sizes = [10, 8], strides = [1, 1]} : vector<10x96xf32> to vector<10x8xf32>
    %78 = arith.truncf %75 : vector<10x8xf32> to vector<10x8xbf16>
    %79 = arith.truncf %76 : vector<8x10xf32> to vector<8x10xbf16>
    %cst_35 = arith.constant dense<0.000000e+00> : vector<10x10xf32>
    %80 = tpu.matmul %78, %79, %cst_35 {dimension_numbers = #tpu.dot_dimension_numbers<[1], [0], [0], [1], [0, 0, 1, 1], [], []>} : vector<10x8xbf16>, vector<8x10xbf16>, vector<10x10xf32> -> vector<10x10xf32>
    %81 = arith.addf %80, %12 : vector<10x10xf32>
    %cst_36 = arith.constant dense<0xFF800000> : vector<10xf32>
    %82 = vector.multi_reduction <maximumf>, %81, %cst_36 [1] : vector<10x10xf32> to vector<10xf32>
    %83 = vector.shape_cast %82 : vector<10xf32> to vector<10x1xf32>
    %84 = vector.broadcast %83 : vector<10x1xf32> to vector<10x10xf32>
    %85 = arith.subf %81, %84 : vector<10x10xf32>
    %86 = math.exp %85 : vector<10x10xf32>
    %cst_37 = arith.constant dense<0.000000e+00> : vector<10xf32>
    %87 = vector.multi_reduction <add>, %86, %cst_37 [1] : vector<10x10xf32> to vector<10xf32>
    %88 = vector.shape_cast %87 : vector<10xf32> to vector<10x1xf32>
    %89 = tpu.reciprocal %88 {approx = true} : vector<10x1xf32> -> vector<10x1xf32>
    %90 = vector.broadcast %89 : vector<10x1xf32> to vector<10x10xf32>
    %91 = arith.mulf %86, %90 : vector<10x10xf32>
    %92 = arith.truncf %91 : vector<10x10xf32> to vector<10x10xbf16>
    %93 = arith.truncf %77 : vector<10x8xf32> to vector<10x8xbf16>
    %cst_38 = arith.constant dense<0.000000e+00> : vector<10x8xf32>
    %94 = tpu.matmul %92, %93, %cst_38 {dimension_numbers = #tpu.dot_dimension_numbers<[1], [0], [0], [1], [0, 0, 1, 1], [], []>} : vector<10x10xbf16>, vector<10x8xbf16>, vector<10x8xf32> -> vector<10x8xf32>
    %c0_39 = arith.constant 0 : index
    %c8 = arith.constant 8 : index
    %95 = vector.load %arg17[%c0_39, %c8] : memref<10x32xf32, #tpu.memory_space<vmem>>, vector<10x8xf32>
    tpu.vector_store %arg17[%c0_39, %c8], %94 {strides = array<i32>} : memref<10x32xf32, #tpu.memory_space<vmem>>, vector<10x8xf32>,
    %96 = vector.extract_strided_slice %51 {offsets = [0, 16], sizes = [10, 8], strides = [1, 1]} : vector<10x96xf32> to vector<10x8xf32>
    %97 = vector.extract_strided_slice %53 {offsets = [16, 0], sizes = [8, 10], strides = [1, 1]} : vector<32x10xf32> to vector<8x10xf32>
    %98 = vector.extract_strided_slice %51 {offsets = [0, 80], sizes = [10, 8], strides = [1, 1]} : vector<10x96xf32> to vector<10x8xf32>
    %99 = arith.truncf %96 : vector<10x8xf32> to vector<10x8xbf16>
    %100 = arith.truncf %97 : vector<8x10xf32> to vector<8x10xbf16>
    %cst_40 = arith.constant dense<0.000000e+00> : vector<10x10xf32>
    %101 = tpu.matmul %99, %100, %cst_40 {dimension_numbers = #tpu.dot_dimension_numbers<[1], [0], [0], [1], [0, 0, 1, 1], [], []>} : vector<10x8xbf16>, vector<8x10xbf16>, vector<10x10xf32> -> vector<10x10xf32>
    %102 = arith.addf %101, %12 : vector<10x10xf32>
    %cst_41 = arith.constant dense<0xFF800000> : vector<10xf32>
    %103 = vector.multi_reduction <maximumf>, %102, %cst_41 [1] : vector<10x10xf32> to vector<10xf32>
    %104 = vector.shape_cast %103 : vector<10xf32> to vector<10x1xf32>
    %105 = vector.broadcast %104 : vector<10x1xf32> to vector<10x10xf32>
    %106 = arith.subf %102, %105 : vector<10x10xf32>
    %107 = math.exp %106 : vector<10x10xf32>
    %cst_42 = arith.constant dense<0.000000e+00> : vector<10xf32>
    %108 = vector.multi_reduction <add>, %107, %cst_42 [1] : vector<10x10xf32> to vector<10xf32>
    %109 = vector.shape_cast %108 : vector<10xf32> to vector<10x1xf32>
    %110 = tpu.reciprocal %109 {approx = true} : vector<10x1xf32> -> vector<10x1xf32>
    %111 = vector.broadcast %110 : vector<10x1xf32> to vector<10x10xf32>
    %112 = arith.mulf %107, %111 : vector<10x10xf32>
    %113 = arith.truncf %112 : vector<10x10xf32> to vector<10x10xbf16>
    %114 = arith.truncf %98 : vector<10x8xf32> to vector<10x8xbf16>
    %cst_43 = arith.constant dense<0.000000e+00> : vector<10x8xf32>
    %115 = tpu.matmul %113, %114, %cst_43 {dimension_numbers = #tpu.dot_dimension_numbers<[1], [0], [0], [1], [0, 0, 1, 1], [], []>} : vector<10x10xbf16>, vector<10x8xbf16>, vector<10x8xf32> -> vector<10x8xf32>
    %c0_44 = arith.constant 0 : index
    %c16 = arith.constant 16 : index
    %116 = vector.load %arg17[%c0_44, %c16] : memref<10x32xf32, #tpu.memory_space<vmem>>, vector<10x8xf32>
    tpu.vector_store %arg17[%c0_44, %c16], %115 {strides = array<i32>} : memref<10x32xf32, #tpu.memory_space<vmem>>, vector<10x8xf32>,
    %117 = vector.extract_strided_slice %51 {offsets = [0, 24], sizes = [10, 8], strides = [1, 1]} : vector<10x96xf32> to vector<10x8xf32>
    %118 = vector.extract_strided_slice %53 {offsets = [24, 0], sizes = [8, 10], strides = [1, 1]} : vector<32x10xf32> to vector<8x10xf32>
    %119 = vector.extract_strided_slice %51 {offsets = [0, 88], sizes = [10, 8], strides = [1, 1]} : vector<10x96xf32> to vector<10x8xf32>
    %120 = arith.truncf %117 : vector<10x8xf32> to vector<10x8xbf16>
    %121 = arith.truncf %118 : vector<8x10xf32> to vector<8x10xbf16>
    %cst_45 = arith.constant dense<0.000000e+00> : vector<10x10xf32>
    %122 = tpu.matmul %120, %121, %cst_45 {dimension_numbers = #tpu.dot_dimension_numbers<[1], [0], [0], [1], [0, 0, 1, 1], [], []>} : vector<10x8xbf16>, vector<8x10xbf16>, vector<10x10xf32> -> vector<10x10xf32>
    %123 = arith.addf %122, %12 : vector<10x10xf32>
    %cst_46 = arith.constant dense<0xFF800000> : vector<10xf32>
    %124 = vector.multi_reduction <maximumf>, %123, %cst_46 [1] : vector<10x10xf32> to vector<10xf32>
    %125 = vector.shape_cast %124 : vector<10xf32> to vector<10x1xf32>
    %126 = vector.broadcast %125 : vector<10x1xf32> to vector<10x10xf32>
    %127 = arith.subf %123, %126 : vector<10x10xf32>
    %128 = math.exp %127 : vector<10x10xf32>
    %cst_47 = arith.constant dense<0.000000e+00> : vector<10xf32>
    %129 = vector.multi_reduction <add>, %128, %cst_47 [1] : vector<10x10xf32> to vector<10xf32>
    %130 = vector.shape_cast %129 : vector<10xf32> to vector<10x1xf32>
    %131 = tpu.reciprocal %130 {approx = true} : vector<10x1xf32> -> vector<10x1xf32>
    %132 = vector.broadcast %131 : vector<10x1xf32> to vector<10x10xf32>
    %133 = arith.mulf %128, %132 : vector<10x10xf32>
    %134 = arith.truncf %133 : vector<10x10xf32> to vector<10x10xbf16>
    %135 = arith.truncf %119 : vector<10x8xf32> to vector<10x8xbf16>
    %cst_48 = arith.constant dense<0.000000e+00> : vector<10x8xf32>
    %136 = tpu.matmul %134, %135, %cst_48 {dimension_numbers = #tpu.dot_dimension_numbers<[1], [0], [0], [1], [0, 0, 1, 1], [], []>} : vector<10x10xbf16>, vector<10x8xbf16>, vector<10x8xf32> -> vector<10x8xf32>
    %c0_49 = arith.constant 0 : index
    %c24 = arith.constant 24 : index
    %137 = vector.load %arg17[%c0_49, %c24] : memref<10x32xf32, #tpu.memory_space<vmem>>, vector<10x8xf32>
    tpu.vector_store %arg17[%c0_49, %c24], %136 {strides = array<i32>} : memref<10x32xf32, #tpu.memory_space<vmem>>, vector<10x8xf32>,
    %c0_50 = arith.constant 0 : index
    %c0_51 = arith.constant 0 : index
    %138 = vector.load %arg17[%c0_50, %c0_51] : memref<10x32xf32, #tpu.memory_space<vmem>>, vector<10x32xf32>
    %139 = arith.truncf %138 : vector<10x32xf32> to vector<10x32xbf16>
    %cst_52 = arith.constant dense<0.000000e+00> : vector<10x32xf32>
    %140 = tpu.matmul %139, %45, %cst_52 {dimension_numbers = #tpu.dot_dimension_numbers<[1], [0], [0], [1], [0, 0, 1, 1], [], []>} : vector<10x32xbf16>, vector<32x32xbf16>, vector<10x32xf32> -> vector<10x32xf32>
    %141 = vector.broadcast %47 : vector<1x32xf32> to vector<10x32xf32>
    %142 = arith.addf %140, %141 : vector<10x32xf32>
    %143 = arith.addf %15, %142 : vector<10x32xf32>
    %144 = vector.extract_strided_slice %14 {offsets = [2, 0], sizes = [1, 32], strides = [1, 1]} : vector<4x32xf32> to vector<1x32xf32>
    %145 = vector.extract_strided_slice %14 {offsets = [3, 0], sizes = [1, 32], strides = [1, 1]} : vector<4x32xf32> to vector<1x32xf32>
    %cst_53 = arith.constant dense<0.000000e+00> : vector<10xf32>
    %146 = vector.multi_reduction <add>, %143, %cst_53 [1] : vector<10x32xf32> to vector<10xf32>
    %147 = vector.shape_cast %146 : vector<10xf32> to vector<10x1xf32>
    %cst_54 = arith.constant 3.200000e+01 : f32
    %148 = vector.broadcast %cst_54 : f32 to vector<10x1xf32>
    %149 = arith.divf %147, %148 : vector<10x1xf32>
    %150 = vector.broadcast %149 : vector<10x1xf32> to vector<10x32xf32>
    %151 = arith.subf %143, %150 : vector<10x32xf32>
    %152 = arith.mulf %151, %151 : vector<10x32xf32>
    %cst_55 = arith.constant dense<0.000000e+00> : vector<10xf32>
    %153 = vector.multi_reduction <add>, %152, %cst_55 [1] : vector<10x32xf32> to vector<10xf32>
    %154 = vector.shape_cast %153 : vector<10xf32> to vector<10x1xf32>
    %cst_56 = arith.constant 3.200000e+01 : f32
    %155 = vector.broadcast %cst_56 : f32 to vector<10x1xf32>
    %156 = arith.divf %154, %155 : vector<10x1xf32>
    %157 = vector.broadcast %149 : vector<10x1xf32> to vector<10x32xf32>
    %158 = arith.subf %143, %157 : vector<10x32xf32>
    %cst_57 = arith.constant 9.99999996E-13 : f32
    %159 = vector.broadcast %cst_57 : f32 to vector<10x1xf32>
    %160 = arith.addf %156, %159 : vector<10x1xf32>
    %161 = math.rsqrt %160 : vector<10x1xf32>
    %162 = vector.broadcast %161 : vector<10x1xf32> to vector<10x32xf32>
    %163 = arith.mulf %158, %162 : vector<10x32xf32>
    %164 = vector.broadcast %144 : vector<1x32xf32> to vector<10x32xf32>
    %165 = arith.mulf %163, %164 : vector<10x32xf32>
    %166 = vector.broadcast %145 : vector<1x32xf32> to vector<10x32xf32>
    %167 = arith.addf %165, %166 : vector<10x32xf32>
    %c0_58 = arith.constant 0 : index
    %c0_59 = arith.constant 0 : index
    %c0_60 = arith.constant 0 : index
    %168 = vector.load %arg10[%c0_58, %c0_59, %c0_60] : memref<1x32x64xbf16, #tpu.memory_space<vmem>>, vector<1x32x64xbf16>
    %169 = vector.shape_cast %168 : vector<1x32x64xbf16> to vector<32x64xbf16>
    %c0_61 = arith.constant 0 : index
    %c0_62 = arith.constant 0 : index
    %c0_63 = arith.constant 0 : index
    %170 = vector.load %arg11[%c0_61, %c0_62, %c0_63] : memref<1x1x64xf32, #tpu.memory_space<vmem>>, vector<1x1x64xf32>
    %171 = vector.shape_cast %170 : vector<1x1x64xf32> to vector<1x64xf32>
    %c0_64 = arith.constant 0 : index
    %c0_65 = arith.constant 0 : index
    %c0_66 = arith.constant 0 : index
    %172 = vector.load %arg12[%c0_64, %c0_65, %c0_66] : memref<1x64x32xbf16, #tpu.memory_space<vmem>>, vector<1x64x32xbf16>
    %173 = vector.shape_cast %172 : vector<1x64x32xbf16> to vector<64x32xbf16>
    %c0_67 = arith.constant 0 : index
    %c0_68 = arith.constant 0 : index
    %c0_69 = arith.constant 0 : index
    %174 = vector.load %arg13[%c0_67, %c0_68, %c0_69] : memref<1x1x32xf32, #tpu.memory_space<vmem>>, vector<1x1x32xf32>
    %175 = vector.shape_cast %174 : vector<1x1x32xf32> to vector<1x32xf32>
    %176 = arith.truncf %167 : vector<10x32xf32> to vector<10x32xbf16>
    %cst_70 = arith.constant dense<0.000000e+00> : vector<10x64xf32>
    %177 = tpu.matmul %176, %169, %cst_70 {dimension_numbers = #tpu.dot_dimension_numbers<[1], [0], [0], [1], [0, 0, 1, 1], [], []>} : vector<10x32xbf16>, vector<32x64xbf16>, vector<10x64xf32> -> vector<10x64xf32>
    %178 = vector.broadcast %171 : vector<1x64xf32> to vector<10x64xf32>
    %179 = arith.addf %177, %178 : vector<10x64xf32>
    %180 = arith.mulf %179, %179 : vector<10x64xf32>
    %181 = arith.mulf %179, %180 : vector<10x64xf32>
    %cst_71 = arith.constant 4.471500e-02 : f32
    %182 = vector.broadcast %cst_71 : f32 to vector<10x64xf32>
    %183 = arith.mulf %182, %181 : vector<10x64xf32>
    %184 = arith.addf %179, %183 : vector<10x64xf32>
    %cst_72 = arith.constant 0.797884583 : f32
    %185 = vector.broadcast %cst_72 : f32 to vector<10x64xf32>
    %186 = arith.mulf %185, %184 : vector<10x64xf32>
    %187 = math.tanh %186 : vector<10x64xf32>
    %cst_73 = arith.constant 1.000000e+00 : f32
    %188 = vector.broadcast %cst_73 : f32 to vector<10x64xf32>
    %189 = arith.addf %188, %187 : vector<10x64xf32>
    %cst_74 = arith.constant 5.000000e-01 : f32
    %190 = vector.broadcast %cst_74 : f32 to vector<10x64xf32>
    %191 = arith.mulf %190, %189 : vector<10x64xf32>
    %192 = arith.mulf %179, %191 : vector<10x64xf32>
    %193 = arith.truncf %192 : vector<10x64xf32> to vector<10x64xbf16>
    %cst_75 = arith.constant dense<0.000000e+00> : vector<10x32xf32>
    %194 = tpu.matmul %193, %173, %cst_75 {dimension_numbers = #tpu.dot_dimension_numbers<[1], [0], [0], [1], [0, 0, 1, 1], [], []>} : vector<10x64xbf16>, vector<64x32xbf16>, vector<10x32xf32> -> vector<10x32xf32>
    %195 = vector.broadcast %175 : vector<1x32xf32> to vector<10x32xf32>
    %196 = arith.addf %194, %195 : vector<10x32xf32>
    %197 = arith.addf %143, %196 : vector<10x32xf32>
    %c0_76 = arith.constant 0 : index
    %c0_77 = arith.constant 0 : index
    %198 = vector.load %arg16[%c0_76, %c0_77] : memref<10x32xf32, #tpu.memory_space<vmem>>, vector<10x32xf32>
    tpu.vector_store %arg16[%c0_76, %c0_77], %197 {strides = array<i32>} : memref<10x32xf32, #tpu.memory_space<vmem>>, vector<10x32xf32>,
    %c1_i32 = arith.constant 1 : i32
    %199 = arith.cmpi eq, %arg0, %c1_i32 : i32
    %200 = arith.extui %199 : i1 to i32
    %c0_i32_78 = arith.constant 0 : i32
    %201 = arith.cmpi ne, %200, %c0_i32_78 : i32
    scf.if %201 {
      %202 = vector.extract_strided_slice %197 {offsets = [0, 0], sizes = [2, 32], strides = [1, 1]} : vector<10x32xf32> to vector<2x32xf32>
      %c0_79 = arith.constant 0 : index
      %c0_80 = arith.constant 0 : index
      %203 = vector.load %arg5[%c0_79, %c0_80] : memref<2x32xf32, #tpu.memory_space<vmem>>, vector<1x32xf32>
      %c1 = arith.constant 1 : index
      %c0_81 = arith.constant 0 : index
      %204 = vector.load %arg5[%c1, %c0_81] : memref<2x32xf32, #tpu.memory_space<vmem>>, vector<1x32xf32>
      %cst_82 = arith.constant dense<0.000000e+00> : vector<2xf32>
      %205 = vector.multi_reduction <add>, %202, %cst_82 [1] : vector<2x32xf32> to vector<2xf32>
      %206 = vector.shape_cast %205 : vector<2xf32> to vector<2x1xf32>
      %cst_83 = arith.constant 3.200000e+01 : f32
      %207 = vector.broadcast %cst_83 : f32 to vector<2x1xf32>
      %208 = arith.divf %206, %207 : vector<2x1xf32>
      %209 = vector.broadcast %208 : vector<2x1xf32> to vector<2x32xf32>
      %210 = arith.subf %202, %209 : vector<2x32xf32>
      %211 = arith.mulf %210, %210 : vector<2x32xf32>
      %cst_84 = arith.constant dense<0.000000e+00> : vector<2xf32>
      %212 = vector.multi_reduction <add>, %211, %cst_84 [1] : vector<2x32xf32> to vector<2xf32>
      %213 = vector.shape_cast %212 : vector<2xf32> to vector<2x1xf32>
      %cst_85 = arith.constant 3.200000e+01 : f32
      %214 = vector.broadcast %cst_85 : f32 to vector<2x1xf32>
      %215 = arith.divf %213, %214 : vector<2x1xf32>
      %216 = vector.broadcast %208 : vector<2x1xf32> to vector<2x32xf32>
      %217 = arith.subf %202, %216 : vector<2x32xf32>
      %cst_86 = arith.constant 9.99999996E-13 : f32
      %218 = vector.broadcast %cst_86 : f32 to vector<2x1xf32>
      %219 = arith.addf %215, %218 : vector<2x1xf32>
      %220 = math.rsqrt %219 : vector<2x1xf32>
      %221 = vector.broadcast %220 : vector<2x1xf32> to vector<2x32xf32>
      %222 = arith.mulf %217, %221 : vector<2x32xf32>
      %223 = vector.broadcast %203 : vector<1x32xf32> to vector<2x32xf32>
      %224 = arith.mulf %222, %223 : vector<2x32xf32>
      %225 = vector.broadcast %204 : vector<1x32xf32> to vector<2x32xf32>
      %226 = arith.addf %224, %225 : vector<2x32xf32>
      %c0_87 = arith.constant 0 : index
      %c0_88 = arith.constant 0 : index
      %227 = vector.load %arg15[%c0_87, %c0_88] : memref<2x32xf32, #tpu.memory_space<vmem>>, vector<2x32xf32>
      tpu.vector_store %arg15[%c0_87, %c0_88], %226 {strides = array<i32>} : memref<2x32xf32, #tpu.memory_space<vmem>>, vector<2x32xf32>,
    } else {
    }
    return
  }
  func.func @transform_0(%arg0: i32) -> (i32, i32) {
    %c0_i32 = arith.constant 0 : i32
    %c0_i32_0 = arith.constant 0 : i32
    %c0_i32_1 = arith.constant 0 : i32
    return %c0_i32, %c0_i32_0 : i32, i32
  }
  func.func @transform_1(%arg0: i32) -> (i32, i32) {
    %c0_i32 = arith.constant 0 : i32
    %c0_i32_0 = arith.constant 0 : i32
    %c0_i32_1 = arith.constant 0 : i32
    return %c0_i32, %c0_i32_0 : i32, i32
  }
  func.func @transform_2(%arg0: i32) -> (i32, i32) {
    %c0_i32 = arith.constant 0 : i32
    %c0_i32_0 = arith.constant 0 : i32
    %c0_i32_1 = arith.constant 0 : i32
    return %c0_i32, %c0_i32_0 : i32, i32
  }
  func.func @transform_3(%arg0: i32) -> (i32, i32) {
    %c0_i32 = arith.constant 0 : i32
    %c0_i32_0 = arith.constant 0 : i32
    %c0_i32_1 = arith.constant 0 : i32
    return %c0_i32, %c0_i32_0 : i32, i32
  }
  func.func @transform_4(%arg0: i32) -> (i32, i32) {
    %c0_i32 = arith.constant 0 : i32
    %c0_i32_0 = arith.constant 0 : i32
    %c0_i32_1 = arith.constant 0 : i32
    return %c0_i32, %c0_i32_0 : i32, i32
  }
  func.func @transform_5(%arg0: i32) -> (i32, i32, i32) {
    %c0_i32 = arith.constant 0 : i32
    %c0_i32_0 = arith.constant 0 : i32
    %c0_i32_1 = arith.constant 0 : i32
    return %arg0, %c0_i32, %c0_i32_0 : i32, i32, i32
  }
  func.func @transform_6(%arg0: i32) -> (i32, i32, i32) {
    %c0_i32 = arith.constant 0 : i32
    %c0_i32_0 = arith.constant 0 : i32
    %c0_i32_1 = arith.constant 0 : i32
    return %arg0, %c0_i32, %c0_i32_0 : i32, i32, i32
  }
  func.func @transform_7(%arg0: i32) -> (i32, i32, i32) {
    %c0_i32 = arith.constant 0 : i32
    %c0_i32_0 = arith.constant 0 : i32
    %c0_i32_1 = arith.constant 0 : i32
    return %arg0, %c0_i32, %c0_i32_0 : i32, i32, i32
  }
  func.func @transform_8(%arg0: i32) -> (i32, i32, i32) {
    %c0_i32 = arith.constant 0 : i32
    %c0_i32_0 = arith.constant 0 : i32
    %c0_i32_1 = arith.constant 0 : i32
    return %arg0, %c0_i32, %c0_i32_0 : i32, i32, i32
  }
  func.func @transform_9(%arg0: i32) -> (i32, i32, i32) {
    %c0_i32 = arith.constant 0 : i32
    %c0_i32_0 = arith.constant 0 : i32
    %c0_i32_1 = arith.constant 0 : i32
    return %arg0, %c0_i32, %c0_i32_0 : i32, i32, i32
  }
  func.func @transform_10(%arg0: i32) -> (i32, i32, i32) {
    %c0_i32 = arith.constant 0 : i32
    %c0_i32_0 = arith.constant 0 : i32
    %c0_i32_1 = arith.constant 0 : i32
    return %arg0, %c0_i32, %c0_i32_0 : i32, i32, i32
  }
  func.func @transform_11(%arg0: i32) -> (i32, i32, i32) {
    %c0_i32 = arith.constant 0 : i32
    %c0_i32_0 = arith.constant 0 : i32
    %c0_i32_1 = arith.constant 0 : i32
    return %arg0, %c0_i32, %c0_i32_0 : i32, i32, i32
  }
  func.func @transform_12(%arg0: i32) -> (i32, i32, i32) {
    %c0_i32 = arith.constant 0 : i32
    %c0_i32_0 = arith.constant 0 : i32
    %c0_i32_1 = arith.constant 0 : i32
    return %arg0, %c0_i32, %c0_i32_0 : i32, i32, i32
  }
  func.func @transform_13(%arg0: i32) -> (i32, i32, i32) {
    %c0_i32 = arith.constant 0 : i32
    %c0_i32_0 = arith.constant 0 : i32
    %c0_i32_1 = arith.constant 0 : i32
    return %arg0, %c0_i32, %c0_i32_0 : i32, i32, i32
  }
  func.func @transform_14(%arg0: i32) -> (i32, i32) {
    %c0_i32 = arith.constant 0 : i32
    %c0_i32_0 = arith.constant 0 : i32
    %c0_i32_1 = arith.constant 0 : i32
    return %c0_i32, %c0_i32_0 : i32, i32
  }
}

module attributes {stable_mosaic.version = 11 : i64} {
  func.func @_head_kernel(%arg0: i32, %arg1: memref<2x32xf32, #tpu.memory_space<vmem>>, %arg2: memref<2x32xf32, #tpu.memory_space<vmem>>, %arg3: memref<32x32xf32, #tpu.memory_space<vmem>>, %arg4: memref<32x32xf32, #tpu.memory_space<vmem>>, %arg5: memref<1x32xf32, #tpu.memory_space<vmem>>, %arg6: memref<1x32xf32, #tpu.memory_space<vmem>>, %arg7: memref<1x1xf32, #tpu.memory_space<vmem>>, %arg8: memref<2x1xf32, #tpu.memory_space<vmem>>) attributes {dimension_semantics = [#tpu.dimension_semantics<arbitrary>], iteration_bounds = array<i64: 1>, scalar_prefetch = 0 : i64, scratch_operands = 0 : i64, tpu.core_type = #tpu.core_type<tc>, window_params = [{pipeline_mode = #tpu.pipeline_mode<synchronous>, transform_indices = @transform_0, window_bounds = array<i64: 2, 32>}, {pipeline_mode = #tpu.pipeline_mode<synchronous>, transform_indices = @transform_1, window_bounds = array<i64: 2, 32>}, {pipeline_mode = #tpu.pipeline_mode<synchronous>, transform_indices = @transform_2, window_bounds = array<i64: 32, 32>}, {pipeline_mode = #tpu.pipeline_mode<synchronous>, transform_indices = @transform_3, window_bounds = array<i64: 32, 32>}, {pipeline_mode = #tpu.pipeline_mode<synchronous>, transform_indices = @transform_4, window_bounds = array<i64: 1, 32>}, {pipeline_mode = #tpu.pipeline_mode<synchronous>, transform_indices = @transform_5, window_bounds = array<i64: 1, 32>}, {pipeline_mode = #tpu.pipeline_mode<synchronous>, transform_indices = @transform_6, window_bounds = array<i64: 1, 1>}, {pipeline_mode = #tpu.pipeline_mode<synchronous>, transform_indices = @transform_7, window_bounds = array<i64: 2, 1>}]} {
    %c0 = arith.constant 0 : index
    %c0_0 = arith.constant 0 : index
    %0 = vector.load %arg1[%c0, %c0_0] : memref<2x32xf32, #tpu.memory_space<vmem>>, vector<2x32xf32>
    %c0_1 = arith.constant 0 : index
    %c0_2 = arith.constant 0 : index
    %1 = vector.load %arg3[%c0_1, %c0_2] : memref<32x32xf32, #tpu.memory_space<vmem>>, vector<32x32xf32>
    %cst = arith.constant dense<0.000000e+00> : vector<2x32xf32>
    %2 = tpu.matmul %0, %1, %cst {dimension_numbers = #tpu.dot_dimension_numbers<[1], [0], [0], [1], [0, 0, 1, 1], [], []>} : vector<2x32xf32>, vector<32x32xf32>, vector<2x32xf32> -> vector<2x32xf32>
    %c0_3 = arith.constant 0 : index
    %c0_4 = arith.constant 0 : index
    %3 = vector.load %arg2[%c0_3, %c0_4] : memref<2x32xf32, #tpu.memory_space<vmem>>, vector<2x32xf32>
    %c0_5 = arith.constant 0 : index
    %c0_6 = arith.constant 0 : index
    %4 = vector.load %arg4[%c0_5, %c0_6] : memref<32x32xf32, #tpu.memory_space<vmem>>, vector<32x32xf32>
    %cst_7 = arith.constant dense<0.000000e+00> : vector<2x32xf32>
    %5 = tpu.matmul %3, %4, %cst_7 {dimension_numbers = #tpu.dot_dimension_numbers<[1], [0], [0], [1], [0, 0, 1, 1], [], []>} : vector<2x32xf32>, vector<32x32xf32>, vector<2x32xf32> -> vector<2x32xf32>
    %6 = arith.addf %2, %5 : vector<2x32xf32>
    %c0_8 = arith.constant 0 : index
    %c0_9 = arith.constant 0 : index
    %7 = vector.load %arg5[%c0_8, %c0_9] : memref<1x32xf32, #tpu.memory_space<vmem>>, vector<1x32xf32>
    %8 = vector.broadcast %7 : vector<1x32xf32> to vector<2x32xf32>
    %9 = arith.addf %6, %8 : vector<2x32xf32>
    %cst_10 = arith.constant 0.000000e+00 : f32
    %10 = vector.broadcast %cst_10 : f32 to vector<2x32xf32>
    %11 = arith.maximumf %9, %10 : vector<2x32xf32>
    %c0_11 = arith.constant 0 : index
    %c0_12 = arith.constant 0 : index
    %12 = vector.load %arg6[%c0_11, %c0_12] : memref<1x32xf32, #tpu.memory_space<vmem>>, vector<1x32xf32>
    %13 = vector.broadcast %12 : vector<1x32xf32> to vector<2x32xf32>
    %14 = arith.mulf %11, %13 : vector<2x32xf32>
    %cst_13 = arith.constant dense<0.000000e+00> : vector<2xf32>
    %15 = vector.multi_reduction <add>, %14, %cst_13 [1] : vector<2x32xf32> to vector<2xf32>
    %16 = vector.shape_cast %15 : vector<2xf32> to vector<2x1xf32>
    %c0_14 = arith.constant 0 : index
    %c0_15 = arith.constant 0 : index
    %17 = vector.load %arg7[%c0_14, %c0_15] : memref<1x1xf32, #tpu.memory_space<vmem>>, vector<1x1xf32>
    %18 = vector.broadcast %17 : vector<1x1xf32> to vector<2x1xf32>
    %19 = arith.addf %16, %18 : vector<2x1xf32>
    %c0_16 = arith.constant 0 : index
    %c0_17 = arith.constant 0 : index
    %20 = vector.load %arg8[%c0_16, %c0_17] : memref<2x1xf32, #tpu.memory_space<vmem>>, vector<2x1xf32>
    tpu.vector_store %arg8[%c0_16, %c0_17], %19 {strides = array<i32>} : memref<2x1xf32, #tpu.memory_space<vmem>>, vector<2x1xf32>,
    return
  }
  func.func @transform_0(%arg0: i32) -> (i32, i32) {
    %c0_i32 = arith.constant 0 : i32
    %c0_i32_0 = arith.constant 0 : i32
    %c0_i32_1 = arith.constant 0 : i32
    return %c0_i32, %c0_i32_0 : i32, i32
  }
  func.func @transform_1(%arg0: i32) -> (i32, i32) {
    %c0_i32 = arith.constant 0 : i32
    %c0_i32_0 = arith.constant 0 : i32
    %c0_i32_1 = arith.constant 0 : i32
    return %c0_i32, %c0_i32_0 : i32, i32
  }
  func.func @transform_2(%arg0: i32) -> (i32, i32) {
    %c0_i32 = arith.constant 0 : i32
    %c0_i32_0 = arith.constant 0 : i32
    %c0_i32_1 = arith.constant 0 : i32
    return %c0_i32, %c0_i32_0 : i32, i32
  }
  func.func @transform_3(%arg0: i32) -> (i32, i32) {
    %c0_i32 = arith.constant 0 : i32
    %c0_i32_0 = arith.constant 0 : i32
    %c0_i32_1 = arith.constant 0 : i32
    return %c0_i32, %c0_i32_0 : i32, i32
  }
  func.func @transform_4(%arg0: i32) -> (i32, i32) {
    %c0_i32 = arith.constant 0 : i32
    %c0_i32_0 = arith.constant 0 : i32
    %c0_i32_1 = arith.constant 0 : i32
    return %c0_i32, %c0_i32_0 : i32, i32
  }
  func.func @transform_5(%arg0: i32) -> (i32, i32) {
    %c0_i32 = arith.constant 0 : i32
    %c0_i32_0 = arith.constant 0 : i32
    %c0_i32_1 = arith.constant 0 : i32
    return %c0_i32, %c0_i32_0 : i32, i32
  }
  func.func @transform_6(%arg0: i32) -> (i32, i32) {
    %c0_i32 = arith.constant 0 : i32
    %c0_i32_0 = arith.constant 0 : i32
    %c0_i32_1 = arith.constant 0 : i32
    return %c0_i32, %c0_i32_0 : i32, i32
  }
  func.func @transform_7(%arg0: i32) -> (i32, i32) {
    %c0_i32 = arith.constant 0 : i32
    %c0_i32_0 = arith.constant 0 : i32
    %c0_i32_1 = arith.constant 0 : i32
    return %c0_i32, %c0_i32_0 : i32, i32
  }
}

module attributes {stable_mosaic.version = 11 : i64} {
  func.func @_bert_encoder_kernel(%arg0: i32, %arg1: memref<16x32xf32, #tpu.memory_space<vmem>>, %arg2: memref<16x1xi32, #tpu.memory_space<vmem>>, %arg3: memref<1x16xi32, #tpu.memory_space<vmem>>, %arg4: memref<1x16xf32, #tpu.memory_space<vmem>>, %arg5: memref<1x32x96xbf16, #tpu.memory_space<vmem>>, %arg6: memref<1x1x96xf32, #tpu.memory_space<vmem>>, %arg7: memref<1x32x32xbf16, #tpu.memory_space<vmem>>, %arg8: memref<1x1x32xf32, #tpu.memory_space<vmem>>, %arg9: memref<1x32x64xbf16, #tpu.memory_space<vmem>>, %arg10: memref<1x1x64xf32, #tpu.memory_space<vmem>>, %arg11: memref<1x64x32xbf16, #tpu.memory_space<vmem>>, %arg12: memref<1x1x32xf32, #tpu.memory_space<vmem>>, %arg13: memref<1x4x32xf32, #tpu.memory_space<vmem>>, %arg14: memref<2x32xf32, #tpu.memory_space<vmem>>, %arg15: memref<16x32xf32, #tpu.memory_space<vmem>>, %arg16: memref<16x32xf32, #tpu.memory_space<vmem>>) attributes {dimension_semantics = [#tpu.dimension_semantics<arbitrary>], iteration_bounds = array<i64: 2>, scalar_prefetch = 0 : i64, scratch_operands = 2 : i64, tpu.core_type = #tpu.core_type<tc>, window_params = [{pipeline_mode = #tpu.pipeline_mode<synchronous>, transform_indices = @transform_0, window_bounds = array<i64: 16, 32>}, {pipeline_mode = #tpu.pipeline_mode<synchronous>, transform_indices = @transform_1, window_bounds = array<i64: 16, 1>}, {pipeline_mode = #tpu.pipeline_mode<synchronous>, transform_indices = @transform_2, window_bounds = array<i64: 1, 16>}, {pipeline_mode = #tpu.pipeline_mode<synchronous>, transform_indices = @transform_3, window_bounds = array<i64: 1, 16>}, {transform_indices = @transform_4, window_bounds = array<i64: 1, 32, 96>}, {transform_indices = @transform_5, window_bounds = array<i64: 1, 1, 96>}, {transform_indices = @transform_6, window_bounds = array<i64: 1, 32, 32>}, {transform_indices = @transform_7, window_bounds = array<i64: 1, 1, 32>}, {transform_indices = @transform_8, window_bounds = array<i64: 1, 32, 64>}, {transform_indices = @transform_9, window_bounds = array<i64: 1, 1, 64>}, {transform_indices = @transform_10, window_bounds = array<i64: 1, 64, 32>}, {transform_indices = @transform_11, window_bounds = array<i64: 1, 1, 32>}, {transform_indices = @transform_12, window_bounds = array<i64: 1, 4, 32>}, {pipeline_mode = #tpu.pipeline_mode<synchronous>, transform_indices = @transform_13, window_bounds = array<i64: 2, 32>}]} {
    %c0_i32 = arith.constant 0 : i32
    %0 = arith.cmpi eq, %arg0, %c0_i32 : i32
    %1 = arith.extui %0 : i1 to i32
    %c0_i32_0 = arith.constant 0 : i32
    %2 = arith.cmpi ne, %1, %c0_i32_0 : i32
    scf.if %2 {
      %c0_79 = arith.constant 0 : index
      %c0_80 = arith.constant 0 : index
      %202 = vector.load %arg1[%c0_79, %c0_80] : memref<16x32xf32, #tpu.memory_space<vmem>>, vector<16x32xf32>
      %c0_81 = arith.constant 0 : index
      %c0_82 = arith.constant 0 : index
      %203 = vector.load %arg15[%c0_81, %c0_82] : memref<16x32xf32, #tpu.memory_space<vmem>>, vector<16x32xf32>
      tpu.vector_store %arg15[%c0_81, %c0_82], %202 {strides = array<i32>} : memref<16x32xf32, #tpu.memory_space<vmem>>, vector<16x32xf32>,
    } else {
    }
    %c0 = arith.constant 0 : index
    %c0_1 = arith.constant 0 : index
    %3 = vector.load %arg2[%c0, %c0_1] : memref<16x1xi32, #tpu.memory_space<vmem>>, vector<16x1xi32>
    %c0_2 = arith.constant 0 : index
    %c0_3 = arith.constant 0 : index
    %4 = vector.load %arg3[%c0_2, %c0_3] : memref<1x16xi32, #tpu.memory_space<vmem>>, vector<1x16xi32>
    %5 = vector.broadcast %3 : vector<16x1xi32> to vector<16x16xi32>
    %6 = vector.broadcast %4 : vector<1x16xi32> to vector<16x16xi32>
    %7 = arith.cmpi eq, %5, %6 : vector<16x16xi32>
    %c0_4 = arith.constant 0 : index
    %c0_5 = arith.constant 0 : index
    %8 = vector.load %arg4[%c0_4, %c0_5] : memref<1x16xf32, #tpu.memory_space<vmem>>, vector<1x16xf32>
    %cst = arith.constant -1.000000e+09 : f32
    %9 = vector.shape_cast %8 : vector<1x16xf32> to vector<1x16xf32>
    %10 = vector.broadcast %9 : vector<1x16xf32> to vector<16x16xf32>
    %11 = vector.broadcast %cst : f32 to vector<16x16xf32>
    %12 = arith.select %7, %10, %11 : vector<16x16xi1>, vector<16x16xf32>
    %c0_6 = arith.constant 0 : index
    %c0_7 = arith.constant 0 : index
    %c0_8 = arith.constant 0 : index
    %13 = vector.load %arg13[%c0_6, %c0_7, %c0_8] : memref<1x4x32xf32, #tpu.memory_space<vmem>>, vector<1x4x32xf32>
    %14 = vector.shape_cast %13 : vector<1x4x32xf32> to vector<4x32xf32>
    %c0_9 = arith.constant 0 : index
    %c0_10 = arith.constant 0 : index
    %15 = vector.load %arg15[%c0_9, %c0_10] : memref<16x32xf32, #tpu.memory_space<vmem>>, vector<16x32xf32>
    %c0_11 = arith.constant 0 : index
    %c0_12 = arith.constant 0 : index
    %c0_13 = arith.constant 0 : index
    %16 = vector.load %arg5[%c0_11, %c0_12, %c0_13] : memref<1x32x96xbf16, #tpu.memory_space<vmem>>, vector<1x32x96xbf16>
    %17 = vector.shape_cast %16 : vector<1x32x96xbf16> to vector<32x96xbf16>
    %c0_14 = arith.constant 0 : index
    %c0_15 = arith.constant 0 : index
    %c0_16 = arith.constant 0 : index
    %18 = vector.load %arg6[%c0_14, %c0_15, %c0_16] : memref<1x1x96xf32, #tpu.memory_space<vmem>>, vector<1x1x96xf32>
    %19 = vector.shape_cast %18 : vector<1x1x96xf32> to vector<1x96xf32>
    %c0_17 = arith.constant 0 : index
    %c0_18 = arith.constant 0 : index
    %c0_19 = arith.constant 0 : index
    %20 = vector.load %arg7[%c0_17, %c0_18, %c0_19] : memref<1x32x32xbf16, #tpu.memory_space<vmem>>, vector<1x32x32xbf16>
    %21 = vector.shape_cast %20 : vector<1x32x32xbf16> to vector<32x32xbf16>
    %c0_20 = arith.constant 0 : index
    %c0_21 = arith.constant 0 : index
    %c0_22 = arith.constant 0 : index
    %22 = vector.load %arg8[%c0_20, %c0_21, %c0_22] : memref<1x1x32xf32, #tpu.memory_space<vmem>>, vector<1x1x32xf32>
    %23 = vector.shape_cast %22 : vector<1x1x32xf32> to vector<1x32xf32>
    %24 = arith.truncf %15 : vector<16x32xf32> to vector<16x32xbf16>
    %cst_23 = arith.constant dense<0.000000e+00> : vector<16x96xf32>
    %25 = tpu.matmul %24, %17, %cst_23 {dimension_numbers = #tpu.dot_dimension_numbers<[1], [0], [0], [1], [0, 0, 1, 1], [], []>} : vector<16x32xbf16>, vector<32x96xbf16>, vector<16x96xf32> -> vector<16x96xf32>
    %26 = vector.broadcast %19 : vector<1x96xf32> to vector<16x96xf32>
    %27 = arith.addf %25, %26 : vector<16x96xf32>
    %28 = vector.extract_strided_slice %27 {offsets = [0, 32], sizes = [16, 32], strides = [1, 1]} : vector<16x96xf32> to vector<16x32xf32>
    %29 = tpu.transpose %28, [1, 0] : vector<16x32xf32> -> vector<32x16xf32>
    %30 = vector.extract_strided_slice %27 {offsets = [0, 0], sizes = [16, 8], strides = [1, 1]} : vector<16x96xf32> to vector<16x8xf32>
    %31 = vector.extract_strided_slice %29 {offsets = [0, 0], sizes = [8, 16], strides = [1, 1]} : vector<32x16xf32> to vector<8x16xf32>
    %32 = vector.extract_strided_slice %27 {offsets = [0, 64], sizes = [16, 8], strides = [1, 1]} : vector<16x96xf32> to vector<16x8xf32>
    %33 = arith.truncf %30 : vector<16x8xf32> to vector<16x8xbf16>
    %34 = arith.truncf %31 : vector<8x16xf32> to vector<8x16xbf16>
    %cst_24 = arith.constant dense<0.000000e+00> : vector<16x16xf32>
    %35 = tpu.matmul %33, %34, %cst_24 {dimension_numbers = #tpu.dot_dimension_numbers<[1], [0], [0], [1], [0, 0, 1, 1], [], []>} : vector<16x8xbf16>, vector<8x16xbf16>, vector<16x16xf32> -> vector<16x16xf32>
    %36 = arith.addf %35, %12 : vector<16x16xf32>
    %cst_25 = arith.constant dense<0xFF800000> : vector<16xf32>
    %37 = vector.multi_reduction <maximumf>, %36, %cst_25 [1] : vector<16x16xf32> to vector<16xf32>
    %38 = vector.shape_cast %37 : vector<16xf32> to vector<16x1xf32>
    %39 = vector.broadcast %38 : vector<16x1xf32> to vector<16x16xf32>
    %40 = arith.subf %36, %39 : vector<16x16xf32>
    %41 = math.exp %40 : vector<16x16xf32>
    %cst_26 = arith.constant dense<0.000000e+00> : vector<16xf32>
    %42 = vector.multi_reduction <add>, %41, %cst_26 [1] : vector<16x16xf32> to vector<16xf32>
    %43 = vector.shape_cast %42 : vector<16xf32> to vector<16x1xf32>
    %44 = tpu.reciprocal %43 {approx = true} : vector<16x1xf32> -> vector<16x1xf32>
    %45 = vector.broadcast %44 : vector<16x1xf32> to vector<16x16xf32>
    %46 = arith.mulf %41, %45 : vector<16x16xf32>
    %47 = arith.truncf %46 : vector<16x16xf32> to vector<16x16xbf16>
    %48 = arith.truncf %32 : vector<16x8xf32> to vector<16x8xbf16>
    %cst_27 = arith.constant dense<0.000000e+00> : vector<16x8xf32>
    %49 = tpu.matmul %47, %48, %cst_27 {dimension_numbers = #tpu.dot_dimension_numbers<[1], [0], [0], [1], [0, 0, 1, 1], [], []>} : vector<16x16xbf16>, vector<16x8xbf16>, vector<16x8xf32> -> vector<16x8xf32>
    %c0_28 = arith.constant 0 : index
    %c0_29 = arith.constant 0 : index
    %50 = vector.load %arg16[%c0_28, %c0_29] : memref<16x32xf32, #tpu.memory_space<vmem>>, vector<16x8xf32>
    tpu.vector_store %arg16[%c0_28, %c0_29], %49 {strides = array<i32>} : memref<16x32xf32, #tpu.memory_space<vmem>>, vector<16x8xf32>,
    %51 = vector.extract_strided_slice %27 {offsets = [0, 8], sizes = [16, 8], strides = [1, 1]} : vector<16x96xf32> to vector<16x8xf32>
    %52 = vector.extract_strided_slice %29 {offsets = [8, 0], sizes = [8, 16], strides = [1, 1]} : vector<32x16xf32> to vector<8x16xf32>
    %53 = vector.extract_strided_slice %27 {offsets = [0, 72], sizes = [16, 8], strides = [1, 1]} : vector<16x96xf32> to vector<16x8xf32>
    %54 = arith.truncf %51 : vector<16x8xf32> to vector<16x8xbf16>
    %55 = arith.truncf %52 : vector<8x16xf32> to vector<8x16xbf16>
    %cst_30 = arith.constant dense<0.000000e+00> : vector<16x16xf32>
    %56 = tpu.matmul %54, %55, %cst_30 {dimension_numbers = #tpu.dot_dimension_numbers<[1], [0], [0], [1], [0, 0, 1, 1], [], []>} : vector<16x8xbf16>, vector<8x16xbf16>, vector<16x16xf32> -> vector<16x16xf32>
    %57 = arith.addf %56, %12 : vector<16x16xf32>
    %cst_31 = arith.constant dense<0xFF800000> : vector<16xf32>
    %58 = vector.multi_reduction <maximumf>, %57, %cst_31 [1] : vector<16x16xf32> to vector<16xf32>
    %59 = vector.shape_cast %58 : vector<16xf32> to vector<16x1xf32>
    %60 = vector.broadcast %59 : vector<16x1xf32> to vector<16x16xf32>
    %61 = arith.subf %57, %60 : vector<16x16xf32>
    %62 = math.exp %61 : vector<16x16xf32>
    %cst_32 = arith.constant dense<0.000000e+00> : vector<16xf32>
    %63 = vector.multi_reduction <add>, %62, %cst_32 [1] : vector<16x16xf32> to vector<16xf32>
    %64 = vector.shape_cast %63 : vector<16xf32> to vector<16x1xf32>
    %65 = tpu.reciprocal %64 {approx = true} : vector<16x1xf32> -> vector<16x1xf32>
    %66 = vector.broadcast %65 : vector<16x1xf32> to vector<16x16xf32>
    %67 = arith.mulf %62, %66 : vector<16x16xf32>
    %68 = arith.truncf %67 : vector<16x16xf32> to vector<16x16xbf16>
    %69 = arith.truncf %53 : vector<16x8xf32> to vector<16x8xbf16>
    %cst_33 = arith.constant dense<0.000000e+00> : vector<16x8xf32>
    %70 = tpu.matmul %68, %69, %cst_33 {dimension_numbers = #tpu.dot_dimension_numbers<[1], [0], [0], [1], [0, 0, 1, 1], [], []>} : vector<16x16xbf16>, vector<16x8xbf16>, vector<16x8xf32> -> vector<16x8xf32>
    %c0_34 = arith.constant 0 : index
    %c8 = arith.constant 8 : index
    %71 = vector.load %arg16[%c0_34, %c8] : memref<16x32xf32, #tpu.memory_space<vmem>>, vector<16x8xf32>
    tpu.vector_store %arg16[%c0_34, %c8], %70 {strides = array<i32>} : memref<16x32xf32, #tpu.memory_space<vmem>>, vector<16x8xf32>,
    %72 = vector.extract_strided_slice %27 {offsets = [0, 16], sizes = [16, 8], strides = [1, 1]} : vector<16x96xf32> to vector<16x8xf32>
    %73 = vector.extract_strided_slice %29 {offsets = [16, 0], sizes = [8, 16], strides = [1, 1]} : vector<32x16xf32> to vector<8x16xf32>
    %74 = vector.extract_strided_slice %27 {offsets = [0, 80], sizes = [16, 8], strides = [1, 1]} : vector<16x96xf32> to vector<16x8xf32>
    %75 = arith.truncf %72 : vector<16x8xf32> to vector<16x8xbf16>
    %76 = arith.truncf %73 : vector<8x16xf32> to vector<8x16xbf16>
    %cst_35 = arith.constant dense<0.000000e+00> : vector<16x16xf32>
    %77 = tpu.matmul %75, %76, %cst_35 {dimension_numbers = #tpu.dot_dimension_numbers<[1], [0], [0], [1], [0, 0, 1, 1], [], []>} : vector<16x8xbf16>, vector<8x16xbf16>, vector<16x16xf32> -> vector<16x16xf32>
    %78 = arith.addf %77, %12 : vector<16x16xf32>
    %cst_36 = arith.constant dense<0xFF800000> : vector<16xf32>
    %79 = vector.multi_reduction <maximumf>, %78, %cst_36 [1] : vector<16x16xf32> to vector<16xf32>
    %80 = vector.shape_cast %79 : vector<16xf32> to vector<16x1xf32>
    %81 = vector.broadcast %80 : vector<16x1xf32> to vector<16x16xf32>
    %82 = arith.subf %78, %81 : vector<16x16xf32>
    %83 = math.exp %82 : vector<16x16xf32>
    %cst_37 = arith.constant dense<0.000000e+00> : vector<16xf32>
    %84 = vector.multi_reduction <add>, %83, %cst_37 [1] : vector<16x16xf32> to vector<16xf32>
    %85 = vector.shape_cast %84 : vector<16xf32> to vector<16x1xf32>
    %86 = tpu.reciprocal %85 {approx = true} : vector<16x1xf32> -> vector<16x1xf32>
    %87 = vector.broadcast %86 : vector<16x1xf32> to vector<16x16xf32>
    %88 = arith.mulf %83, %87 : vector<16x16xf32>
    %89 = arith.truncf %88 : vector<16x16xf32> to vector<16x16xbf16>
    %90 = arith.truncf %74 : vector<16x8xf32> to vector<16x8xbf16>
    %cst_38 = arith.constant dense<0.000000e+00> : vector<16x8xf32>
    %91 = tpu.matmul %89, %90, %cst_38 {dimension_numbers = #tpu.dot_dimension_numbers<[1], [0], [0], [1], [0, 0, 1, 1], [], []>} : vector<16x16xbf16>, vector<16x8xbf16>, vector<16x8xf32> -> vector<16x8xf32>
    %c0_39 = arith.constant 0 : index
    %c16 = arith.constant 16 : index
    %92 = vector.load %arg16[%c0_39, %c16] : memref<16x32xf32, #tpu.memory_space<vmem>>, vector<16x8xf32>
    tpu.vector_store %arg16[%c0_39, %c16], %91 {strides = array<i32>} : memref<16x32xf32, #tpu.memory_space<vmem>>, vector<16x8xf32>,
    %93 = vector.extract_strided_slice %27 {offsets = [0, 24], sizes = [16, 8], strides = [1, 1]} : vector<16x96xf32> to vector<16x8xf32>
    %94 = vector.extract_strided_slice %29 {offsets = [24, 0], sizes = [8, 16], strides = [1, 1]} : vector<32x16xf32> to vector<8x16xf32>
    %95 = vector.extract_strided_slice %27 {offsets = [0, 88], sizes = [16, 8], strides = [1, 1]} : vector<16x96xf32> to vector<16x8xf32>
    %96 = arith.truncf %93 : vector<16x8xf32> to vector<16x8xbf16>
    %97 = arith.truncf %94 : vector<8x16xf32> to vector<8x16xbf16>
    %cst_40 = arith.constant dense<0.000000e+00> : vector<16x16xf32>
    %98 = tpu.matmul %96, %97, %cst_40 {dimension_numbers = #tpu.dot_dimension_numbers<[1], [0], [0], [1], [0, 0, 1, 1], [], []>} : vector<16x8xbf16>, vector<8x16xbf16>, vector<16x16xf32> -> vector<16x16xf32>
    %99 = arith.addf %98, %12 : vector<16x16xf32>
    %cst_41 = arith.constant dense<0xFF800000> : vector<16xf32>
    %100 = vector.multi_reduction <maximumf>, %99, %cst_41 [1] : vector<16x16xf32> to vector<16xf32>
    %101 = vector.shape_cast %100 : vector<16xf32> to vector<16x1xf32>
    %102 = vector.broadcast %101 : vector<16x1xf32> to vector<16x16xf32>
    %103 = arith.subf %99, %102 : vector<16x16xf32>
    %104 = math.exp %103 : vector<16x16xf32>
    %cst_42 = arith.constant dense<0.000000e+00> : vector<16xf32>
    %105 = vector.multi_reduction <add>, %104, %cst_42 [1] : vector<16x16xf32> to vector<16xf32>
    %106 = vector.shape_cast %105 : vector<16xf32> to vector<16x1xf32>
    %107 = tpu.reciprocal %106 {approx = true} : vector<16x1xf32> -> vector<16x1xf32>
    %108 = vector.broadcast %107 : vector<16x1xf32> to vector<16x16xf32>
    %109 = arith.mulf %104, %108 : vector<16x16xf32>
    %110 = arith.truncf %109 : vector<16x16xf32> to vector<16x16xbf16>
    %111 = arith.truncf %95 : vector<16x8xf32> to vector<16x8xbf16>
    %cst_43 = arith.constant dense<0.000000e+00> : vector<16x8xf32>
    %112 = tpu.matmul %110, %111, %cst_43 {dimension_numbers = #tpu.dot_dimension_numbers<[1], [0], [0], [1], [0, 0, 1, 1], [], []>} : vector<16x16xbf16>, vector<16x8xbf16>, vector<16x8xf32> -> vector<16x8xf32>
    %c0_44 = arith.constant 0 : index
    %c24 = arith.constant 24 : index
    %113 = vector.load %arg16[%c0_44, %c24] : memref<16x32xf32, #tpu.memory_space<vmem>>, vector<16x8xf32>
    tpu.vector_store %arg16[%c0_44, %c24], %112 {strides = array<i32>} : memref<16x32xf32, #tpu.memory_space<vmem>>, vector<16x8xf32>,
    %c0_45 = arith.constant 0 : index
    %c0_46 = arith.constant 0 : index
    %114 = vector.load %arg16[%c0_45, %c0_46] : memref<16x32xf32, #tpu.memory_space<vmem>>, vector<16x32xf32>
    %115 = arith.truncf %114 : vector<16x32xf32> to vector<16x32xbf16>
    %cst_47 = arith.constant dense<0.000000e+00> : vector<16x32xf32>
    %116 = tpu.matmul %115, %21, %cst_47 {dimension_numbers = #tpu.dot_dimension_numbers<[1], [0], [0], [1], [0, 0, 1, 1], [], []>} : vector<16x32xbf16>, vector<32x32xbf16>, vector<16x32xf32> -> vector<16x32xf32>
    %117 = vector.broadcast %23 : vector<1x32xf32> to vector<16x32xf32>
    %118 = arith.addf %116, %117 : vector<16x32xf32>
    %119 = arith.addf %15, %118 : vector<16x32xf32>
    %120 = vector.extract_strided_slice %14 {offsets = [0, 0], sizes = [1, 32], strides = [1, 1]} : vector<4x32xf32> to vector<1x32xf32>
    %121 = vector.extract_strided_slice %14 {offsets = [1, 0], sizes = [1, 32], strides = [1, 1]} : vector<4x32xf32> to vector<1x32xf32>
    %cst_48 = arith.constant dense<0.000000e+00> : vector<16xf32>
    %122 = vector.multi_reduction <add>, %119, %cst_48 [1] : vector<16x32xf32> to vector<16xf32>
    %123 = vector.shape_cast %122 : vector<16xf32> to vector<16x1xf32>
    %cst_49 = arith.constant 3.200000e+01 : f32
    %124 = vector.broadcast %cst_49 : f32 to vector<16x1xf32>
    %125 = arith.divf %123, %124 : vector<16x1xf32>
    %126 = vector.broadcast %125 : vector<16x1xf32> to vector<16x32xf32>
    %127 = arith.subf %119, %126 : vector<16x32xf32>
    %128 = arith.mulf %127, %127 : vector<16x32xf32>
    %cst_50 = arith.constant dense<0.000000e+00> : vector<16xf32>
    %129 = vector.multi_reduction <add>, %128, %cst_50 [1] : vector<16x32xf32> to vector<16xf32>
    %130 = vector.shape_cast %129 : vector<16xf32> to vector<16x1xf32>
    %cst_51 = arith.constant 3.200000e+01 : f32
    %131 = vector.broadcast %cst_51 : f32 to vector<16x1xf32>
    %132 = arith.divf %130, %131 : vector<16x1xf32>
    %133 = vector.broadcast %125 : vector<16x1xf32> to vector<16x32xf32>
    %134 = arith.subf %119, %133 : vector<16x32xf32>
    %cst_52 = arith.constant 9.99999996E-13 : f32
    %135 = vector.broadcast %cst_52 : f32 to vector<16x1xf32>
    %136 = arith.addf %132, %135 : vector<16x1xf32>
    %137 = math.rsqrt %136 : vector<16x1xf32>
    %138 = vector.broadcast %137 : vector<16x1xf32> to vector<16x32xf32>
    %139 = arith.mulf %134, %138 : vector<16x32xf32>
    %140 = vector.broadcast %120 : vector<1x32xf32> to vector<16x32xf32>
    %141 = arith.mulf %139, %140 : vector<16x32xf32>
    %142 = vector.broadcast %121 : vector<1x32xf32> to vector<16x32xf32>
    %143 = arith.addf %141, %142 : vector<16x32xf32>
    %c0_53 = arith.constant 0 : index
    %c0_54 = arith.constant 0 : index
    %c0_55 = arith.constant 0 : index
    %144 = vector.load %arg9[%c0_53, %c0_54, %c0_55] : memref<1x32x64xbf16, #tpu.memory_space<vmem>>, vector<1x32x64xbf16>
    %145 = vector.shape_cast %144 : vector<1x32x64xbf16> to vector<32x64xbf16>
    %c0_56 = arith.constant 0 : index
    %c0_57 = arith.constant 0 : index
    %c0_58 = arith.constant 0 : index
    %146 = vector.load %arg10[%c0_56, %c0_57, %c0_58] : memref<1x1x64xf32, #tpu.memory_space<vmem>>, vector<1x1x64xf32>
    %147 = vector.shape_cast %146 : vector<1x1x64xf32> to vector<1x64xf32>
    %c0_59 = arith.constant 0 : index
    %c0_60 = arith.constant 0 : index
    %c0_61 = arith.constant 0 : index
    %148 = vector.load %arg11[%c0_59, %c0_60, %c0_61] : memref<1x64x32xbf16, #tpu.memory_space<vmem>>, vector<1x64x32xbf16>
    %149 = vector.shape_cast %148 : vector<1x64x32xbf16> to vector<64x32xbf16>
    %c0_62 = arith.constant 0 : index
    %c0_63 = arith.constant 0 : index
    %c0_64 = arith.constant 0 : index
    %150 = vector.load %arg12[%c0_62, %c0_63, %c0_64] : memref<1x1x32xf32, #tpu.memory_space<vmem>>, vector<1x1x32xf32>
    %151 = vector.shape_cast %150 : vector<1x1x32xf32> to vector<1x32xf32>
    %152 = arith.truncf %143 : vector<16x32xf32> to vector<16x32xbf16>
    %cst_65 = arith.constant dense<0.000000e+00> : vector<16x64xf32>
    %153 = tpu.matmul %152, %145, %cst_65 {dimension_numbers = #tpu.dot_dimension_numbers<[1], [0], [0], [1], [0, 0, 1, 1], [], []>} : vector<16x32xbf16>, vector<32x64xbf16>, vector<16x64xf32> -> vector<16x64xf32>
    %154 = vector.broadcast %147 : vector<1x64xf32> to vector<16x64xf32>
    %155 = arith.addf %153, %154 : vector<16x64xf32>
    %156 = arith.mulf %155, %155 : vector<16x64xf32>
    %157 = arith.mulf %155, %156 : vector<16x64xf32>
    %cst_66 = arith.constant 4.471500e-02 : f32
    %158 = vector.broadcast %cst_66 : f32 to vector<16x64xf32>
    %159 = arith.mulf %158, %157 : vector<16x64xf32>
    %160 = arith.addf %155, %159 : vector<16x64xf32>
    %cst_67 = arith.constant 0.797884583 : f32
    %161 = vector.broadcast %cst_67 : f32 to vector<16x64xf32>
    %162 = arith.mulf %161, %160 : vector<16x64xf32>
    %163 = math.tanh %162 : vector<16x64xf32>
    %cst_68 = arith.constant 1.000000e+00 : f32
    %164 = vector.broadcast %cst_68 : f32 to vector<16x64xf32>
    %165 = arith.addf %164, %163 : vector<16x64xf32>
    %cst_69 = arith.constant 5.000000e-01 : f32
    %166 = vector.broadcast %cst_69 : f32 to vector<16x64xf32>
    %167 = arith.mulf %166, %165 : vector<16x64xf32>
    %168 = arith.mulf %155, %167 : vector<16x64xf32>
    %169 = arith.truncf %168 : vector<16x64xf32> to vector<16x64xbf16>
    %cst_70 = arith.constant dense<0.000000e+00> : vector<16x32xf32>
    %170 = tpu.matmul %169, %149, %cst_70 {dimension_numbers = #tpu.dot_dimension_numbers<[1], [0], [0], [1], [0, 0, 1, 1], [], []>} : vector<16x64xbf16>, vector<64x32xbf16>, vector<16x32xf32> -> vector<16x32xf32>
    %171 = vector.broadcast %151 : vector<1x32xf32> to vector<16x32xf32>
    %172 = arith.addf %170, %171 : vector<16x32xf32>
    %173 = arith.addf %143, %172 : vector<16x32xf32>
    %174 = vector.extract_strided_slice %14 {offsets = [2, 0], sizes = [1, 32], strides = [1, 1]} : vector<4x32xf32> to vector<1x32xf32>
    %175 = vector.extract_strided_slice %14 {offsets = [3, 0], sizes = [1, 32], strides = [1, 1]} : vector<4x32xf32> to vector<1x32xf32>
    %cst_71 = arith.constant dense<0.000000e+00> : vector<16xf32>
    %176 = vector.multi_reduction <add>, %173, %cst_71 [1] : vector<16x32xf32> to vector<16xf32>
    %177 = vector.shape_cast %176 : vector<16xf32> to vector<16x1xf32>
    %cst_72 = arith.constant 3.200000e+01 : f32
    %178 = vector.broadcast %cst_72 : f32 to vector<16x1xf32>
    %179 = arith.divf %177, %178 : vector<16x1xf32>
    %180 = vector.broadcast %179 : vector<16x1xf32> to vector<16x32xf32>
    %181 = arith.subf %173, %180 : vector<16x32xf32>
    %182 = arith.mulf %181, %181 : vector<16x32xf32>
    %cst_73 = arith.constant dense<0.000000e+00> : vector<16xf32>
    %183 = vector.multi_reduction <add>, %182, %cst_73 [1] : vector<16x32xf32> to vector<16xf32>
    %184 = vector.shape_cast %183 : vector<16xf32> to vector<16x1xf32>
    %cst_74 = arith.constant 3.200000e+01 : f32
    %185 = vector.broadcast %cst_74 : f32 to vector<16x1xf32>
    %186 = arith.divf %184, %185 : vector<16x1xf32>
    %187 = vector.broadcast %179 : vector<16x1xf32> to vector<16x32xf32>
    %188 = arith.subf %173, %187 : vector<16x32xf32>
    %cst_75 = arith.constant 9.99999996E-13 : f32
    %189 = vector.broadcast %cst_75 : f32 to vector<16x1xf32>
    %190 = arith.addf %186, %189 : vector<16x1xf32>
    %191 = math.rsqrt %190 : vector<16x1xf32>
    %192 = vector.broadcast %191 : vector<16x1xf32> to vector<16x32xf32>
    %193 = arith.mulf %188, %192 : vector<16x32xf32>
    %194 = vector.broadcast %174 : vector<1x32xf32> to vector<16x32xf32>
    %195 = arith.mulf %193, %194 : vector<16x32xf32>
    %196 = vector.broadcast %175 : vector<1x32xf32> to vector<16x32xf32>
    %197 = arith.addf %195, %196 : vector<16x32xf32>
    %c0_76 = arith.constant 0 : index
    %c0_77 = arith.constant 0 : index
    %198 = vector.load %arg15[%c0_76, %c0_77] : memref<16x32xf32, #tpu.memory_space<vmem>>, vector<16x32xf32>
    tpu.vector_store %arg15[%c0_76, %c0_77], %197 {strides = array<i32>} : memref<16x32xf32, #tpu.memory_space<vmem>>, vector<16x32xf32>,
    %c1_i32 = arith.constant 1 : i32
    %199 = arith.cmpi eq, %arg0, %c1_i32 : i32
    %200 = arith.extui %199 : i1 to i32
    %c0_i32_78 = arith.constant 0 : i32
    %201 = arith.cmpi ne, %200, %c0_i32_78 : i32
    scf.if %201 {
      %202 = vector.extract_strided_slice %197 {offsets = [0, 0], sizes = [2, 32], strides = [1, 1]} : vector<16x32xf32> to vector<2x32xf32>
      %c0_79 = arith.constant 0 : index
      %c0_80 = arith.constant 0 : index
      %203 = vector.load %arg14[%c0_79, %c0_80] : memref<2x32xf32, #tpu.memory_space<vmem>>, vector<2x32xf32>
      tpu.vector_store %arg14[%c0_79, %c0_80], %202 {strides = array<i32>} : memref<2x32xf32, #tpu.memory_space<vmem>>, vector<2x32xf32>,
    } else {
    }
    return
  }
  func.func @transform_0(%arg0: i32) -> (i32, i32) {
    %c0_i32 = arith.constant 0 : i32
    %c0_i32_0 = arith.constant 0 : i32
    %c0_i32_1 = arith.constant 0 : i32
    return %c0_i32, %c0_i32_0 : i32, i32
  }
  func.func @transform_1(%arg0: i32) -> (i32, i32) {
    %c0_i32 = arith.constant 0 : i32
    %c0_i32_0 = arith.constant 0 : i32
    %c0_i32_1 = arith.constant 0 : i32
    return %c0_i32, %c0_i32_0 : i32, i32
  }
  func.func @transform_2(%arg0: i32) -> (i32, i32) {
    %c0_i32 = arith.constant 0 : i32
    %c0_i32_0 = arith.constant 0 : i32
    %c0_i32_1 = arith.constant 0 : i32
    return %c0_i32, %c0_i32_0 : i32, i32
  }
  func.func @transform_3(%arg0: i32) -> (i32, i32) {
    %c0_i32 = arith.constant 0 : i32
    %c0_i32_0 = arith.constant 0 : i32
    %c0_i32_1 = arith.constant 0 : i32
    return %c0_i32, %c0_i32_0 : i32, i32
  }
  func.func @transform_4(%arg0: i32) -> (i32, i32, i32) {
    %c0_i32 = arith.constant 0 : i32
    %c0_i32_0 = arith.constant 0 : i32
    %c0_i32_1 = arith.constant 0 : i32
    return %arg0, %c0_i32, %c0_i32_0 : i32, i32, i32
  }
  func.func @transform_5(%arg0: i32) -> (i32, i32, i32) {
    %c0_i32 = arith.constant 0 : i32
    %c0_i32_0 = arith.constant 0 : i32
    %c0_i32_1 = arith.constant 0 : i32
    return %arg0, %c0_i32, %c0_i32_0 : i32, i32, i32
  }
  func.func @transform_6(%arg0: i32) -> (i32, i32, i32) {
    %c0_i32 = arith.constant 0 : i32
    %c0_i32_0 = arith.constant 0 : i32
    %c0_i32_1 = arith.constant 0 : i32
    return %arg0, %c0_i32, %c0_i32_0 : i32, i32, i32
  }
  func.func @transform_7(%arg0: i32) -> (i32, i32, i32) {
    %c0_i32 = arith.constant 0 : i32
    %c0_i32_0 = arith.constant 0 : i32
    %c0_i32_1 = arith.constant 0 : i32
    return %arg0, %c0_i32, %c0_i32_0 : i32, i32, i32
  }
  func.func @transform_8(%arg0: i32) -> (i32, i32, i32) {
    %c0_i32 = arith.constant 0 : i32
    %c0_i32_0 = arith.constant 0 : i32
    %c0_i32_1 = arith.constant 0 : i32
    return %arg0, %c0_i32, %c0_i32_0 : i32, i32, i32
  }
  func.func @transform_9(%arg0: i32) -> (i32, i32, i32) {
    %c0_i32 = arith.constant 0 : i32
    %c0_i32_0 = arith.constant 0 : i32
    %c0_i32_1 = arith.constant 0 : i32
    return %arg0, %c0_i32, %c0_i32_0 : i32, i32, i32
  }
  func.func @transform_10(%arg0: i32) -> (i32, i32, i32) {
    %c0_i32 = arith.constant 0 : i32
    %c0_i32_0 = arith.constant 0 : i32
    %c0_i32_1 = arith.constant 0 : i32
    return %arg0, %c0_i32, %c0_i32_0 : i32, i32, i32
  }
  func.func @transform_11(%arg0: i32) -> (i32, i32, i32) {
    %c0_i32 = arith.constant 0 : i32
    %c0_i32_0 = arith.constant 0 : i32
    %c0_i32_1 = arith.constant 0 : i32
    return %arg0, %c0_i32, %c0_i32_0 : i32, i32, i32
  }
  func.func @transform_12(%arg0: i32) -> (i32, i32, i32) {
    %c0_i32 = arith.constant 0 : i32
    %c0_i32_0 = arith.constant 0 : i32
    %c0_i32_1 = arith.constant 0 : i32
    return %arg0, %c0_i32, %c0_i32_0 : i32, i32, i32
  }
  func.func @transform_13(%arg0: i32) -> (i32, i32) {
    %c0_i32 = arith.constant 0 : i32
    %c0_i32_0 = arith.constant 0 : i32
    %c0_i32_1 = arith.constant 0 : i32
    return %c0_i32, %c0_i32_0 : i32, i32
  }
}

</mosaic_0001>

<bundles_post_ra>
// kernel: tile.0
= control target key start
LH: loop header
LB: loop body
LE: loop exit
PB: predicated region body
PF: predicated region fallthrough
CT: control target
= control target key end

     0   :  { %vm3_vm0 = vcmask 7168   ;;  %s13_s11 = smov 127   ;;  %s36_s0 = inlined_call_operand.vmem [shape: s32[5,2], index: 0, kind: input, shape index: {}]   ;;  %s37_s1 = inlined_call_operand.vmem [shape: s32[10,1], index: 1, kind: output, shape index: {}]  }
   0x1   :  { %v2_v0 = vld [vmem:[%s36_s0] sm:$0x1f]  }
   0x2   :  { %v5_v1 = vld [vmem:[%s36_s0] sm:$0x1f]   ;;  %4 = vst.msk [vmem:[%s37_s1] ss:$2 sm:$0x1f] %vm3_vm0, %v2_v0  }
   0x3   :  { %6 = vrot.lane.b32.xlu0 %v5_v1, %s13_s11 }
  0x75   :  { %v7_v2 = vpop.permute.xlu0 %6  }
  0x76   :  { %11 = vst.msk [vmem:[%s37_s1 + $0x1] ss:$2 sm:$0x1f] %vm3_vm0, %v7_v2  }

// kernel: tile.17
= control target key start
LH: loop header
LB: loop body
LE: loop exit
PB: predicated region body
PF: predicated region fallthrough
CT: control target
= control target key end

     0   :  { %s43_s10 = smov 8   ;;  %s44_s11 = smov 4   ;;  %vm3_vm0 = vcmask 15360   ;;  %vm9_vm1 = vcmask 80960   ;;  %vm15_vm2 = vcmask 64560   ;;  %vm21_vm3 = vcmask 48160   ;;  %s75_s0 = inlined_call_operand.vmem [shape: s32[5,2], index: 0, kind: input, shape index: {}]   ;;  %s76_s1 = inlined_call_operand.vmem [shape: s32[1,10], index: 1, kind: output, shape index: {}]  }
   0x1   :  { %v35_v0 = vld [vmem:[%s75_s0 + $0x4] sm:$0x1]   ;;  %v37_v1 = vld [vmem:[%s75_s0 + $0x2] sm:$0x1]   ;;  %v36_v2 = vld [vmem:[%s75_s0 + $0x3] sm:$0x1]  }
   0x2   :  { %7 = vrot.lane.b32.xlu0 %v35_v0, %s43_s10  ;;  %19 = vrot.lane.b32.xlu1 %v37_v1, %s44_s11  ;;  %v38_v3 = vld [vmem:[%s75_s0 + $0x1] sm:$0x1]   ;;  %s45_s16 = smov 6   ;;  %s46_s17 = smov 2   ;;  %v2_v4 = vld [vmem:[%s75_s0] sm:$0x1]  }
   0x3   :  { %4 = vst.msk [vmem:[#allocation0] sm:$0x1] %vm3_vm0, %v2_v4   ;;  %vm27_vm4 = vcmask 31760  }
   0xa   :  { %13 = vrot.lane.b32.xlu0 %v36_v2, %s45_s16  ;;  %25 = vrot.lane.b32.xlu1 %v38_v3, %s46_s17 }
  0x74   :  { %v8_v5 = vpop.permute.xlu0 %7   ;;  %v20_v6 = vpop.permute.xlu1 %19  }
  0x75   :  { %10 = vst.msk [vmem:[#allocation0] sm:$0x1] %vm9_vm1, %v8_v5  }
  0x7c   :  { %v14_v7 = vpop.permute.xlu0 %13   ;;  %v26_v8 = vpop.permute.xlu1 %25  }
  0x7d   :  { %16 = vst.msk [vmem:[#allocation0] sm:$0x1] %vm15_vm2, %v14_v7  }
  0x7e   :  { %22 = vst.msk [vmem:[#allocation0] sm:$0x1] %vm21_vm3, %v20_v6  }
  0x7f   :  { %28 = vst.msk [vmem:[#allocation0] sm:$0x1] %vm27_vm4, %v26_v8  }
  0x86   :  { %v31_v9 = vld [vmem:[#allocation0] sm:$0x1] }
  0x87   :  { %34 = vst [vmem:[%s76_s1] sm:$0x1] %v31_v9 }

// kernel: tile.1
= control target key start
LH: loop header
LB: loop body
LE: loop exit
PB: predicated region body
PF: predicated region fallthrough
CT: control target
= control target key end

     0   :  { %vm3_vm0 = vcmask 7168   ;;  %s13_s9 = smov 127   ;;  %s33_s0 = inlined_call_operand.vmem [shape: s32[8,2], index: 0, kind: input, shape index: {}]   ;;  %s34_s1 = inlined_call_operand.vmem [shape: s32[16,1], index: 1, kind: output, shape index: {}]  }
   0x1   :  { %v2_v0 = vld [vmem:[%s33_s0] sm:$0xff]  }
   0x2   :  { %4 = vst.msk [vmem:[%s34_s1] ss:$2 sm:$0xff] %vm3_vm0, %v2_v0   ;;  %6 = vrot.lane.b32.xlu0 %v2_v0, %s13_s9 }
  0x74   :  { %v7_v1 = vpop.permute.xlu0 %6  }
  0x75   :  { %11 = vst.msk [vmem:[%s34_s1 + $0x1] ss:$2 sm:$0xff] %vm3_vm0, %v7_v1  }

// kernel: tile.23
= control target key start
LH: loop header
LB: loop body
LE: loop exit
PB: predicated region body
PF: predicated region fallthrough
CT: control target
= control target key end

     0   :  { %s67_s10 = smov 14   ;;  %s68_s11 = smov 10   ;;  %vm3_vm0 = vcmask 15360   ;;  %vm9_vm1 = vcmask 130160   ;;  %vm15_vm2 = vcmask 113760   ;;  %vm21_vm3 = vcmask 97360   ;;  %s111_s0 = inlined_call_operand.vmem [shape: s32[8,2], index: 0, kind: input, shape index: {}]   ;;  %s112_s1 = inlined_call_operand.vmem [shape: s32[1,16], index: 1, kind: output, shape index: {}]  }
   0x1   :  { %v53_v0 = vld [vmem:[%s111_s0 + $0x7] sm:$0x1]   ;;  %v55_v1 = vld [vmem:[%s111_s0 + $0x5] sm:$0x1]   ;;  %v57_v2 = vld [vmem:[%s111_s0 + $0x3] sm:$0x1]  }
   0x2   :  { %7 = vrot.lane.b32.xlu0 %v53_v0, %s67_s10  ;;  %19 = vrot.lane.b32.xlu1 %v55_v1, %s68_s11  ;;  %s69_s14 = smov 6   ;;  %v54_v3 = vld [vmem:[%s111_s0 + $0x6] sm:$0x1]   ;;  %v56_v4 = vld [vmem:[%s111_s0 + $0x4] sm:$0x1]   ;;  %s70_s21 = smov 12  }
   0x3   :  { %31 = vrot.lane.b32.xlu2 %v57_v2, %s69_s14  ;;  %v58_v5 = vld [vmem:[%s111_s0 + $0x2] sm:$0x1]   ;;  %s71_s22 = smov 8   ;;  %s72_s23 = smov 4   ;;  %v59_v6 = vld [vmem:[%s111_s0 + $0x1] sm:$0x1]  }
   0x4   :  { %s73_s26 = smov 2   ;;  %v2_v7 = vld [vmem:[%s111_s0] sm:$0x1]   ;;  %vm27_vm4 = vcmask 80960   ;;  %vm33_vm5 = vcmask 64560   ;;  %vm39_vm6 = vcmask 48160  }
   0x5   :  { %4 = vst.msk [vmem:[#allocation0] sm:$0x1] %vm3_vm0, %v2_v7   ;;  %vm45_vm7 = vcmask 31760  }
   0xa   :  { %13 = vrot.lane.b32.xlu0 %v54_v3, %s70_s21  ;;  %25 = vrot.lane.b32.xlu1 %v56_v4, %s71_s22 }
   0xb   :  { %37 = vrot.lane.b32.xlu2 %v58_v5, %s72_s23 }
  0x12   :  { %43 = vrot.lane.b32.xlu0 %v59_v6, %s73_s26 }
  0x5d   :  { %v32_v8 = vpop.permute.xlu2 %31  }
  0x65   :  { %v38_v9 = vpop.permute.xlu2 %37  }
  0x74   :  { %v8_v10 = vpop.permute.xlu0 %7   ;;  %v20_v11 = vpop.permute.xlu1 %19  }
  0x75   :  { %10 = vst.msk [vmem:[#allocation0] sm:$0x1] %vm9_vm1, %v8_v10  }
  0x7c   :  { %v14_v12 = vpop.permute.xlu0 %13   ;;  %v26_v13 = vpop.permute.xlu1 %25  }
  0x7d   :  { %16 = vst.msk [vmem:[#allocation0] sm:$0x1] %vm15_vm2, %v14_v12  }
  0x7e   :  { %22 = vst.msk [vmem:[#allocation0] sm:$0x1] %vm21_vm3, %v20_v11  }
  0x7f   :  { %28 = vst.msk [vmem:[#allocation0] sm:$0x1] %vm27_vm4, %v26_v13  }
  0x80   :  { %34 = vst.msk [vmem:[#allocation0] sm:$0x1] %vm33_vm5, %v32_v8  }
  0x81   :  { %40 = vst.msk [vmem:[#allocation0] sm:$0x1] %vm39_vm6, %v38_v9  }
  0x84   :  { %v44_v14 = vpop.permute.xlu0 %43  }
  0x85   :  { %46 = vst.msk [vmem:[#allocation0] sm:$0x1] %vm45_vm7, %v44_v14  }
  0x8c   :  { %v49_v15 = vld [vmem:[#allocation0] sm:$0x1] }
  0x8d   :  { %52 = vst [vmem:[%s112_s1] sm:$0x1] %v49_v15 }

// kernel: multimodal_forward.5
= control target key start
LH: loop header
LB: loop body
LE: loop exit
PB: predicated region body
PF: predicated region fallthrough
CT: control target
= control target key end

     0   :  { %vm38_vm0 = vcmask 261120   ;;  %vm96_vm1 = vcmask 254976   ;;  %vm105_vm2 = vcmask 1024   ;;  %s198_s3 = inlined_call_operand.vmem [shape: f32[32,32], index: 3, kind: input, shape index: {}]   ;;  %s199_s2 = inlined_call_operand.vmem [shape: f32[32,32], index: 2, kind: input, shape index: {}]   ;;  %s200_s1 = inlined_call_operand.vmem [shape: f32[2,32], index: 1, kind: input, shape index: {}]   ;;  %s201_s0 = inlined_call_operand.vmem [shape: f32[2,32], index: 0, kind: input, shape index: {}]   ;;  %s202_s4 = inlined_call_operand.vmem [shape: f32[1,32], index: 4, kind: input, shape index: {}]   ;;  %s203_s5 = inlined_call_operand.vmem [shape: f32[1,32], index: 5, kind: input, shape index: {}]   ;;  %s204_s6 = inlined_call_operand.<no memory space> [shape: f32[1,1], index: 6, kind: input, shape index: {}]   ;;  %s205_s7 = inlined_call_operand.vmem [shape: f32[2,1], index: 7, kind: output, shape index: {}]  }
   0x1   :  { %v37_v0 = vld [vmem:[%s198_s3 + $0x18] sm:$0xff]  ;;  %v36_v2 = vld [vmem:[%s198_s3 + $0x10] sm:$0xff]  ;;  %v35_v4 = vld [vmem:[%s198_s3 + $0x8] sm:$0xff]  ;;  %v12_v10 = vstv %s204_s6 }
   0x2   :  { %v32_v1 = vld [vmem:[%s199_s2 + $0x18] sm:$0xff]  ;;  %54 = vmatpush.msra.mxu0 %v37_v0  ;;  %v31_v3 = vld [vmem:[%s199_s2 + $0x10] sm:$0xff]  ;;  %v30_v5 = vld [vmem:[%s199_s2 + $0x8] sm:$0xff]  ;;  %13 = vst [vmem:[#allocation2] sm:$0x1] %v12_v10 }
   0x3   :  { %77 = vmatpush.msra.mxu1 %v32_v1  ;;  %v34_v6 = vld [vmem:[%s198_s3] sm:$0xff] }
   0x4   :  { %55 = vmatpush.msra.mxu0 %v36_v2  ;;  %v29_v7 = vld [vmem:[%s199_s2] sm:$0xff] }
   0x5   :  { %78 = vmatpush.msra.mxu1 %v31_v3  ;;  %v33_v8 = vld [vmem:[%s200_s1] sm:$0x3] }
   0x6   :  { %56 = vmatpush.msra.mxu0 %v35_v4  ;;  %v28_v9 = vld [vmem:[%s201_s0] sm:$0x3] }
   0x7   :  { %79 = vmatpush.msra.mxu1 %v30_v5  ;;  %v113_v11 = vld [vmem:[%s202_s4] ss:$0 sm:$0xff] }
   0x8   :  { %57 = vmatpush.msra.mxu0 %v34_v6  ;;  %v114_v16 = vld [vmem:[%s203_s5] ss:$0 sm:$0xff] }
   0x9   :  { %80 = vmatpush.msra.mxu1 %v29_v7  ;;  %111 = vmatmul.msk.f32.vlgmr.msra.gmra.mxu0 %vm38_vm0, %v33_v8  ;;  %v115_v20 = vld [vmem:[#allocation2] ss:$0 sm:$0xff] }
   0xa   :  { %112 = vmatmul.msk.f32.vlgmr.msra.gmra.mxu1 %vm38_vm0, %v28_v9 }
  0x86   :  { %v59_v12 = vpop.f32.mrf.mxu0 }
  0x87   :  { %v82_v13 = vpop.f32.mrf.mxu1 }
  0x88   :  { %v83_v14 = vadd.f32 %v82_v13, %v59_v12 }
  0x8a   :  { %v89_v15 = vadd.f32 %v113_v11, %v83_v14 }
  0x8c   :  { %v90_v17 = vmax.f32 %v89_v15, 0.0 }
  0x8e   :  { %v95_v18 = vmul.f32 %v114_v16, %v90_v17 }
  0x90   :  { %v97_v19 = vsel %vm96_vm1, %v95_v18, 0.0 }
  0x91   :  { %98 = vadd.xlane.f32.xlu0 %v97_v19 }
 0x104   :  { %v99_v21 = vpop.xlane.xlu0 %98 }
 0x105   :  { %v104_v22 = vadd.f32 %v115_v20, %v99_v21 }
 0x107   :  { %106 = vst.msk [vmem:[%s205_s7] sm:$0x3] %vm105_vm2, %v104_v22 }

// kernel: multimodal_forward.4
= control target key start
LH: loop header
LB: loop body
LE: loop exit
PB: predicated region body
PF: predicated region fallthrough
CT: control target
= control target key end

     0   :  { %s1603_s25 = smov 0   ;;  %s1798_s0 = inlined_call_operand.vmem [shape: f32[16,32], index: 0, kind: input, shape index: {}]   ;;  %s1799_s1 = inlined_call_operand.vmem [shape: s32[16,1], index: 1, kind: input, shape index: {}]   ;;  %s1800_s2 = inlined_call_operand.vmem [shape: s32[1,16], index: 2, kind: input, shape index: {}]   ;;  %s1801_s3 = inlined_call_operand.vmem [shape: f32[1,16], index: 3, kind: input, shape index: {}]   ;;  %s1802_s4 = inlined_call_operand.vmem [shape: bf16[2,32,96], index: 4, kind: input, shape index: {}]   ;;  %s1803_s5 = inlined_call_operand.vmem [shape: f32[2,1,96], index: 5, kind: input, shape index: {}]   ;;  %s1804_s6 = inlined_call_operand.vmem [shape: bf16[2,32,32], index: 6, kind: input, shape index: {}]   ;;  %s1805_s7 = inlined_call_operand.vmem [shape: f32[2,1,32], index: 7, kind: input, shape index: {}]   ;;  %s1806_s8 = inlined_call_operand.vmem [shape: bf16[2,32,64], index: 8, kind: input, shape index: {}]   ;;  %s1807_s9 = inlined_call_operand.vmem [shape: f32[2,1,64], index: 9, kind: input, shape index: {}]   ;;  %s1808_s10 = inlined_call_operand.vmem [shape: bf16[2,64,32], index: 10, kind: input, shape index: {}]   ;;  %s1809_s11 = inlined_call_operand.vmem [shape: f32[2,1,32], index: 11, kind: input, shape index: {}]   ;;  %s1810_s12 = inlined_call_operand.vmem [shape: f32[2,4,32], index: 12, kind: input, shape index: {}]   ;;  %s1811_s13 = inlined_call_operand.vmem [shape: f32[2,32], index: 13, kind: output, shape index: {}]  }
   0x1   :  { %1813 = sst [smem:[#allocation5_spill]] %s1802_s4 }
   0x2   :  { %1814 = sst [smem:[#allocation6_spill]] %s1803_s5 }
   0x3   :  { %1815 = sst [smem:[#allocation7_spill]] %s1804_s6 }
   0x4   :  { %1816 = sst [smem:[#allocation8_spill]] %s1805_s7 }
   0x5   :  { %1817 = sst [smem:[#allocation9_spill]] %s1811_s13 }
   0x6 LB: > { %1818 = sst [smem:[#allocation4_spill]] %s1518_s25  ;;  %s1609_s26 = sadd.s32 4294967295, %s1518_s25   ;;  %s1518_s25 = sphi %s1603_s25, %s23_s25  }
   0x7   : > { %p1356_p0 = scmp.ge.s32.totalorder %s1518_s25, 1  ;;  %p453_p1 = scmp.lt.s32.totalorder %s1518_s25, 3 }
   0x9   : > { %p454_p2 = pnand %p1356_p0, %p453_p1 }
   0xa   : > { %p523_p3 = scmp.lt.s32.totalorder (!%p454_p2), %s1609_s26, 1  ;;  %s1819_s5 = sld [smem:[#allocation6_spill]] (!%p454_p2) }
   0xb   : > { %457 = sbr.rel (%p454_p2) target bundleno = 2528 (0x9e0), region = 72  ;;  %s1820_s4 = sld [smem:[#allocation5_spill]] (!%p454_p2) }
   0xc   : > { %s1821_s6 = sld [smem:[#allocation7_spill]] (!%p454_p2)  ;;  %p1366_p4 = scmp.ne.s32.totalorder (!%p454_p2), %s1609_s26, 0 }
  0x10   : > { %s1615_s27 = scalar_select %p523_p3, %s1609_s26, 1 }
  0x12   : > { %s1422_s28 = sshll.u32 %s1615_s27, 4  ;;  %s530_s14 = scalar_lea.vmem %s1819_s5, %s1615_s27 }
  0x13   : > { %s527_s17 = scalar_lea.vmem %s1820_s4, %s1422_s28  ;;  %s1628_s20 = scalar_lea.vmem %s1821_s6, %s1422_s28 }
  0x14   : > { %s1637_s13 = scalar_lea.vmem %s1806_s8, %s1422_s28  ;;  %s546_s5 = scalar_lea.vmem %s1807_s9, %s1615_s27 }
  0x15   : > { %s1425_s15 = sshll.u32 %s1615_s27, 5  ;;  %s554_s21 = scalar_lea.vmem %s1809_s11, %s1615_s27 }
  0x16   : > { %s1647_s18 = scalar_lea.vmem %s1808_s10, %s1425_s15  ;;  %s1365_s22 = sshll.u32 %s1615_s27, 2 }
  0x17   : > { %s1657_s25 = scalar_lea.vmem %s1810_s12, %s1365_s22  ;;  %563 = sbr.rel (%p1366_p4) target bundleno = 31 (0x1f), region = 76 }
  0x1c   : > { %v564_v0 = vld [vmem:[%s1798_s0] sm:$0xff]  ;;  %vm566_vm0 = vcmask 261120   ;;  %v565_v1 = vld [vmem:[%s1798_s0 + $0x8] sm:$0xff] }
  0x1d   : > { %567 = vst.msk [vmem:[#allocation2] sm:$0xff] %vm566_vm0, %v564_v0 }
  0x1e   : > { %568 = vst.msk [vmem:[#allocation2 + $0x8] sm:$0xff] %vm566_vm0, %v565_v1 }
  0x1f PF: > { %v1427_v2 = vld [vmem:[%s527_s17 + $0x8] sm:$0xff]  ;;  %v1426_v3 = vld [vmem:[%s527_s17] sm:$0xff]  ;;  %vm616_vm1 = vcmask 261120   ;;  %s1520_s6 = smov 96   ;;  %v1521_v16 = vmov 0   ;;  %vm680_vm2 = vcmask 1043456  }
  0x20   : > { %626 = vmatpush.bf16.msra.mxu0 %v1427_v2  ;;  %v1460_v7 = vld [vmem:[%s530_s14] ss:$0 sm:$0xff]  ;;  %1458 = vset.pattern.permute.xlu2 %v1521_v16  ;;  %v570_v17 = vld [vmem:[%s1799_s1 + $0x8] sm:$0xff]  ;;  %vm676_vm3 = vcmask 64512   ;;  %vm698_vm5 = vcmask 130048   ;;  %s1522_s22 = smov 64  }
  0x21   : > { %v569_v15 = vld [vmem:[%s1799_s1] sm:$0xff]  ;;  %1459 = vset.pattern.permute.xlu0 %v1521_v16  ;;  %s1523_s28 = smov 112   ;;  %s1524_s24 = smov 104   ;;  %vm819_vm7 = vcmask 130112   ;;  %vm896_vm8 = vcmask 195712   ;;  %vm973_vm9 = vcmask 261312  }
  0x22   : > { %573 = vperm.xlu2 %1458, %v569_v15   ;;  %v1461_v21 = vld [vmem:[%s1800_s2] ss:$0 sm:$0xff]  ;;  %s1525_s4 = smov 120   ;;  %s1526_s29 = smov 56  }
  0x23   : > { %v1462_v23 = vld [vmem:[%s1801_s3] ss:$0 sm:$0xff]  ;;  %s1528_s7 = smov 40   ;;  %s1529_s17 = smov 8  }
  0x24   : > { %v1666_v4 = vld [vmem:[#allocation2] sm:$0xff]  ;;  %627 = vmatpush.bf16.msra.mxu0 %v1426_v3  ;;  %s1530_s14 = smov 16   ;;  %s1531_s23 = smov 24  }
  0x25   : > { %v1668_v5 = vld [vmem:[#allocation2 + $0x8] sm:$0xff]  ;;  %s1823_s16 = sld [smem:[#allocation8_spill]]  ;;  %p1419_p5 = scmp.ne.s32.totalorder %s1609_s26, 1 }
  0x26   : > { %v600_v6 = vpack.c.bf16 %v1668_v5, %v1666_v4 }
  0x28   : > { %1375 = vmatmul.msk.bf16.vlgmr.msra.gmra.mxu0 %vm616_vm1, %v600_v6 }
  0x2a   : > { %576 = vperm.xlu2 %1458, %v570_v17  }
  0x2b   : > { %s1824_s19 = scalar_lea.vmem %s1823_s16, %s1615_s27 }
  0x7c   : > { %v574_v22 = vpop.permute.xlu2 %573 }
  0x7d   : > { %vm579_vm4 = vcmp.eq.s32.totalorder %v574_v22, %v1461_v21 }
  0x7e   : > { %v1690_v24 = vsel %vm579_vm4, %v1462_v23, -1e+09 }
  0x84   : > { %v577_v27 = vpop.permute.xlu2 %576 }
  0x85   : > { %vm580_vm6 = vcmp.eq.s32.totalorder %v577_v27, %v1461_v21 }
  0x86   : > { %v1694_v29 = vsel %vm580_vm6, %v1462_v23, -1e+09 }
  0xa5   : > { %v629_v8 = vpop.f32.mrf.mxu0 }
  0xa6   : > { %v630_v9 = vadd.f32 %v1460_v7, %v629_v8 }
  0xa8   : > { %636 = vrot.lane.b32.xlu0 %v630_v9, %s1520_s6 }
  0xad   : > { %v631_v10 = vpop.f32.mrf.mxu0 }
  0xae   : > { %v632_v11 = vadd.f32 %v1460_v7, %v631_v10 }
  0xb0   : > { %v1673_v12 = vpack.c.bf16 %v632_v11, %v630_v9  ;;  %638 = vrot.lane.b32.xlu0 %v632_v11, %s1520_s6  ;;  %s1527_s6 = smov 48  }
 0x11a   : > { %v637_v13 = vpop.permute.xlu0 %636 }
 0x11b   : > { %642 = vxpose.xlu1.b32.start [1/2] (short) (narrow) %v637_v13, 32 }
 0x122   : > { %v639_v14 = vpop.permute.xlu0 %638 }
 0x123   : > { %643 = vxpose.xlu1.b32.end [2/2] (short) (narrow) %v639_v14, 32 }
 0x1bf   : > { %v658_v18 = vpop.trf.xlu1 }
 0x1c0   : > { %v675_v19 = vpack.c.bf16 %v658_v18, %v658_v18 }
 0x1c2   : > { %v682_v20 = vsel %vm680_vm2, %v675_v19, 0 }
 0x1c3   : > { %691 = vmatpush.bf16.msra.mxu1 %v682_v20 }
 0x1c6   : > { %1376 = vmatmul.msk.bf16.vlgmr.msra.gmra.mxu1 %vm676_vm3, %v1673_v12 }
 0x1c7   : > { %v659_v31 = vpop.trf.xlu1 }
 0x1c8   : > { %v745_v33 = vpack.c.bf16 %v659_v31, %v659_v31 }
 0x1ca   : > { %v752_v35 = vsel %vm680_vm2, %v745_v33, 0 }
 0x1cb   : > { %761 = vmatpush.bf16.msra.mxu3 %v752_v35 }
 0x1cf   : > { %v660_v36 = vpop.trf.xlu1 }
 0x1d0   : > { %v822_v48 = vpack.c.bf16 %v660_v36, %v660_v36 }
 0x1d2   : > { %v829_v51 = vsel %vm680_vm2, %v822_v48, 0 }
 0x1d7   : > { %v661_v37 = vpop.trf.xlu1 }
 0x1d8   : > { %v899_v38 = vpack.c.bf16 %v661_v37, %v661_v37 }
 0x1da   : > { %v906_v39 = vsel %vm680_vm2, %v899_v38, 0  ;;  %vm1163_vm2 = vcmask 523264  }
 0x1db   : > { %915 = vmatpush.bf16.msrb.mxu0 %v906_v39 }
 0x243   : > { %v693_v25 = vpop.f32.mrf.mxu1 }
 0x244   : > { %v694_v26 = vadd.f32 %v693_v25, %v1690_v24 }
 0x246   : > { %v699_v28 = vsel %vm698_vm5, %v694_v26, -inf }
 0x247   : > { %700 = vmax.xlane.f32.xlu0 %v699_v28 }
 0x24b   : > { %v695_v30 = vpop.f32.mrf.mxu1 }
 0x24c   : > { %v696_v32 = vadd.f32 %v695_v30, %v1694_v29 }
 0x24e   : > { %v702_v34 = vsel %vm698_vm5, %v696_v32, -inf }
 0x24f   : > { %703 = vmax.xlane.f32.xlu1 %v702_v34 }
 0x25b   : > { %723 = vrot.lane.b32.xlu0 %v1673_v12, %s1522_s22 }
 0x263   : > { %823 = vrot.lane.b32.xlu0 %v1673_v12, %s1523_s28 }
 0x26b   : > { %900 = vrot.lane.b32.xlu0 %v1673_v12, %s1524_s24 }
 0x2ba   : > { %v701_v40 = vpop.xlane.xlu0 %700 }
 0x2bb   : > { %v705_v41 = vsub.f32 %v694_v26, %v701_v40 }
 0x2bd   : > { %v707_v42 = vmul.f32 1.442695, %v705_v41 }
 0x2bf   : > { %1466 = vpow2.f32 %v707_v42 }
 0x2c2   : > { %v704_v43 = vpop.xlane.xlu1 %703 }
 0x2c3   : > { %v706_v44 = vsub.f32 %v696_v32, %v704_v43 }
 0x2c5   : > { %v1467_v45 = vpop.eup %1466  ;;  %v709_v46 = vmul.f32 1.442695, %v706_v44 }
 0x2c6   : > { %v711_v47 = vsel %vm698_vm5, %v1467_v45, 0.0 }
 0x2c7   : > { %1468 = vpow2.f32 %v709_v46  ;;  %712 = vadd.xlane.f32.xlu2 %v711_v47 }
 0x2cd   : > { %v1469_v49 = vpop.eup %1468  ;;  %v724_v50 = vpop.permute.xlu0 %723 }
 0x2ce   : > { %736 = vmatpush.bf16.msra.mxu2 %v724_v50  ;;  %v714_v52 = vsel %vm698_vm5, %v1469_v49, 0.0 }
 0x2cf   : > { %715 = vadd.xlane.f32.xlu2 %v714_v52 }
 0x2d2   : > { %838 = vmatpush.bf16.msrb.mxu2 %v829_v51 }
 0x2d5   : > { %v824_v53 = vpop.permute.xlu0 %823 }
 0x2dd   : > { %v901_v54 = vpop.permute.xlu0 %900 }
 0x2de   : > { %1382 = vmatmul.msk.bf16.vlgmr.msrb.gmra.mxu0 %vm676_vm3, %v901_v54 }
 0x2e7   : > { %746 = vrot.lane.b32.xlu2 %v1673_v12, %s1525_s4 }
 0x33a   : > { %v713_v55 = vpop.xlane.xlu2 %712 }
 0x33b   : > { %1470 = vrcp.f32 %v713_v55 }
 0x341   : > { %v1471_v57 = vpop.eup %1470 }
 0x342   : > { %v716_v56 = vpop.xlane.xlu2 %715  ;;  %v719_v60 = vmul.f32 %v1471_v57, %v1467_v45 }
 0x343   : > { %1472 = vrcp.f32 %v716_v56 }
 0x349   : > { %v1473_v58 = vpop.eup %1472 }
 0x34a   : > { %v747_v59 = vpop.permute.xlu2 %746  ;;  %v720_v61 = vmul.f32 %v1473_v58, %v1469_v49 }
 0x34b   : > { %1378 = vmatmul.msk.bf16.vlgmr.msra.gmra.mxu3 %vm676_vm3, %v747_v59 }
 0x34c   : > { %v721_v62 = vpack.c.bf16 %v720_v61, %v719_v60 }
 0x34e   : > { %1377 = vmatmul.msk.bf16.vlgmr.msra.gmra.mxu2 %vm698_vm5, %v721_v62 }
 0x35b   : > { %v917_v9 = vpop.f32.mrf.mxu0 }
 0x35c   : > { %v918_v10 = vadd.f32 %v917_v9, %v1690_v24 }
 0x35e   : > { %1380 = vmatmul.msk.bf16.vlgmr.msrb.gmra.mxu2 %vm676_vm3, %v824_v53  ;;  %v922_v13 = vsel %vm698_vm5, %v918_v10, -inf }
 0x363   : > { %v919_v16 = vpop.f32.mrf.mxu0 }
 0x364   : > { %v920_v17 = vadd.f32 %v919_v16, %v1694_v29 }
 0x366   : > { %v925_v20 = vsel %vm698_vm5, %v920_v17, -inf }
 0x3ce   : > { %v763_v63 = vpop.f32.mrf.mxu3 }
 0x3cf   : > { %v764_v0 = vadd.f32 %v763_v63, %v1690_v24 }
 0x3d1   : > { %v738_v1 = vpop.f32.mrf.mxu2  ;;  %v768_v2 = vsel %vm698_vm5, %v764_v0, -inf }
 0x3d2   : > { %743 = vst.msk [vmem:[#allocation3] sm:$0xff] %vm676_vm3, %v738_v1  ;;  %769 = vmax.xlane.f32.xlu2 %v768_v2 }
 0x3d6   : > { %v765_v3 = vpop.f32.mrf.mxu3 }
 0x3d7   : > { %v766_v6 = vadd.f32 %v765_v3, %v1694_v29 }
 0x3d9   : > { %v740_v7 = vpop.f32.mrf.mxu2  ;;  %v771_v8 = vsel %vm698_vm5, %v766_v6, -inf }
 0x3da   : > { %744 = vst.msk [vmem:[#allocation3 + $0x8] sm:$0xff] %vm676_vm3, %v740_v7  ;;  %772 = vmax.xlane.f32.xlu0 %v771_v8 }
 0x3e1   : > { %v840_v11 = vpop.f32.mrf.mxu2 }
 0x3e2   : > { %v841_v14 = vadd.f32 %v840_v11, %v1690_v24  ;;  %923 = vmax.xlane.f32.xlu0 %v922_v13 }
 0x3e4   : > { %v845_v15 = vsel %vm698_vm5, %v841_v14, -inf }
 0x3e5   : > { %846 = vmax.xlane.f32.xlu1 %v845_v15 }
 0x3e9   : > { %v842_v18 = vpop.f32.mrf.mxu2 }
 0x3ea   : > { %v843_v19 = vadd.f32 %v842_v18, %v1694_v29 }
 0x3ec   : > { %v848_v21 = vsel %vm698_vm5, %v843_v19, -inf }
 0x3ed   : > { %926 = vmax.xlane.f32.xlu1 %v925_v20  ;;  %849 = vmax.xlane.f32.xlu2 %v848_v21 }
 0x406   : > { %791 = vrot.lane.b32.xlu1 %v1673_v12, %s1526_s29 }
 0x445   : > { %v770_v22 = vpop.xlane.xlu2 %769 }
 0x446   : > { %v774_v23 = vsub.f32 %v764_v0, %v770_v22  ;;  %v1429_v22 = vld [vmem:[%s1628_s20 + $0x8] sm:$0xff] }
 0x447   : > { %1003 = vmatpush.bf16.msra.mxu2 %v1429_v22 }
 0x448   : > { %v776_v24 = vmul.f32 1.442695, %v774_v23 }
 0x44a   : > { %1474 = vpow2.f32 %v776_v24  ;;  %v1428_v24 = vld [vmem:[%s1628_s20] sm:$0xff] }
 0x44b   : > { %1004 = vmatpush.bf16.msra.mxu2 %v1428_v24 }
 0x44d   : > { %v773_v25 = vpop.xlane.xlu0 %772 }
 0x44e   : > { %v775_v26 = vsub.f32 %v766_v6, %v773_v25 }
 0x450   : > { %v1475_v27 = vpop.eup %1474  ;;  %v778_v28 = vmul.f32 1.442695, %v775_v26 }
 0x451   : > { %v780_v30 = vsel %vm698_vm5, %v1475_v27, 0.0 }
 0x452   : > { %1476 = vpow2.f32 %v778_v28  ;;  %781 = vadd.xlane.f32.xlu2 %v780_v30 }
 0x455   : > { %v924_v29 = vpop.xlane.xlu0 %923 }
 0x456   : > { %v928_v31 = vsub.f32 %v918_v10, %v924_v29 }
 0x458   : > { %v1477_v32 = vpop.eup %1476  ;;  %v930_v33 = vmul.f32 1.442695, %v928_v31  ;;  %v847_v34 = vpop.xlane.xlu1 %846  ;;  %v1463_v31 = vld [vmem:[%s1824_s19] ss:$0 sm:$0xff] }
 0x459   : > { %v851_v35 = vsub.f32 %v841_v14, %v847_v34  ;;  %v783_v36 = vsel %vm698_vm5, %v1477_v32, 0.0 }
 0x45a   : > { %1478 = vpow2.f32 %v930_v33  ;;  %784 = vadd.xlane.f32.xlu0 %v783_v36 }
 0x45b   : > { %v853_v37 = vmul.f32 1.442695, %v851_v35 }
 0x45d   : > { %1480 = vpow2.f32 %v853_v37 }
 0x460   : > { %v1479_v38 = vpop.eup %1478  ;;  %v927_v39 = vpop.xlane.xlu1 %926 }
 0x461   : > { %v850_v40 = vpop.xlane.xlu2 %849  ;;  %v929_v41 = vsub.f32 %v920_v17, %v927_v39  ;;  %v934_v42 = vsel %vm698_vm5, %v1479_v38, 0.0 }
 0x462   : > { %935 = vadd.xlane.f32.xlu2 %v934_v42  ;;  %v852_v44 = vsub.f32 %v843_v19, %v850_v40  ;;  %v1532_v40 = vmov 32.0  }
 0x463   : > { %v932_v43 = vmul.f32 1.442695, %v929_v41  ;;  %v1481_v45 = vpop.eup %1480 }
 0x464   : > { %v855_v46 = vmul.f32 1.442695, %v852_v44  ;;  %v857_v47 = vsel %vm698_vm5, %v1481_v45, 0.0 }
 0x465   : > { %1482 = vpow2.f32 %v932_v43 }
 0x466   : > { %1484 = vpow2.f32 %v855_v46 }
 0x46a   : > { %858 = vadd.xlane.f32.xlu2 %v857_v47 }
 0x46b   : > { %v1483_v48 = vpop.eup %1482 }
 0x46c   : > { %v937_v49 = vsel %vm698_vm5, %v1483_v48, 0.0  ;;  %v1485_v50 = vpop.eup %1484 }
 0x46d   : > { %938 = vadd.xlane.f32.xlu0 %v937_v49  ;;  %v860_v51 = vsel %vm698_vm5, %v1485_v50, 0.0 }
 0x475   : > { %861 = vadd.xlane.f32.xlu0 %v860_v51 }
 0x478   : > { %v792_v52 = vpop.permute.xlu1 %791 }
 0x479   : > { %804 = vmatpush.bf16.msrb.mxu1 %v792_v52 }
 0x482   : > { %868 = vrot.lane.b32.xlu2 %v1673_v12, %s1527_s6 }
 0x489   : > { %945 = vrot.lane.b32.xlu0 %v1673_v12, %s1528_s7 }
 0x4c5   : > { %v782_v53 = vpop.xlane.xlu2 %781 }
 0x4c6   : > { %1486 = vrcp.f32 %v782_v53 }
 0x4cc   : > { %v1487_v55 = vpop.eup %1486 }
 0x4cd   : > { %v785_v54 = vpop.xlane.xlu0 %784  ;;  %v788_v57 = vmul.f32 %v1487_v55, %v1475_v27  ;;  %v1431_v55 = vld [vmem:[%s1637_s13 + $0x8] sm:$0xff] }
 0x4ce   : > { %1488 = vrcp.f32 %v785_v54 }
 0x4d4   : > { %v1489_v56 = vpop.eup %1488 }
 0x4d5   : > { %v789_v58 = vmul.f32 %v1489_v56, %v1477_v32  ;;  %v936_v59 = vpop.xlane.xlu2 %935 }
 0x4d7   : > { %v790_v60 = vpack.c.bf16 %v789_v58, %v788_v57 }
 0x4d9   : > { %1379 = vmatmul.msk.bf16.vlgmr.msrb.gmra.mxu1 %vm698_vm5, %v790_v60 }
 0x4dd   : > { %v859_v61 = vpop.xlane.xlu2 %858 }
 0x4de   : > { %1490 = vrcp.f32 %v859_v61 }
 0x4e0   : > { %v939_v62 = vpop.xlane.xlu0 %938 }
 0x4e4   : > { %v1491_v12 = vpop.eup %1490 }
 0x4e5   : > { %v869_v63 = vpop.permute.xlu2 %868  ;;  %v865_v2 = vmul.f32 %v1491_v12, %v1481_v45 }
 0x4e6   : > { %881 = vmatpush.bf16.msrb.mxu3 %v869_v63 }
 0x4e8   : > { %v862_v0 = vpop.xlane.xlu0 %861 }
 0x4e9   : > { %1492 = vrcp.f32 %v862_v0 }
 0x4ea   : > { %1494 = vrcp.f32 %v939_v62  ;;  %1109 = vmatpush.bf16.msra.mxu3 %v1431_v55 }
 0x4eb   : > { %1496 = vrcp.f32 %v936_v59  ;;  %v1430_v59 = vld [vmem:[%s1637_s13] sm:$0xff] }
 0x4ec   : > { %1498 = vrcp.f32 %v1532_v40 }
 0x4ee   : > { %1110 = vmatpush.bf16.msra.mxu3 %v1430_v59 }
 0x4ef   : > { %v1493_v1 = vpop.eup %1492 }
 0x4f0   : > { %v866_v3 = vmul.f32 %v1493_v1, %v1485_v50  ;;  %v1495_v7 = vpop.eup %1494 }
 0x4f1   : > { %v1497_v8 = vpop.eup %1496  ;;  %v943_v9 = vmul.f32 %v1495_v7, %v1483_v48 }
 0x4f2   : > { %v867_v6 = vpack.c.bf16 %v866_v3, %v865_v2  ;;  %v942_v10 = vmul.f32 %v1497_v8, %v1479_v38  ;;  %v1499_v41 = vpop.eup %1498 }
 0x4f3   : > { %v1020_v42 = vmul.f32 32.0, %v1499_v41  ;;  %vm1024_vm10 = vweird.f32 %v1499_v41 }
 0x4f4   : > { %1381 = vmatmul.msk.bf16.vlgmr.msrb.gmra.mxu3 %vm698_vm5, %v867_v6  ;;  %v944_v13 = vpack.c.bf16 %v943_v9, %v942_v10  ;;  %v1760_v9 = vld [vmem:[%s1657_s25] sm:$0xf]  ;;  %s1825_s25 = sld [smem:[#allocation9_spill]] (!%p1419_p5) }
 0x4f5   : > { %v1021_v43 = vsub.f32 1.0, %v1020_v42 }
 0x4f7   : > { %v1022_v44 = vmul.f32 %v1499_v41, %v1021_v43 }
 0x4f9   : > { %v1023_v45 = vadd.f32 %v1499_v41, %v1022_v44 }
 0x4fb   : > { %v946_v11 = vpop.permute.xlu0 %945 }
 0x4fc   : > { %958 = vmatpush.bf16.msra.mxu1 %v946_v11 }
 0x4ff   : > { %1383 = vmatmul.msk.bf16.vlgmr.msra.gmra.mxu1 %vm698_vm5, %v944_v13 }
 0x556   : > { %v806_v14 = vpop.f32.mrf.mxu1 }
 0x557   : > { %813 = vrot.lane.b32.xlu1 %v806_v14, %s1529_s17  ;;  %v1064_v14 = vperm.slane %v1760_v9, 0 }
 0x55e   : > { %v808_v15 = vpop.f32.mrf.mxu1 }
 0x55f   : > { %815 = vrot.lane.b32.xlu1 %v808_v15, %s1529_s17 }
 0x577   : > { %v883_v16 = vpop.f32.mrf.mxu3 }
 0x578   : > { %890 = vrot.lane.b32.xlu1 %v883_v16, %s1530_s14 }
 0x57c   : > { %v960_v17 = vpop.f32.mrf.mxu1 }
 0x57d   : > { %967 = vrot.lane.b32.xlu0 %v960_v17, %s1531_s23 }
 0x57f   : > { %v885_v18 = vpop.f32.mrf.mxu3 }
 0x580   : > { %892 = vrot.lane.b32.xlu2 %v885_v18, %s1530_s14  ;;  %v1067_v18 = vperm.slane %v1760_v9, 1 }
 0x584   : > { %v962_v19 = vpop.f32.mrf.mxu1 }
 0x585   : > { %969 = vrot.lane.b32.xlu1 %v962_v19, %s1531_s23 }
 0x5c9   : > { %v814_v20 = vpop.permute.xlu1 %813 }
 0x5ca   : > { %820 = vst.msk [vmem:[#allocation3] sm:$0xff] %vm819_vm7, %v814_v20 }
 0x5d1   : > { %v816_v21 = vpop.permute.xlu1 %815 }
 0x5d2   : > { %821 = vst.msk [vmem:[#allocation3 + $0x8] sm:$0xff] %vm819_vm7, %v816_v21 }
 0x5da   : > { %v893_v23 = vpop.permute.xlu2 %892 }
 0x5db   : > { %898 = vst.msk [vmem:[#allocation3 + $0x8] sm:$0xff] %vm896_vm8, %v893_v23 }
 0x5ea   : > { %v891_v25 = vpop.permute.xlu1 %890 }
 0x5eb   : > { %897 = vst.msk [vmem:[#allocation3] sm:$0xff] %vm896_vm8, %v891_v25  ;;  %v1435_v25 = vld [vmem:[%s1647_s18 + $0x18] sm:$0xff] }
 0x5ec   : > { %1171 = vmatpush.bf16.msra.mxu0 %v1435_v25 }
 0x5ef   : > { %v968_v26 = vpop.permute.xlu0 %967 }
 0x5f0   : > { %974 = vst.msk [vmem:[#allocation3] sm:$0xff] %vm973_vm9, %v968_v26  ;;  %v1434_v26 = vld [vmem:[%s1647_s18 + $0x10] sm:$0xff] }
 0x5f1   : > { %1172 = vmatpush.bf16.msra.mxu0 %v1434_v26 }
 0x5f7   : > { %v970_v27 = vpop.permute.xlu1 %969  ;;  %v976_v28 = vld [vmem:[#allocation3] sm:$0xff] }
 0x5f8   : > { %975 = vst.msk [vmem:[#allocation3 + $0x8] sm:$0xff] %vm973_vm9, %v970_v27  ;;  %v1433_v27 = vld [vmem:[%s1647_s18 + $0x8] sm:$0xff] }
 0x5f9   : > { %1173 = vmatpush.bf16.msra.mxu0 %v1433_v27  ;;  %v1230_v27 = vperm.slane %v1760_v9, 3 }
 0x5ff   : > { %v977_v30 = vld [vmem:[#allocation3 + $0x8] sm:$0xff] }
 0x600   : > { %v978_v29 = vpack.c.bf16 %v977_v30, %v976_v28  ;;  %v1464_v28 = vld [vmem:[%s546_s5] ss:$0 sm:$0xff] }
 0x602   : > { %1392 = vmatmul.msk.bf16.vlgmr.msra.gmra.mxu2 %vm616_vm1, %v978_v29  ;;  %v1432_v29 = vld [vmem:[%s1647_s18] sm:$0xff] }
 0x603   : > { %1174 = vmatpush.bf16.msra.mxu0 %v1432_v29 }
 0x685   : > { %v1006_v32 = vpop.f32.mrf.mxu2 }
 0x686   : > { %v1007_v33 = vadd.f32 %v1463_v31, %v1006_v32 }
 0x688   : > { %v1011_v34 = vadd.f32 %v1007_v33, %v1666_v4  ;;  %v1749_v4 = vsel %vm1024_vm10, %v1499_v41, %v1023_v45 }
 0x68a   : > { %v1013_v35 = vsel %vm616_vm1, %v1011_v34, 0.0 }
 0x68b   : > { %1014 = vadd.xlane.f32.xlu2 %v1013_v35 }
 0x68d   : > { %v1008_v36 = vpop.f32.mrf.mxu2 }
 0x68e   : > { %v1009_v37 = vadd.f32 %v1463_v31, %v1008_v36 }
 0x690   : > { %v1012_v38 = vadd.f32 %v1009_v37, %v1668_v5 }
 0x692   : > { %v1016_v39 = vsel %vm616_vm1, %v1012_v38, 0.0 }
 0x693   : > { %1017 = vadd.xlane.f32.xlu0 %v1016_v39 }
 0x6fe   : > { %v1015_v46 = vpop.xlane.xlu2 %1014 }
 0x6ff   : > { %v1026_v47 = vmul.f32 %v1749_v4, %v1015_v46 }
 0x701   : > { %v1028_v48 = vsub.f32 %v1011_v34, %v1026_v47 }
 0x703   : > { %v1030_v5 = vmul.f32 %v1028_v48, %v1028_v48 }
 0x705   : > { %v1032_v49 = vsel %vm616_vm1, %v1030_v5, 0.0 }
 0x706   : > { %v1018_v50 = vpop.xlane.xlu0 %1017  ;;  %1033 = vadd.xlane.f32.xlu1 %v1032_v49 }
 0x707   : > { %v1027_v51 = vmul.f32 %v1749_v4, %v1018_v50 }
 0x709   : > { %v1029_v52 = vsub.f32 %v1012_v38, %v1027_v51 }
 0x70b   : > { %v1031_v53 = vmul.f32 %v1029_v52, %v1029_v52 }
 0x70d   : > { %v1035_v54 = vsel %vm616_vm1, %v1031_v53, 0.0 }
 0x70e   : > { %1036 = vadd.xlane.f32.xlu2 %v1035_v54 }
 0x779   : > { %v1034_v56 = vpop.xlane.xlu1 %1033 }
 0x77a   : > { %v1038_v57 = vmul.f32 %v1034_v56, %v1749_v4 }
 0x77c   : > { %v1040_v58 = vadd.f32 1e-12, %v1038_v57 }
 0x77e   : > { %1500 = vrsqrt.f32 %v1040_v58  ;;  %vm1048_vm12 = vweird.f32 %v1040_v58 }
 0x781   : > { %v1037_v60 = vpop.xlane.xlu2 %1036 }
 0x782   : > { %v1039_v61 = vmul.f32 %v1037_v60, %v1749_v4 }
 0x784   : > { %v1501_v62 = vpop.eup %1500  ;;  %v1041_v63 = vadd.f32 1e-12, %v1039_v61 }
 0x785   : > { %v1043_v0 = vmul.f32 %v1501_v62, %v1040_v58  ;;  %vm1049_vm11 = vweird.f32 %v1501_v62 }
 0x786   : > { %1502 = vrsqrt.f32 %v1041_v63  ;;  %vm1050_vm13 = vmor %vm1048_vm12, %vm1049_vm11  ;;  %vm1058_vm15 = vweird.f32 %v1041_v63 }
 0x787   : > { %v1044_v12 = vmul.f32 %v1501_v62, %v1043_v0 }
 0x789   : > { %v1045_v1 = vmul.f32 0.5, %v1044_v12 }
 0x78b   : > { %v1046_v2 = vsub.f32 1.5, %v1045_v1 }
 0x78c   : > { %v1503_v3 = vpop.eup %1502 }
 0x78d   : > { %v1047_v6 = vmul.f32 %v1501_v62, %v1046_v2  ;;  %v1053_v7 = vmul.f32 %v1503_v3, %v1041_v63  ;;  %vm1059_vm14 = vweird.f32 %v1503_v3 }
 0x78e   : > { %vm1060_vm0 = vmor %vm1058_vm15, %vm1059_vm14 }
 0x78f   : > { %v1054_v8 = vmul.f32 %v1503_v3, %v1053_v7  ;;  %v1051_v10 = vsel %vm1050_vm13, %v1501_v62, %v1047_v6 }
 0x790   : > { %v1062_v15 = vmul.f32 %v1051_v10, %v1028_v48 }
 0x791   : > { %v1055_v11 = vmul.f32 0.5, %v1054_v8 }
 0x792   : > { %v1065_v19 = vmul.f32 %v1064_v14, %v1062_v15 }
 0x793   : > { %v1056_v13 = vsub.f32 1.5, %v1055_v11 }
 0x794   : > { %v1068_v22 = vadd.f32 %v1067_v18, %v1065_v19 }
 0x795   : > { %v1057_v16 = vmul.f32 %v1503_v3, %v1056_v13 }
 0x797   : > { %v1061_v17 = vsel %vm1060_vm0, %v1503_v3, %v1057_v16 }
 0x798   : > { %v1063_v20 = vmul.f32 %v1061_v17, %v1029_v52  ;;  %v1465_v52 = vld [vmem:[%s554_s21] ss:$0 sm:$0xff] }
 0x79a   : > { %v1066_v21 = vmul.f32 %v1064_v14, %v1063_v20 }
 0x79c   : > { %v1069_v23 = vadd.f32 %v1067_v18, %v1066_v21 }
 0x79e   : > { %v1084_v24 = vpack.c.bf16 %v1069_v23, %v1068_v22 }
 0x7a0   : > { %1401 = vmatmul.msk.bf16.vlgmr.msra.gmra.mxu3 %vm616_vm1, %v1084_v24  ;;  %v1227_v24 = vperm.slane %v1760_v9, 2 }
 0x823   : > { %v1112_v30 = vpop.f32.mrf.mxu3 }
 0x824   : > { %v1113_v31 = vadd.f32 %v1464_v28, %v1112_v30 }
 0x826   : > { %v1117_v32 = vmul.f32 %v1113_v31, %v1113_v31 }
 0x828   : > { %v1119_v33 = vmul.f32 %v1117_v32, %v1113_v31 }
 0x82a   : > { %v1121_v34 = vmul.f32 0.044715, %v1119_v33 }
 0x82b   : > { %v1114_v35 = vpop.f32.mrf.mxu3 }
 0x82c   : > { %v1123_v36 = vadd.f32 %v1121_v34, %v1113_v31  ;;  %v1115_v37 = vadd.f32 %v1464_v28, %v1114_v35 }
 0x82e   : > { %v1125_v38 = vmul.f32 0.7978846, %v1123_v36  ;;  %v1118_v39 = vmul.f32 %v1115_v37, %v1115_v37 }
 0x830   : > { %v1120_v40 = vmul.f32 %v1118_v39, %v1115_v37  ;;  %1504 = vtanh.f32 %v1125_v38 }
 0x832   : > { %v1122_v41 = vmul.f32 0.044715, %v1120_v40 }
 0x834   : > { %v1124_v42 = vadd.f32 %v1122_v41, %v1115_v37 }
 0x836   : > { %v1126_v43 = vmul.f32 0.7978846, %v1124_v42  ;;  %v1505_v44 = vpop.eup %1504 }
 0x837   : > { %v1129_v45 = vadd.f32 1.0, %v1505_v44 }
 0x838   : > { %1506 = vtanh.f32 %v1126_v43 }
 0x839   : > { %v1131_v47 = vmul.f32 0.5, %v1129_v45 }
 0x83b   : > { %v1133_v49 = vmul.f32 %v1131_v47, %v1113_v31 }
 0x83e   : > { %v1507_v46 = vpop.eup %1506 }
 0x83f   : > { %v1130_v48 = vadd.f32 1.0, %v1507_v46 }
 0x841   : > { %v1132_v5 = vmul.f32 0.5, %v1130_v48 }
 0x843   : > { %v1134_v50 = vmul.f32 %v1132_v5, %v1115_v37 }
 0x845   : > { %v1135_v51 = vpack.c.bf16 %v1134_v50, %v1133_v49 }
 0x847   : > { %1418 = vmatmul.msk.bf16.vlgmr.msra.gmra.mxu0 %vm1163_vm2, %v1135_v51 }
 0x8c4   : > { %v1176_v53 = vpop.f32.mrf.mxu0 }
 0x8c5   : > { %v1177_v54 = vadd.f32 %v1465_v52, %v1176_v53 }
 0x8c7   : > { %v1181_v55 = vadd.f32 %v1177_v54, %v1068_v22 }
 0x8c9   : > { %v1183_v56 = vsel %vm616_vm1, %v1181_v55, 0.0 }
 0x8ca   : > { %1184 = vadd.xlane.f32.xlu0 %v1183_v56 }
 0x8cc   : > { %v1178_v57 = vpop.f32.mrf.mxu0 }
 0x8cd   : > { %v1179_v58 = vadd.f32 %v1465_v52, %v1178_v57 }
 0x8cf   : > { %v1182_v59 = vadd.f32 %v1179_v58, %v1069_v23 }
 0x8d1   : > { %v1186_v60 = vsel %vm616_vm1, %v1182_v59, 0.0 }
 0x8d2   : > { %1187 = vadd.xlane.f32.xlu1 %v1186_v60 }
 0x93d   : > { %v1185_v61 = vpop.xlane.xlu0 %1184 }
 0x93e   : > { %v1189_v62 = vmul.f32 %v1185_v61, %v1749_v4 }
 0x940   : > { %v1191_v63 = vsub.f32 %v1181_v55, %v1189_v62 }
 0x942   : > { %v1193_v0 = vmul.f32 %v1191_v63, %v1191_v63 }
 0x944   : > { %v1195_v12 = vsel %vm616_vm1, %v1193_v0, 0.0 }
 0x945   : > { %v1188_v1 = vpop.xlane.xlu1 %1187  ;;  %1196 = vadd.xlane.f32.xlu2 %v1195_v12 }
 0x946   : > { %v1190_v2 = vmul.f32 %v1188_v1, %v1749_v4 }
 0x948   : > { %v1192_v3 = vsub.f32 %v1182_v59, %v1190_v2 }
 0x94a   : > { %v1194_v6 = vmul.f32 %v1192_v3, %v1192_v3 }
 0x94c   : > { %v1198_v7 = vsel %vm616_vm1, %v1194_v6, 0.0 }
 0x94d   : > { %1199 = vadd.xlane.f32.xlu0 %v1198_v7 }
 0x9b8   : > { %v1197_v8 = vpop.xlane.xlu2 %1196 }
 0x9b9   : > { %v1201_v10 = vmul.f32 %v1197_v8, %v1749_v4 }
 0x9bb   : > { %v1203_v11 = vadd.f32 1e-12, %v1201_v10 }
 0x9bd   : > { %1508 = vrsqrt.f32 %v1203_v11  ;;  %vm1211_vm4 = vweird.f32 %v1203_v11 }
 0x9c0   : > { %v1200_v13 = vpop.xlane.xlu0 %1199 }
 0x9c1   : > { %v1202_v14 = vmul.f32 %v1200_v13, %v1749_v4 }
 0x9c3   : > { %v1509_v15 = vpop.eup %1508  ;;  %v1204_v16 = vadd.f32 1e-12, %v1202_v14 }
 0x9c4   : > { %v1206_v17 = vmul.f32 %v1509_v15, %v1203_v11  ;;  %vm1212_vm3 = vweird.f32 %v1509_v15 }
 0x9c5   : > { %1510 = vrsqrt.f32 %v1204_v16  ;;  %vm1213_vm5 = vmor %vm1211_vm4, %vm1212_vm3  ;;  %vm1221_vm7 = vweird.f32 %v1204_v16 }
 0x9c6   : > { %v1207_v18 = vmul.f32 %v1509_v15, %v1206_v17 }
 0x9c8   : > { %v1208_v19 = vmul.f32 0.5, %v1207_v18 }
 0x9ca   : > { %v1209_v20 = vsub.f32 1.5, %v1208_v19 }
 0x9cb   : > { %v1511_v21 = vpop.eup %1510 }
 0x9cc   : > { %v1210_v22 = vmul.f32 %v1509_v15, %v1209_v20  ;;  %v1216_v23 = vmul.f32 %v1511_v21, %v1204_v16  ;;  %vm1222_vm6 = vweird.f32 %v1511_v21 }
 0x9cd   : > { %vm1223_vm8 = vmor %vm1221_vm7, %vm1222_vm6 }
 0x9ce   : > { %v1214_v25 = vsel %vm1213_vm5, %v1509_v15, %v1210_v22  ;;  %v1217_v26 = vmul.f32 %v1511_v21, %v1216_v23 }
 0x9cf   : > { %v1225_v4 = vmul.f32 %v1214_v25, %v1191_v63 }
 0x9d0   : > { %v1218_v28 = vmul.f32 0.5, %v1217_v26 }
 0x9d1   : > { %v1228_v30 = vmul.f32 %v1227_v24, %v1225_v4 }
 0x9d2   : > { %v1219_v29 = vsub.f32 1.5, %v1218_v28 }
 0x9d3   : > { %v1231_v31 = vadd.f32 %v1230_v27, %v1228_v30 }
 0x9d4   : > { %v1220_v32 = vmul.f32 %v1511_v21, %v1219_v29 }
 0x9d5   : > { %1233 = vst.msk [vmem:[#allocation2] sm:$0xff] %vm616_vm1, %v1231_v31 }
 0x9d6   : > { %v1224_v33 = vsel %vm1223_vm8, %v1511_v21, %v1220_v32 }
 0x9d7   : > { %v1226_v34 = vmul.f32 %v1224_v33, %v1192_v3 }
 0x9d9   : > { %v1229_v35 = vmul.f32 %v1227_v24, %v1226_v34  ;;  %1238 = sbr.rel (%p1419_p5) target bundleno = 2528 (0x9e0), region = 80 }
 0x9db   : > { %v1232_v36 = vadd.f32 %v1230_v27, %v1229_v35 }
 0x9dd   : > { %1234 = vst.msk [vmem:[#allocation2 + $0x8] sm:$0xff] %vm616_vm1, %v1232_v36 }
 0x9de   : > { %vm1239_vm9 = vcmask 254976  }
 0x9df   : > { %1240 = vst.msk [vmem:[%s1825_s25] sm:$0x3] %vm1239_vm9, %v1231_v31 }
 0x9e0 PF: > { %s1826_s22 = sld [smem:[#allocation4_spill]] }
 0x9e6   : > { %s23_s25 = sadd.s32 1, %s1826_s22  }
 0x9e7   : > { %p20_p6 = scmp.ge.s32.totalorder %s23_s25, 4  }
 0x9e9   :  { %22 = sbr.rel (!%p20_p6) target bundleno = 6 (0x6), region = 130 }

// kernel: multimodal_forward.3
= control target key start
LH: loop header
LB: loop body
LE: loop exit
PB: predicated region body
PF: predicated region fallthrough
CT: control target
= control target key end

     0   :  { %s1683_s29 = smov 0   ;;  %s1913_s0 = inlined_call_operand.vmem [shape: f32[10,32], index: 0, kind: input, shape index: {}]   ;;  %s1914_s1 = inlined_call_operand.vmem [shape: s32[10,1], index: 1, kind: input, shape index: {}]   ;;  %s1915_s2 = inlined_call_operand.vmem [shape: s32[1,10], index: 2, kind: input, shape index: {}]   ;;  %s1916_s3 = inlined_call_operand.vmem [shape: f32[1,10], index: 3, kind: input, shape index: {}]   ;;  %s1917_s4 = inlined_call_operand.vmem [shape: f32[2,32], index: 4, kind: input, shape index: {}]   ;;  %s1918_s5 = inlined_call_operand.vmem [shape: bf16[2,32,96], index: 5, kind: input, shape index: {}]   ;;  %s1919_s6 = inlined_call_operand.vmem [shape: f32[2,1,96], index: 6, kind: input, shape index: {}]   ;;  %s1920_s7 = inlined_call_operand.vmem [shape: bf16[2,32,32], index: 7, kind: input, shape index: {}]   ;;  %s1921_s8 = inlined_call_operand.vmem [shape: f32[2,1,32], index: 8, kind: input, shape index: {}]   ;;  %s1922_s9 = inlined_call_operand.vmem [shape: bf16[2,32,64], index: 9, kind: input, shape index: {}]   ;;  %s1923_s10 = inlined_call_operand.vmem [shape: f32[2,1,64], index: 10, kind: input, shape index: {}]   ;;  %s1924_s11 = inlined_call_operand.vmem [shape: bf16[2,64,32], index: 11, kind: input, shape index: {}]   ;;  %s1925_s12 = inlined_call_operand.vmem [shape: f32[2,1,32], index: 12, kind: input, shape index: {}]   ;;  %s1926_s13 = inlined_call_operand.vmem [shape: f32[2,4,32], index: 13, kind: input, shape index: {}]   ;;  %s1927_s14 = inlined_call_operand.vmem [shape: f32[2,32], index: 14, kind: output, shape index: {}]  }
   0x1   :  { %1930 = sst [smem:[#allocation5_spill]] %s1917_s4 }
   0x2   :  { %1931 = sst [smem:[#allocation6_spill]] %s1918_s5 }
   0x3   :  { %1932 = sst [smem:[#allocation7_spill]] %s1920_s7 }
   0x4   :  { %1933 = sst [smem:[#allocation8_spill]] %s1921_s8 }
   0x5   :  { %1934 = sst [smem:[#allocation9_spill]] %s1927_s14 }
   0x6 LB: > { %1935 = sst [smem:[#allocation4_spill]] %s1593_s29  ;;  %s1689_s30 = sadd.s32 4294967295, %s1593_s29   ;;  %s1593_s29 = sphi %s1683_s29, %s24_s29  }
   0x7   : > { %p1426_p0 = scmp.ge.s32.totalorder %s1593_s29, 1  ;;  %p478_p1 = scmp.lt.s32.totalorder %s1593_s29, 3 }
   0x9   : > { %p479_p2 = pnand %p1426_p0, %p478_p1 }
   0xa   : > { %p550_p3 = scmp.lt.s32.totalorder (!%p479_p2), %s1689_s30, 1  ;;  %s1936_s5 = sld [smem:[#allocation6_spill]] (!%p479_p2) }
   0xb   : > { %482 = sbr.rel (%p479_p2) target bundleno = 2766 (0xace), region = 76  ;;  %s1937_s7 = sld [smem:[#allocation7_spill]] (!%p479_p2) }
   0xc   : > { %p1436_p4 = scmp.ne.s32.totalorder (!%p479_p2), %s1689_s30, 0 }
  0x10   : > { %s1695_s15 = scalar_select %p550_p3, %s1689_s30, 1 }
  0x12   : > { %s1492_s16 = sshll.u32 %s1695_s15, 4  ;;  %s573_s20 = scalar_lea.vmem %s1923_s10, %s1695_s15 }
  0x13   : > { %s1705_s22 = scalar_lea.vmem %s1936_s5, %s1492_s16  ;;  %s1710_s25 = scalar_lea.vmem %s1937_s7, %s1492_s16 }
  0x14   : > { %s1719_s4 = scalar_lea.vmem %s1922_s9, %s1492_s16  ;;  %s1495_s21 = sshll.u32 %s1695_s15, 5 }
  0x15   : > { %s1729_s23 = scalar_lea.vmem %s1924_s11, %s1495_s21  ;;  %s581_s26 = scalar_lea.vmem %s1925_s12, %s1695_s15 }
  0x16   : > { %s1435_s27 = sshll.u32 %s1695_s15, 2  ;;  %590 = sbr.rel (%p1436_p4) target bundleno = 30 (0x1e), region = 80 }
  0x17   : > { %s1739_s14 = scalar_lea.vmem %s1926_s13, %s1435_s27 }
  0x1b   : > { %v591_v0 = vld [vmem:[%s1913_s0] sm:$0xff]  ;;  %vm593_vm0 = vcmask 261120   ;;  %v592_v1 = vld [vmem:[%s1913_s0 + $0x8] sm:$0x3]  ;;  %vm595_vm1 = vcmask 254976  }
  0x1c   : > { %594 = vst.msk [vmem:[#allocation2] sm:$0xff] %vm593_vm0, %v591_v0 }
  0x1d   : > { %596 = vst.msk [vmem:[#allocation2 + $0x8] sm:$0x3] %vm595_vm1, %v592_v1 }
  0x1e PF: > { %vm618_vm2 = vcmask 261120   ;;  %vm622_vm3 = vcmask 254976   ;;  %v1595_v6 = vmov 32.0   ;;  %v1497_v23 = vld [vmem:[%s1705_s22 + $0x8] sm:$0xff]  ;;  %v1496_v25 = vld [vmem:[%s1705_s22] sm:$0xff]  ;;  %s1939_s22 = scalar_lea.vmem %s1919_s6, %s1695_s15  ;;  %s1596_s28 = smov 96  }
  0x1f   : > { %1537 = vrcp.f32 %v1595_v6  ;;  %712 = vmatpush.bf16.msra.mxu0 %v1497_v23  ;;  %v1769_v42 = vld [vmem:[%s1739_s14] sm:$0xf]  ;;  %v598_v0 = vld [vmem:[%s1914_s1 + $0x8] sm:$0x3]  ;;  %v1597_v1 = vmov 0   ;;  %vm766_vm11 = vcmask 1043456  }
  0x20   : > { %v671_v45 = vperm.slane %v1769_v42, 0  ;;  %v674_v50 = vperm.slane %v1769_v42, 1  ;;  %v1531_v55 = vld [vmem:[%s1939_s22] ss:$0 sm:$0xff]  ;;  %1528 = vset.pattern.permute.xlu1 %v1597_v1  ;;  %1529 = vset.pattern.permute.xlu2 %v1597_v1  ;;  %vm762_vm12 = vcmask 64512   ;;  %vm784_vm14 = vcmask 80896  }
  0x21   : > { %v597_v63 = vld [vmem:[%s1914_s1] sm:$0xff]  ;;  %vm788_vm0 = vcmask 74752   ;;  %s1598_s5 = smov 64   ;;  %s1599_s19 = smov 112   ;;  %vm815_vm1 = vcmask 1044480  }
  0x22   : > { %s1600_s7 = smov 120   ;;  %s1601_s8 = smov 104  }
  0x23   : > { %v1748_v2 = vld [vmem:[#allocation2] sm:$0xff]  ;;  %713 = vmatpush.bf16.msra.mxu0 %v1496_v25  ;;  %s1602_s22 = smov 56   ;;  %s1604_s17 = smov 40  }
  0x24   : > { %v619_v3 = vsel %vm618_vm2, %v1748_v2, 0.0  ;;  %v1752_v4 = vld [vmem:[#allocation2 + $0x8] sm:$0x3]  ;;  %s1605_s18 = smov 8   ;;  %s1606_s21 = smov 16  }
  0x25   : > { %620 = vadd.xlane.f32.xlu0 %v619_v3  ;;  %v623_v5 = vsel %vm622_vm3, %v1752_v4, 0.0  ;;  %v1538_v7 = vpop.eup %1537  ;;  %s1607_s24 = smov 24   ;;  %s1940_s14 = sld [smem:[#allocation8_spill]] }
  0x26   : > { %v627_v8 = vmul.f32 32.0, %v1538_v7  ;;  %vm631_vm4 = vweird.f32 %v1538_v7  ;;  %p1489_p5 = scmp.ne.s32.totalorder %s1689_s30, 1 }
  0x28   : > { %v628_v9 = vsub.f32 1.0, %v627_v8 }
  0x2a   : > { %v629_v10 = vmul.f32 %v1538_v7, %v628_v9  ;;  %v1533_v9 = vld [vmem:[%s1916_s3] ss:$0 sm:$0xff] }
  0x2b   : > { %s1941_s29 = scalar_lea.vmem %s1940_s14, %s1695_s15 }
  0x2c   : > { %v630_v11 = vadd.f32 %v1538_v7, %v629_v10 }
  0x2d   : > { %624 = vadd.xlane.f32.xlu0 %v623_v5 }
  0x2e   : > { %v1756_v12 = vsel %vm631_vm4, %v1538_v7, %v630_v11  ;;  %v1532_v7 = vld [vmem:[%s1915_s2] ss:$0 sm:$0xff]  ;;  %vm834_vm4 = vcmask 58368  }
  0x98   : > { %v621_v13 = vpop.xlane.xlu0 %620 }
  0x99   : > { %v633_v14 = vmul.f32 %v1756_v12, %v621_v13 }
  0x9b   : > { %v635_v15 = vsub.f32 %v1748_v2, %v633_v14 }
  0x9d   : > { %v637_v16 = vmul.f32 %v635_v15, %v635_v15 }
  0x9f   : > { %v639_v17 = vsel %vm618_vm2, %v637_v16, 0.0 }
  0xa0   : > { %640 = vadd.xlane.f32.xlu1 %v639_v17  ;;  %v625_v18 = vpop.xlane.xlu0 %624 }
  0xa1   : > { %v634_v19 = vmul.f32 %v1756_v12, %v625_v18 }
  0xa3   : > { %v636_v20 = vsub.f32 %v1752_v4, %v634_v19 }
  0xa5   : > { %v638_v21 = vmul.f32 %v636_v20, %v636_v20 }
  0xa7   : > { %v642_v22 = vsel %vm622_vm3, %v638_v21, 0.0 }
  0xa8   : > { %643 = vadd.xlane.f32.xlu1 %v642_v22 }
  0xc1   : > { %601 = vperm.xlu1 %1528, %v597_v63  }
 0x113   : > { %v641_v24 = vpop.xlane.xlu1 %640 }
 0x114   : > { %v645_v26 = vmul.f32 %v641_v24, %v1756_v12 }
 0x116   : > { %v647_v27 = vadd.f32 1e-12, %v645_v26 }
 0x118   : > { %1539 = vrsqrt.f32 %v647_v27  ;;  %vm655_vm6 = vweird.f32 %v647_v27 }
 0x11b   : > { %v644_v28 = vpop.xlane.xlu1 %643 }
 0x11c   : > { %v646_v29 = vmul.f32 %v644_v28, %v1756_v12 }
 0x11e   : > { %v1540_v30 = vpop.eup %1539  ;;  %v648_v31 = vadd.f32 1e-12, %v646_v29 }
 0x11f   : > { %v650_v32 = vmul.f32 %v1540_v30, %v647_v27  ;;  %vm656_vm5 = vweird.f32 %v1540_v30 }
 0x120   : > { %1541 = vrsqrt.f32 %v648_v31  ;;  %vm657_vm7 = vmor %vm655_vm6, %vm656_vm5  ;;  %vm665_vm9 = vweird.f32 %v648_v31  ;;  %vm912_vm5 = vcmask 130112   ;;  %vm914_vm6 = vcmask 123968  }
 0x121   : > { %v651_v33 = vmul.f32 %v1540_v30, %v650_v32 }
 0x123   : > { %v652_v34 = vmul.f32 0.5, %v651_v33 }
 0x125   : > { %v653_v35 = vsub.f32 1.5, %v652_v34 }
 0x126   : > { %v1542_v36 = vpop.eup %1541 }
 0x127   : > { %v654_v37 = vmul.f32 %v1540_v30, %v653_v35  ;;  %v660_v38 = vmul.f32 %v1542_v36, %v648_v31  ;;  %vm666_vm8 = vweird.f32 %v1542_v36 }
 0x128   : > { %vm667_vm10 = vmor %vm665_vm9, %vm666_vm8  ;;  %vm994_vm8 = vcmask 189568   ;;  %vm1074_vm9 = vcmask 255168  }
 0x129   : > { %v661_v39 = vmul.f32 %v1542_v36, %v660_v38  ;;  %v658_v40 = vsel %vm657_vm7, %v1540_v30, %v654_v37  ;;  %vm992_vm7 = vcmask 195712  }
 0x12a   : > { %v669_v44 = vmul.f32 %v658_v40, %v635_v15 }
 0x12b   : > { %v662_v41 = vmul.f32 0.5, %v661_v39 }
 0x12c   : > { %v672_v49 = vmul.f32 %v671_v45, %v669_v44 }
 0x12d   : > { %v663_v43 = vsub.f32 1.5, %v662_v41 }
 0x12e   : > { %v675_v52 = vadd.f32 %v674_v50, %v672_v49 }
 0x12f   : > { %v664_v46 = vmul.f32 %v1542_v36, %v663_v43 }
 0x131   : > { %v668_v47 = vsel %vm667_vm10, %v1542_v36, %v664_v46  ;;  %vm1072_vm10 = vcmask 261312  }
 0x132   : > { %v670_v48 = vmul.f32 %v668_v47, %v636_v20 }
 0x133   : > { %v602_v8 = vpop.permute.xlu1 %601 }
 0x134   : > { %v673_v51 = vmul.f32 %v671_v45, %v670_v48  ;;  %vm607_vm13 = vcmp.eq.s32.totalorder %v602_v8, %v1532_v7 }
 0x135   : > { %v1796_v10 = vsel %vm607_vm13, %v1533_v9, -1e+09 }
 0x136   : > { %v676_v53 = vadd.f32 %v674_v50, %v673_v51 }
 0x138   : > { %v687_v54 = vpack.c.bf16 %v676_v53, %v675_v52 }
 0x13a   : > { %1445 = vmatmul.msk.bf16.vlgmr.msra.gmra.mxu0 %vm618_vm2, %v687_v54 }
 0x1b7   : > { %v715_v56 = vpop.f32.mrf.mxu0 }
 0x1b8   : > { %v716_v57 = vadd.f32 %v1531_v55, %v715_v56 }
 0x1ba   : > { %722 = vrot.lane.b32.xlu2 %v716_v57, %s1596_s28 }
 0x1bf   : > { %v717_v58 = vpop.f32.mrf.mxu0 }
 0x1c0   : > { %v718_v59 = vadd.f32 %v1531_v55, %v717_v58 }
 0x1c2   : > { %v1779_v60 = vpack.c.bf16 %v718_v59, %v716_v57  ;;  %724 = vrot.lane.b32.xlu2 %v718_v59, %s1596_s28  ;;  %s1603_s28 = smov 48  }
 0x1ca   : > { %604 = vperm.xlu2 %1529, %v598_v0  }
 0x214   : > { %v723_v61 = vpop.permute.xlu2 %722 }
 0x215   : > { %728 = vxpose.xlu0.b32.start [1/2] (short) (narrow) %v723_v61, 32 }
 0x21c   : > { %v725_v62 = vpop.permute.xlu2 %724 }
 0x21d   : > { %729 = vxpose.xlu0.b32.end [2/2] (short) (narrow) %v725_v62, 32 }
 0x224   : > { %v605_v13 = vpop.permute.xlu2 %604 }
 0x225   : > { %vm608_vm15 = vcmp.eq.s32.totalorder %v605_v13, %v1532_v7 }
 0x226   : > { %v1800_v16 = vsel %vm608_vm15, %v1533_v9, -1e+09 }
 0x284   : > { %1530 = vset.pattern.permute.xlu0 %v1597_v1 }
 0x2b9   : > { %v744_v3 = vpop.trf.xlu0 }
 0x2ba   : > { %v761_v5 = vpack.c.bf16 %v744_v3, %v744_v3 }
 0x2bc   : > { %v768_v6 = vsel %vm766_vm11, %v761_v5, 0 }
 0x2bd   : > { %777 = vmatpush.bf16.msra.mxu1 %v768_v6 }
 0x2c0   : > { %1446 = vmatmul.msk.bf16.vlgmr.msra.gmra.mxu1 %vm762_vm12, %v1779_v60 }
 0x2c1   : > { %v745_v20 = vpop.trf.xlu0 }
 0x2c2   : > { %v836_v21 = vpack.c.bf16 %v745_v20, %v745_v20 }
 0x2c4   : > { %v843_v22 = vsel %vm766_vm11, %v836_v21, 0 }
 0x2c5   : > { %852 = vmatpush.bf16.msra.mxu3 %v843_v22 }
 0x2c9   : > { %v746_v33 = vpop.trf.xlu0 }
 0x2ca   : > { %v916_v34 = vpack.c.bf16 %v746_v33, %v746_v33 }
 0x2cc   : > { %v923_v35 = vsel %vm766_vm11, %v916_v34, 0 }
 0x2d1   : > { %v747_v39 = vpop.trf.xlu0 }
 0x2d2   : > { %v996_v40 = vpack.c.bf16 %v747_v39, %v747_v39 }
 0x2d4   : > { %v1003_v41 = vsel %vm766_vm11, %v996_v40, 0 }
 0x2d5   : > { %1012 = vmatpush.bf16.msrb.mxu0 %v1003_v41 }
 0x33d   : > { %v779_v11 = vpop.f32.mrf.mxu1 }
 0x33e   : > { %v780_v14 = vadd.f32 %v779_v11, %v1796_v10 }
 0x340   : > { %v785_v15 = vsel %vm784_vm14, %v780_v14, -inf }
 0x341   : > { %786 = vmax.xlane.f32.xlu2 %v785_v15 }
 0x345   : > { %v781_v17 = vpop.f32.mrf.mxu1 }
 0x346   : > { %v782_v18 = vadd.f32 %v781_v17, %v1800_v16 }
 0x348   : > { %v789_v19 = vsel %vm788_vm0, %v782_v18, -inf }
 0x349   : > { %790 = vmax.xlane.f32.xlu1 %v789_v19 }
 0x359   : > { %810 = vrot.lane.b32.xlu2 %v1779_v60, %s1598_s5 }
 0x361   : > { %917 = vrot.lane.b32.xlu2 %v1779_v60, %s1599_s19 }
 0x362   : > { %837 = vrot.lane.b32.xlu1 %v1779_v60, %s1600_s7 }
 0x3b4   : > { %v787_v23 = vpop.xlane.xlu2 %786 }
 0x3b5   : > { %v792_v24 = vsub.f32 %v780_v14, %v787_v23 }
 0x3b7   : > { %v794_v25 = vmul.f32 1.442695, %v792_v24 }
 0x3b9   : > { %1543 = vpow2.f32 %v794_v25 }
 0x3bc   : > { %v811_v26 = vpop.permute.xlu2 %810  ;;  %v791_v27 = vpop.xlane.xlu1 %790 }
 0x3bd   : > { %v793_v28 = vsub.f32 %v782_v18, %v791_v27  ;;  %v817_v29 = vsel %vm815_vm1, %v811_v26, 0 }
 0x3be   : > { %826 = vmatpush.bf16.msra.mxu2 %v817_v29 }
 0x3bf   : > { %v1544_v30 = vpop.eup %1543  ;;  %v796_v31 = vmul.f32 1.442695, %v793_v28 }
 0x3c0   : > { %v798_v32 = vsel %vm784_vm14, %v1544_v30, 0.0 }
 0x3c1   : > { %1545 = vpow2.f32 %v796_v31  ;;  %799 = vadd.xlane.f32.xlu0 %v798_v32 }
 0x3c2   : > { %932 = vmatpush.bf16.msrb.mxu2 %v923_v35 }
 0x3c4   : > { %v918_v43 = vpop.permute.xlu2 %917 }
 0x3c7   : > { %v1546_v36 = vpop.eup %1545 }
 0x3c8   : > { %v801_v37 = vsel %vm788_vm0, %v1546_v36, 0.0 }
 0x3c9   : > { %802 = vadd.xlane.f32.xlu2 %v801_v37 }
 0x3d4   : > { %v838_v38 = vpop.permute.xlu1 %837 }
 0x3d5   : > { %1448 = vmatmul.msk.bf16.vlgmr.msra.gmra.mxu3 %vm762_vm12, %v838_v38 }
 0x3e1   : > { %997 = vrot.lane.b32.xlu2 %v1779_v60, %s1601_s8 }
 0x434   : > { %v800_v44 = vpop.xlane.xlu0 %799 }
 0x435   : > { %1547 = vrcp.f32 %v800_v44 }
 0x43b   : > { %v1548_v46 = vpop.eup %1547 }
 0x43c   : > { %v803_v45 = vpop.xlane.xlu2 %802  ;;  %v806_v49 = vmul.f32 %v1548_v46, %v1544_v30 }
 0x43d   : > { %1549 = vrcp.f32 %v803_v45 }
 0x443   : > { %v1550_v47 = vpop.eup %1549 }
 0x444   : > { %v998_v48 = vpop.permute.xlu2 %997  ;;  %v807_v50 = vmul.f32 %v1550_v47, %v1546_v36 }
 0x445   : > { %1452 = vmatmul.msk.bf16.vlgmr.msrb.gmra.mxu0 %vm762_vm12, %v998_v48 }
 0x446   : > { %v808_v51 = vpack.c.bf16 %v807_v50, %v806_v49 }
 0x448   : > { %1447 = vmatmul.msk.bf16.vlgmr.msra.gmra.mxu2 %vm784_vm14, %v808_v51 }
 0x458   : > { %v854_v52 = vpop.f32.mrf.mxu3  ;;  %1450 = vmatmul.msk.bf16.vlgmr.msrb.gmra.mxu2 %vm762_vm12, %v918_v43 }
 0x459   : > { %v855_v53 = vadd.f32 %v854_v52, %v1796_v10 }
 0x45b   : > { %v859_v54 = vsel %vm784_vm14, %v855_v53, -inf }
 0x45c   : > { %860 = vmax.xlane.f32.xlu1 %v859_v54 }
 0x460   : > { %v856_v55 = vpop.f32.mrf.mxu3 }
 0x461   : > { %v857_v56 = vadd.f32 %v856_v55, %v1800_v16 }
 0x463   : > { %v862_v57 = vsel %vm788_vm0, %v857_v56, -inf }
 0x464   : > { %863 = vmax.xlane.f32.xlu2 %v862_v57 }
 0x4c2   : > { %v1014_v0 = vpop.f32.mrf.mxu0 }
 0x4c3   : > { %v1015_v6 = vadd.f32 %v1014_v0, %v1796_v10 }
 0x4c5   : > { %v1019_v14 = vsel %vm784_vm14, %v1015_v6, -inf }
 0x4ca   : > { %v1016_v15 = vpop.f32.mrf.mxu0 }
 0x4cb   : > { %v828_v58 = vpop.f32.mrf.mxu2  ;;  %v1017_v18 = vadd.f32 %v1016_v15, %v1800_v16 }
 0x4cc   : > { %833 = vst.msk [vmem:[#allocation3] sm:$0xff] %vm762_vm12, %v828_v58 }
 0x4cf   : > { %v861_v61 = vpop.xlane.xlu1 %860 }
 0x4d0   : > { %v865_v1 = vsub.f32 %v855_v53, %v861_v61 }
 0x4d2   : > { %v867_v5 = vmul.f32 1.442695, %v865_v1 }
 0x4d3   : > { %v830_v59 = vpop.f32.mrf.mxu2 }
 0x4d4   : > { %835 = vst.msk [vmem:[#allocation3 + $0x8] sm:$0x3] %vm834_vm4, %v830_v59  ;;  %1551 = vpow2.f32 %v867_v5 }
 0x4d7   : > { %v864_v7 = vpop.xlane.xlu2 %863 }
 0x4d8   : > { %v866_v11 = vsub.f32 %v857_v56, %v864_v7 }
 0x4da   : > { %v869_v17 = vmul.f32 1.442695, %v866_v11  ;;  %v1552_v19 = vpop.eup %1551 }
 0x4db   : > { %v934_v62 = vpop.f32.mrf.mxu2  ;;  %v871_v20 = vsel %vm784_vm14, %v1552_v19, 0.0 }
 0x4dc   : > { %v935_v63 = vadd.f32 %v934_v62, %v1796_v10  ;;  %1553 = vpow2.f32 %v869_v17  ;;  %v1022_v10 = vsel %vm788_vm0, %v1017_v18, -inf }
 0x4de   : > { %v939_v3 = vsel %vm784_vm14, %v935_v63, -inf }
 0x4df   : > { %940 = vmax.xlane.f32.xlu1 %v939_v3 }
 0x4e2   : > { %v1554_v21 = vpop.eup %1553 }
 0x4e3   : > { %v936_v8 = vpop.f32.mrf.mxu2  ;;  %v874_v22 = vsel %vm788_vm0, %v1554_v21, 0.0 }
 0x4e4   : > { %v937_v9 = vadd.f32 %v936_v8, %v1800_v16 }
 0x4e6   : > { %v942_v13 = vsel %vm788_vm0, %v937_v9, -inf }
 0x4e7   : > { %943 = vmax.xlane.f32.xlu2 %v942_v13  ;;  %1020 = vmax.xlane.f32.xlu1 %v1019_v14 }
 0x4ef   : > { %1023 = vmax.xlane.f32.xlu2 %v1022_v10  ;;  %872 = vadd.xlane.f32.xlu1 %v871_v20  ;;  %v1498_v10 = vld [vmem:[%s1710_s25] sm:$0xff] }
 0x4f7   : > { %875 = vadd.xlane.f32.xlu2 %v874_v22 }
 0x508   : > { %882 = vrot.lane.b32.xlu1 %v1779_v60, %s1602_s22  ;;  %s1943_s22 = sld [smem:[#allocation9_spill]] (!%p1489_p5) }
 0x510   : > { %962 = vrot.lane.b32.xlu1 %v1779_v60, %s1603_s28 }
 0x552   : > { %v941_v23 = vpop.xlane.xlu1 %940 }
 0x553   : > { %v945_v16 = vsub.f32 %v935_v63, %v941_v23 }
 0x555   : > { %v947_v24 = vmul.f32 1.442695, %v945_v16 }
 0x557   : > { %1555 = vpow2.f32 %v947_v24 }
 0x55a   : > { %v944_v25 = vpop.xlane.xlu2 %943  ;;  %v1021_v26 = vpop.xlane.xlu1 %1020 }
 0x55b   : > { %v946_v27 = vsub.f32 %v937_v9, %v944_v25  ;;  %v1025_v28 = vsub.f32 %v1015_v6, %v1021_v26  ;;  %v1534_v26 = vld [vmem:[%s1941_s29] ss:$0 sm:$0xff] }
 0x55d   : > { %v1556_v29 = vpop.eup %1555  ;;  %v949_v30 = vmul.f32 1.442695, %v946_v27  ;;  %v1027_v31 = vmul.f32 1.442695, %v1025_v28 }
 0x55e   : > { %v951_v32 = vsel %vm784_vm14, %v1556_v29, 0.0 }
 0x55f   : > { %1557 = vpow2.f32 %v949_v30  ;;  %952 = vadd.xlane.f32.xlu2 %v951_v32 }
 0x560   : > { %1559 = vpow2.f32 %v1027_v31 }
 0x562   : > { %v1024_v33 = vpop.xlane.xlu2 %1023  ;;  %v873_v44 = vpop.xlane.xlu1 %872 }
 0x563   : > { %v1026_v34 = vsub.f32 %v1017_v18, %v1024_v33 }
 0x565   : > { %v1558_v35 = vpop.eup %1557  ;;  %v1029_v36 = vmul.f32 1.442695, %v1026_v34 }
 0x566   : > { %v1560_v37 = vpop.eup %1559  ;;  %v954_v38 = vsel %vm788_vm0, %v1558_v35, 0.0 }
 0x567   : > { %1561 = vpow2.f32 %v1029_v36  ;;  %955 = vadd.xlane.f32.xlu2 %v954_v38  ;;  %v1031_v39 = vsel %vm784_vm14, %v1560_v37, 0.0 }
 0x568   : > { %1032 = vadd.xlane.f32.xlu0 %v1031_v39 }
 0x56a   : > { %v876_v41 = vpop.xlane.xlu2 %875 }
 0x56b   : > { %1563 = vrcp.f32 %v876_v41 }
 0x56c   : > { %1565 = vrcp.f32 %v873_v44  ;;  %v1501_v44 = vld [vmem:[%s1719_s4 + $0x8] sm:$0xff] }
 0x56d   : > { %v1562_v40 = vpop.eup %1561 }
 0x56e   : > { %v1034_v43 = vsel %vm788_vm0, %v1562_v40, 0.0 }
 0x56f   : > { %1035 = vadd.xlane.f32.xlu2 %v1034_v43 }
 0x571   : > { %v1564_v45 = vpop.eup %1563 }
 0x572   : > { %v1566_v46 = vpop.eup %1565  ;;  %v880_v47 = vmul.f32 %v1564_v45, %v1554_v21 }
 0x573   : > { %v879_v49 = vmul.f32 %v1566_v46, %v1552_v19  ;;  %v1499_v19 = vld [vmem:[%s1710_s25 + $0x8] sm:$0xff] }
 0x574   : > { %1103 = vmatpush.bf16.msra.mxu2 %v1499_v19  ;;  %v1535_v19 = vld [vmem:[%s573_s20] ss:$0 sm:$0xff] }
 0x575   : > { %v881_v51 = vpack.c.bf16 %v880_v47, %v879_v49 }
 0x578   : > { %1104 = vmatpush.bf16.msra.mxu2 %v1498_v10  ;;  %v1502_v10 = vld [vmem:[%s1729_s23] sm:$0xff] }
 0x57a   : > { %v883_v48 = vpop.permute.xlu1 %882 }
 0x57b   : > { %v888_v50 = vsel %vm815_vm1, %v883_v48, 0  ;;  %v1500_v48 = vld [vmem:[%s1719_s4] sm:$0xff] }
 0x57c   : > { %1042 = vrot.lane.b32.xlu0 %v1779_v60, %s1604_s17  ;;  %897 = vmatpush.bf16.msrb.mxu1 %v888_v50 }
 0x57f   : > { %1449 = vmatmul.msk.bf16.vlgmr.msrb.gmra.mxu1 %vm784_vm14, %v881_v51 }
 0x582   : > { %v963_v52 = vpop.permute.xlu1 %962 }
 0x583   : > { %v968_v53 = vsel %vm815_vm1, %v963_v52, 0 }
 0x584   : > { %977 = vmatpush.bf16.msrb.mxu3 %v968_v53 }
 0x588   : > { %1202 = vmatpush.bf16.msra.mxu3 %v1501_v44 }
 0x58c   : > { %1203 = vmatpush.bf16.msra.mxu3 %v1500_v48 }
 0x5d2   : > { %v953_v54 = vpop.xlane.xlu2 %952 }
 0x5d3   : > { %1567 = vrcp.f32 %v953_v54 }
 0x5d9   : > { %v1568_v56 = vpop.eup %1567 }
 0x5da   : > { %v956_v55 = vpop.xlane.xlu2 %955  ;;  %v959_v58 = vmul.f32 %v1568_v56, %v1556_v29 }
 0x5db   : > { %1569 = vrcp.f32 %v956_v55  ;;  %v1033_v62 = vpop.xlane.xlu0 %1032 }
 0x5e1   : > { %v1570_v57 = vpop.eup %1569 }
 0x5e2   : > { %v960_v59 = vmul.f32 %v1570_v57, %v1558_v35  ;;  %v1036_v61 = vpop.xlane.xlu2 %1035 }
 0x5e3   : > { %1571 = vrcp.f32 %v1036_v61 }
 0x5e4   : > { %v961_v60 = vpack.c.bf16 %v960_v59, %v959_v58  ;;  %1573 = vrcp.f32 %v1033_v62 }
 0x5e6   : > { %1451 = vmatmul.msk.bf16.vlgmr.msrb.gmra.mxu3 %vm784_vm14, %v961_v60 }
 0x5e9   : > { %v1572_v63 = vpop.eup %1571 }
 0x5ea   : > { %v1574_v0 = vpop.eup %1573  ;;  %v1040_v1 = vmul.f32 %v1572_v63, %v1562_v40 }
 0x5eb   : > { %v1039_v5 = vmul.f32 %v1574_v0, %v1560_v37  ;;  %v1157_v0 = vperm.slane %v1769_v42, 2 }
 0x5ed   : > { %v1041_v7 = vpack.c.bf16 %v1040_v1, %v1039_v5 }
 0x5ee   : > { %v1043_v3 = vpop.permute.xlu0 %1042 }
 0x5ef   : > { %v1048_v6 = vsel %vm815_vm1, %v1043_v3, 0  ;;  %vm1256_vm1 = vcmask 523264  }
 0x5f0   : > { %1057 = vmatpush.bf16.msra.mxu1 %v1048_v6  ;;  %v1160_v6 = vperm.slane %v1769_v42, 3 }
 0x5f3   : > { %1453 = vmatmul.msk.bf16.vlgmr.msra.gmra.mxu1 %vm784_vm14, %v1041_v7 }
 0x5fc   : > { %v899_v8 = vpop.f32.mrf.mxu1 }
 0x5fd   : > { %906 = vrot.lane.b32.xlu2 %v899_v8, %s1605_s18 }
 0x604   : > { %v901_v9 = vpop.f32.mrf.mxu1 }
 0x605   : > { %908 = vrot.lane.b32.xlu1 %v901_v9, %s1605_s18 }
 0x657   : > { %v907_v11 = vpop.permute.xlu2 %906 }
 0x658   : > { %913 = vst.msk [vmem:[#allocation3] sm:$0xff] %vm912_vm5, %v907_v11 }
 0x669   : > { %v979_v13 = vpop.f32.mrf.mxu3 }
 0x66a   : > { %986 = vrot.lane.b32.xlu1 %v979_v13, %s1606_s21 }
 0x670   : > { %v1059_v14 = vpop.f32.mrf.mxu1 }
 0x671   : > { %v981_v15 = vpop.f32.mrf.mxu3 }
 0x672   : > { %1066 = vrot.lane.b32.xlu1 %v1059_v14, %s1607_s24  ;;  %988 = vrot.lane.b32.xlu0 %v981_v15, %s1606_s21  ;;  %v1505_v15 = vld [vmem:[%s1729_s23 + $0x18] sm:$0xff] }
 0x673   : > { %1264 = vmatpush.bf16.msra.mxu0 %v1505_v15 }
 0x677   : > { %v909_v17 = vpop.permute.xlu1 %908 }
 0x678   : > { %v1061_v18 = vpop.f32.mrf.mxu1  ;;  %915 = vst.msk [vmem:[#allocation3 + $0x8] sm:$0x3] %vm914_vm6, %v909_v17  ;;  %v1504_v17 = vld [vmem:[%s1729_s23 + $0x10] sm:$0xff] }
 0x679   : > { %1068 = vrot.lane.b32.xlu2 %v1061_v18, %s1607_s24  ;;  %1265 = vmatpush.bf16.msra.mxu0 %v1504_v17  ;;  %v1503_v18 = vld [vmem:[%s1729_s23 + $0x8] sm:$0xff] }
 0x67d   : > { %1266 = vmatpush.bf16.msra.mxu0 %v1503_v18 }
 0x681   : > { %1267 = vmatpush.bf16.msra.mxu0 %v1502_v10 }
 0x6d3   : > { %v1069_v23 = vpop.permute.xlu2 %1068 }
 0x6dc   : > { %v987_v20 = vpop.permute.xlu1 %986 }
 0x6dd   : > { %993 = vst.msk [vmem:[#allocation3] sm:$0xff] %vm992_vm7, %v987_v20 }
 0x6e4   : > { %v989_v21 = vpop.permute.xlu0 %988  ;;  %v1067_v22 = vpop.permute.xlu1 %1066 }
 0x6e5   : > { %995 = vst.msk [vmem:[#allocation3 + $0x8] sm:$0x3] %vm994_vm8, %v989_v21 }
 0x6e6   : > { %1075 = vst.msk [vmem:[#allocation3 + $0x8] sm:$0x3] %vm1074_vm9, %v1069_v23 }
 0x6e7   : > { %1073 = vst.msk [vmem:[#allocation3] sm:$0xff] %vm1072_vm10, %v1067_v22 }
 0x6ed   : > { %v1077_v16 = vld [vmem:[#allocation3 + $0x8] sm:$0x3] }
 0x6ee   : > { %v1076_v24 = vld [vmem:[#allocation3] sm:$0xff] }
 0x6ef   : > { %v1078_v25 = vpack.c.bf16 %v1077_v16, %v1076_v24 }
 0x6f1   : > { %1462 = vmatmul.msk.bf16.vlgmr.msra.gmra.mxu2 %vm618_vm2, %v1078_v25 }
 0x774   : > { %v1106_v27 = vpop.f32.mrf.mxu2 }
 0x775   : > { %v1107_v28 = vadd.f32 %v1534_v26, %v1106_v27 }
 0x777   : > { %v1855_v29 = vadd.f32 %v1107_v28, %v1748_v2 }
 0x779   : > { %v1113_v30 = vsel %vm618_vm2, %v1855_v29, 0.0 }
 0x77a   : > { %1114 = vadd.xlane.f32.xlu0 %v1113_v30 }
 0x77c   : > { %v1108_v31 = vpop.f32.mrf.mxu2 }
 0x77d   : > { %v1109_v32 = vadd.f32 %v1534_v26, %v1108_v31 }
 0x77f   : > { %v1860_v33 = vadd.f32 %v1109_v32, %v1752_v4 }
 0x781   : > { %v1116_v34 = vsel %vm622_vm3, %v1860_v33, 0.0 }
 0x782   : > { %1117 = vadd.xlane.f32.xlu1 %v1116_v34 }
 0x7ed   : > { %v1115_v35 = vpop.xlane.xlu0 %1114 }
 0x7ee   : > { %v1119_v36 = vmul.f32 %v1115_v35, %v1756_v12 }
 0x7f0   : > { %v1121_v2 = vsub.f32 %v1855_v29, %v1119_v36 }
 0x7f2   : > { %v1123_v37 = vmul.f32 %v1121_v2, %v1121_v2 }
 0x7f4   : > { %v1125_v38 = vsel %vm618_vm2, %v1123_v37, 0.0 }
 0x7f5   : > { %v1118_v39 = vpop.xlane.xlu1 %1117  ;;  %1126 = vadd.xlane.f32.xlu2 %v1125_v38 }
 0x7f6   : > { %v1120_v40 = vmul.f32 %v1118_v39, %v1756_v12 }
 0x7f8   : > { %v1122_v4 = vsub.f32 %v1860_v33, %v1120_v40 }
 0x7fa   : > { %v1124_v41 = vmul.f32 %v1122_v4, %v1122_v4 }
 0x7fc   : > { %v1128_v43 = vsel %vm622_vm3, %v1124_v41, 0.0  ;;  %v1536_v41 = vld [vmem:[%s581_s26] ss:$0 sm:$0xff]  ;;  %s1942_s26 = sld [smem:[#allocation5_spill]] (!%p1489_p5) }
 0x7fd   : > { %1129 = vadd.xlane.f32.xlu0 %v1128_v43 }
 0x868   : > { %v1127_v45 = vpop.xlane.xlu2 %1126 }
 0x869   : > { %v1131_v46 = vmul.f32 %v1127_v45, %v1756_v12 }
 0x86b   : > { %v1133_v47 = vadd.f32 1e-12, %v1131_v46 }
 0x86d   : > { %1575 = vrsqrt.f32 %v1133_v47  ;;  %vm1141_vm12 = vweird.f32 %v1133_v47 }
 0x870   : > { %v1130_v49 = vpop.xlane.xlu0 %1129 }
 0x871   : > { %v1132_v50 = vmul.f32 %v1130_v49, %v1756_v12 }
 0x873   : > { %v1576_v51 = vpop.eup %1575  ;;  %v1134_v52 = vadd.f32 1e-12, %v1132_v50 }
 0x874   : > { %v1136_v53 = vmul.f32 %v1576_v51, %v1133_v47  ;;  %vm1142_vm11 = vweird.f32 %v1576_v51 }
 0x875   : > { %1577 = vrsqrt.f32 %v1134_v52  ;;  %vm1143_vm13 = vmor %vm1141_vm12, %vm1142_vm11  ;;  %vm1151_vm15 = vweird.f32 %v1134_v52 }
 0x876   : > { %v1137_v54 = vmul.f32 %v1576_v51, %v1136_v53 }
 0x878   : > { %v1138_v55 = vmul.f32 0.5, %v1137_v54 }
 0x87a   : > { %v1139_v56 = vsub.f32 1.5, %v1138_v55 }
 0x87b   : > { %v1578_v57 = vpop.eup %1577 }
 0x87c   : > { %v1140_v58 = vmul.f32 %v1576_v51, %v1139_v56  ;;  %v1146_v59 = vmul.f32 %v1578_v57, %v1134_v52  ;;  %vm1152_vm14 = vweird.f32 %v1578_v57 }
 0x87d   : > { %vm1153_vm0 = vmor %vm1151_vm15, %vm1152_vm14 }
 0x87e   : > { %v1147_v61 = vmul.f32 %v1578_v57, %v1146_v59  ;;  %v1144_v62 = vsel %vm1143_vm13, %v1576_v51, %v1140_v58 }
 0x87f   : > { %v1155_v1 = vmul.f32 %v1144_v62, %v1121_v2 }
 0x880   : > { %v1148_v60 = vmul.f32 0.5, %v1147_v61 }
 0x881   : > { %v1158_v7 = vmul.f32 %v1157_v0, %v1155_v1 }
 0x882   : > { %v1149_v63 = vsub.f32 1.5, %v1148_v60 }
 0x883   : > { %v1161_v11 = vadd.f32 %v1160_v6, %v1158_v7 }
 0x884   : > { %v1150_v3 = vmul.f32 %v1578_v57, %v1149_v63 }
 0x886   : > { %v1154_v5 = vsel %vm1153_vm0, %v1578_v57, %v1150_v3 }
 0x887   : > { %v1156_v8 = vmul.f32 %v1154_v5, %v1122_v4 }
 0x889   : > { %v1159_v9 = vmul.f32 %v1157_v0, %v1156_v8 }
 0x88b   : > { %v1162_v13 = vadd.f32 %v1160_v6, %v1159_v9 }
 0x88d   : > { %v1177_v14 = vpack.c.bf16 %v1162_v13, %v1161_v11 }
 0x88f   : > { %1471 = vmatmul.msk.bf16.vlgmr.msra.gmra.mxu3 %vm618_vm2, %v1177_v14 }
 0x912   : > { %v1205_v42 = vpop.f32.mrf.mxu3 }
 0x913   : > { %v1206_v20 = vadd.f32 %v1535_v19, %v1205_v42 }
 0x915   : > { %v1210_v21 = vmul.f32 %v1206_v20, %v1206_v20 }
 0x917   : > { %v1212_v22 = vmul.f32 %v1210_v21, %v1206_v20 }
 0x919   : > { %v1214_v23 = vmul.f32 0.044715, %v1212_v22 }
 0x91a   : > { %v1207_v16 = vpop.f32.mrf.mxu3 }
 0x91b   : > { %v1216_v24 = vadd.f32 %v1214_v23, %v1206_v20  ;;  %v1208_v25 = vadd.f32 %v1535_v19, %v1207_v16 }
 0x91d   : > { %v1218_v26 = vmul.f32 0.7978846, %v1216_v24  ;;  %v1211_v27 = vmul.f32 %v1208_v25, %v1208_v25 }
 0x91f   : > { %v1213_v28 = vmul.f32 %v1211_v27, %v1208_v25  ;;  %1579 = vtanh.f32 %v1218_v26 }
 0x921   : > { %v1215_v30 = vmul.f32 0.044715, %v1213_v28 }
 0x923   : > { %v1217_v31 = vadd.f32 %v1215_v30, %v1208_v25 }
 0x925   : > { %v1219_v32 = vmul.f32 0.7978846, %v1217_v31  ;;  %v1580_v34 = vpop.eup %1579 }
 0x926   : > { %v1222_v35 = vadd.f32 1.0, %v1580_v34 }
 0x927   : > { %1581 = vtanh.f32 %v1219_v32 }
 0x928   : > { %v1224_v2 = vmul.f32 0.5, %v1222_v35 }
 0x92a   : > { %v1226_v39 = vmul.f32 %v1224_v2, %v1206_v20 }
 0x92d   : > { %v1582_v36 = vpop.eup %1581 }
 0x92e   : > { %v1223_v37 = vadd.f32 1.0, %v1582_v36 }
 0x930   : > { %v1225_v38 = vmul.f32 0.5, %v1223_v37 }
 0x932   : > { %v1227_v40 = vmul.f32 %v1225_v38, %v1208_v25 }
 0x934   : > { %v1228_v4 = vpack.c.bf16 %v1227_v40, %v1226_v39 }
 0x936   : > { %1488 = vmatmul.msk.bf16.vlgmr.msra.gmra.mxu0 %vm1256_vm1, %v1228_v4 }
 0x9b3   : > { %v1269_v43 = vpop.f32.mrf.mxu0 }
 0x9b4   : > { %v1270_v44 = vadd.f32 %v1536_v41, %v1269_v43 }
 0x9b6   : > { %v1274_v45 = vadd.f32 %v1270_v44, %v1855_v29 }
 0x9b8   : > { %1276 = vst.msk [vmem:[#allocation2] sm:$0xff] %vm618_vm2, %v1274_v45 }
 0x9bb   : > { %v1271_v46 = vpop.f32.mrf.mxu0 }
 0x9bc   : > { %v1272_v47 = vadd.f32 %v1536_v41, %v1271_v46  ;;  %1281 = sbr.rel (%p1489_p5) target bundleno = 2766 (0xace), region = 84 }
 0x9be   : > { %v1275_v48 = vadd.f32 %v1272_v47, %v1860_v33 }
 0x9c0   : > { %1277 = vst.msk [vmem:[#allocation2 + $0x8] sm:$0x3] %vm622_vm3, %v1275_v48 }
 0x9c1   : > { %v1284_v49 = vsel %vm622_vm3, %v1274_v45, 0.0  ;;  %v1583_v60 = vld [vmem:[%s1942_s26] ss:$0 sm:$0xff] }
 0x9c2   : > { %1285 = vadd.xlane.f32.xlu0 %v1284_v49 }
 0xa35   : > { %v1286_v50 = vpop.xlane.xlu0 %1285 }
 0xa36   : > { %v1287_v51 = vmul.f32 %v1286_v50, %v1756_v12 }
 0xa38   : > { %v1288_v52 = vsub.f32 %v1274_v45, %v1287_v51 }
 0xa3a   : > { %v1289_v53 = vmul.f32 %v1288_v52, %v1288_v52 }
 0xa3c   : > { %v1290_v29 = vsel %vm622_vm3, %v1289_v53, 0.0 }
 0xa3d   : > { %1291 = vadd.xlane.f32.xlu0 %v1290_v29 }
 0xab0   : > { %v1292_v54 = vpop.xlane.xlu0 %1291 }
 0xab1   : > { %v1293_v55 = vmul.f32 %v1292_v54, %v1756_v12  ;;  %v1584_v12 = vld [vmem:[%s1942_s26 + $0x1] ss:$0 sm:$0xff] }
 0xab3   : > { %v1294_v33 = vadd.f32 1e-12, %v1293_v55 }
 0xab5   : > { %1585 = vrsqrt.f32 %v1294_v33  ;;  %vm1301_vm4 = vweird.f32 %v1294_v33 }
 0xabb   : > { %v1586_v56 = vpop.eup %1585 }
 0xabc   : > { %v1296_v57 = vmul.f32 %v1586_v56, %v1294_v33  ;;  %vm1302_vm2 = vweird.f32 %v1586_v56 }
 0xabd   : > { %vm1303_vm5 = vmor %vm1301_vm4, %vm1302_vm2 }
 0xabe   : > { %v1297_v58 = vmul.f32 %v1586_v56, %v1296_v57 }
 0xac0   : > { %v1298_v59 = vmul.f32 0.5, %v1297_v58 }
 0xac2   : > { %v1299_v61 = vsub.f32 1.5, %v1298_v59 }
 0xac4   : > { %v1300_v62 = vmul.f32 %v1586_v56, %v1299_v61 }
 0xac6   : > { %v1304_v63 = vsel %vm1303_vm5, %v1586_v56, %v1300_v62 }
 0xac7   : > { %v1305_v0 = vmul.f32 %v1304_v63, %v1288_v52 }
 0xac9   : > { %v1307_v1 = vmul.f32 %v1583_v60, %v1305_v0 }
 0xacb   : > { %v1309_v3 = vadd.f32 %v1584_v12, %v1307_v1 }
 0xacd   : > { %1310 = vst.msk [vmem:[%s1943_s22] sm:$0x3] %vm622_vm3, %v1309_v3 }
 0xace PF: > { %s1944_s28 = sld [smem:[#allocation4_spill]] }
 0xad4   : > { %s24_s29 = sadd.s32 1, %s1944_s28  }
 0xad5   : > { %p21_p6 = scmp.ge.s32.totalorder %s24_s29, 4  }
 0xad7   :  { %23 = sbr.rel (!%p21_p6) target bundleno = 6 (0x6), region = 134 }

</bundles_post_ra>
